<compile_context>
chip_gen: v7x
topology: tpu7x:2x2x1
jax: 0.10.0
libtpu: 0.0.40
codegen_flags: <defaults>
</compile_context>

<pallas_src>
import jax
import jax.numpy as jnp
import numpy as np
from jax import lax
from jax.experimental import pallas as pl
from jax.experimental.pallas import tpu as pltpu

LEAK = 0.2       # LeakyReLU(0.2)
BN_EPS = 1e-5    # nn.BatchNorm2d default eps
K = 4            # conv kernel size
STRIDE = 2
PAD = 2
LANE = 128
HIDDEN = 1024    # AcDiscriminator embedding width


def _conv_out(n):
    return (n + 2 * PAD - K) // STRIDE + 1


def _ceil_to(x, m):
    return -(-x // m) * m


def _vmem_spec():
    return pl.BlockSpec(memory_space=pltpu.MemorySpace.VMEM)


# ------------------------------ fused kernel ------------------------------

def _make_kernel(N, C1, C2, P1p, P2p, n1_valid, n2_valid):
    """Build the fused forward kernel for one static configuration."""
    KK = K * K

    def _bn_lrelu(y, gamma, beta, mask, count):
        # Training-mode BatchNorm folded into one per-channel FMA, then LeakyReLU.
        # y: (C, N*Pp) f32, lane-dense; mask selects valid (non lane-padding) pixels.
        s = jnp.sum(y * mask, axis=1, keepdims=True)
        mean = s * (1.0 / count)
        d = (y - mean) * mask                               # two-pass var: no cancellation
        var = jnp.sum(d * d, axis=1, keepdims=True) * (1.0 / count)
        scale = gamma * lax.rsqrt(var + BN_EPS)             # rsqrt -> EUP slot
        shift = beta - mean * scale
        yn = y * scale + shift                              # single FMA pass (f32)
        return jnp.where(yn >= 0.0, yn, LEAK * yn)

    def kernel(p1_ref, w1_ref, g1_ref, be1_ref, m1_ref,
               s2_ref, w2_ref, g2_ref, be2_ref, m2_ref,
               pool_ref, wfc_ref, bfc_ref, wr_ref, br_ref,
               wo_ref, bo_ref, onehot_ref,
               out_ref, p2_scr):
        # ---- layer 1: one bf16 matmul over the whole batch (conv bias cancelled by BN)
        y1 = jnp.dot(w1_ref[...], p1_ref[...],
                     preferred_element_type=jnp.float32)            # (C1, N*P1p) f32
        y1 = _bn_lrelu(y1, g1_ref[...], be1_ref[...], m1_ref[...], n1_valid)
        y1b = y1.astype(jnp.bfloat16)
        y1_blk = [y1b[:, n * P1p:(n + 1) * P1p] for n in range(N)]  # per-image lane blocks

        # ---- layer-2 im2col: per-(tap, image) exact 0/1 gather matmuls fill the
        #      (KK*C1, N*P2p) scratch; every (8,128) store is tile-aligned.
        for t in range(KK):
            s_t = s2_ref[t]                                          # (P1p, P2p) bf16
            for n in range(N):
                g = jnp.dot(y1_blk[n], s_t,
                            preferred_element_type=jnp.float32)      # (C1, P2p) f32
                p2_scr[t * C1:(t + 1) * C1, n * P2p:(n + 1) * P2p] = g

        # ---- layer 2: ONE merged K = KK*C1 = 128 bf16 matmul (accumulation on the MXU)
        y2 = jnp.dot(w2_ref[...], p2_scr[...].astype(jnp.bfloat16),
                     preferred_element_type=jnp.float32)             # (C2, N*P2p) f32
        y2 = _bn_lrelu(y2, g2_ref[...], be2_ref[...], m2_ref[...], n2_valid)

        # ---- GlobalAvgPool as a matmul (pool matrix zeroes lane padding, /P2)
        pooled = jnp.dot(y2, pool_ref[...],
                         preferred_element_type=jnp.float32)         # (C2, N) f32

        # ---- Linear(D, 1024) + classifier heads, all on the MXU
        vecs = jnp.dot(wfc_ref[...], pooled.astype(jnp.bfloat16),
                       preferred_element_type=jnp.float32) + bfc_ref[...]   # (1024, N)
        vb = vecs.astype(jnp.bfloat16)
        real = jnp.dot(wr_ref[...], vb,
                       preferred_element_type=jnp.float32) + br_ref[...]    # (1, N)
        obj = jnp.dot(wo_ref[...], vb,
                      preferred_element_type=jnp.float32) + bo_ref[...]     # (num_obj, N)

        # ---- per-sample cross entropy (f32): logsumexp over classes minus label logit
        mx = jnp.max(obj, axis=0, keepdims=True)
        lse = mx + jnp.log(jnp.sum(jnp.exp(obj - mx), axis=0, keepdims=True))
        lab = jnp.sum(obj * onehot_ref[...], axis=0, keepdims=True)
        loss = lse - lab                                             # (1, N)

        # ---- single lane-dense (8,128) output slab
        out_ref[...] = jnp.zeros_like(out_ref)
        out_ref[0:1, 0:N] = real
        out_ref[1:2, 0:N] = loss

    return kernel


# --------------------------- one-time preparation ---------------------------

def prepare(params, N, H, W):
    """Parameter re-layouts and all kernel constants, hoisted out of the per-call path."""
    (w1, _b1, g1, be1), (w2, _b2, g2, be2) = params["cnn"]   # conv biases cancelled by BN
    wfc, bfc = params["fc"]
    wr, br = params["real"]
    wo, bo = params["obj"]
    C1, Cin = w1.shape[0], w1.shape[1]
    C2 = w2.shape[0]
    KK = K * K

    OH1, OW1 = _conv_out(H), _conv_out(W)
    OH2, OW2 = _conv_out(OH1), _conv_out(OW1)
    P1, P2 = OH1 * OW1, OH2 * OW2
    P1p, P2p = _ceil_to(P1, LANE), _ceil_to(P2, LANE)

    # Batch-independent 0/1 gather matrices (layer-2 im2col as matmuls), exact in bf16.
    s2 = np.zeros((KK, P1p, P2p), np.float32)
    for kh in range(K):
        for kw in range(K):
            t = kh * K + kw
            for p in range(OH2):
                for q in range(OW2):
                    ih = STRIDE * p + kh - PAD
                    iw = STRIDE * q + kw - PAD
                    if 0 <= ih < OH1 and 0 <= iw < OW1:
                        s2[t, ih * OW1 + iw, p * OW2 + q] = 1.0

    mask1 = np.zeros((1, N * P1p), np.float32)
    mask2 = np.zeros((1, N * P2p), np.float32)
    pool = np.zeros((N * P2p, N), np.float32)
    for n in range(N):
        mask1[0, n * P1p:n * P1p + P1] = 1.0
        mask2[0, n * P2p:n * P2p + P2] = 1.0
        pool[n * P2p:n * P2p + P2, n] = 1.0 / P2

    consts = dict(
        # conv weights, (kh, kw, c) flattening shared with the im2col / scratch layouts
        w1t=jnp.transpose(w1, (0, 2, 3, 1)).reshape(C1, KK * Cin).astype(jnp.bfloat16),
        g1=g1.reshape(C1, 1).astype(jnp.float32),
        be1=be1.reshape(C1, 1).astype(jnp.float32),
        w2f=jnp.transpose(w2, (0, 2, 3, 1)).reshape(C2, KK * C1).astype(jnp.bfloat16),
        g2=g2.reshape(C2, 1).astype(jnp.float32),
        be2=be2.reshape(C2, 1).astype(jnp.float32),
        # heads
        wfc=wfc.astype(jnp.bfloat16), bfc=bfc.reshape(HIDDEN, 1).astype(jnp.float32),
        wr=wr.astype(jnp.bfloat16), br=br.reshape(1, 1).astype(jnp.float32),
        wo=wo.astype(jnp.bfloat16), bo=bo.reshape(-1, 1).astype(jnp.float32),
        # structural constants
        s2=jnp.asarray(s2, jnp.bfloat16),
        mask1=jnp.asarray(mask1), mask2=jnp.asarray(mask2),
        pool=jnp.asarray(pool),
    )
    return consts


def _im2col_p1(x, P1p):
    """Layer-1 im2col in (K*K*Cin, N*P1p) layout; rows in (kh, kw, c) order (matches w1t),
    lane axis = image * P1p + output_pixel, zero-padded to a 128-lane multiple per image."""
    N, C, H, W = x.shape
    OH, OW = _conv_out(H), _conv_out(W)
    xp = jnp.pad(x, ((0, 0), (0, 0), (PAD, PAD), (PAD, PAD)))
    taps = []
    for kh in range(K):
        for kw in range(K):
            taps.append(xp[:, :, kh:kh + (OH - 1) * STRIDE + 1:STRIDE,
                               kw:kw + (OW - 1) * STRIDE + 1:STRIDE])
    p = jnp.stack(taps, axis=0)                  # (KK, N, C, OH, OW)
    p = jnp.transpose(p, (0, 2, 1, 3, 4))        # (KK, C, N, OH, OW)
    p = p.reshape(K * K * C, N, OH * OW)
    p = jnp.pad(p, ((0, 0), (0, 0), (0, P1p - OH * OW)))
    return p.reshape(K * K * C, N * P1p)


# ------------------------------ forward pass ------------------------------

def discriminator_forward(consts, object_crops, objs):
    """AcDiscriminator forward (conv stack + BN + LReLU + GAP + FC + heads + CE) as
    one fused pallas_call. Returns (real_scores (N,1), ac_loss scalar)."""
    N, Cin, H, W = object_crops.shape
    OH1, OW1 = _conv_out(H), _conv_out(W)
    OH2, OW2 = _conv_out(OH1), _conv_out(OW1)
    P1, P2 = OH1 * OW1, OH2 * OW2
    P1p, P2p = _ceil_to(P1, LANE), _ceil_to(P2, LANE)
    C1 = consts["w1t"].shape[0]
    C2 = consts["w2f"].shape[0]
    num_obj = consts["wo"].shape[0]
    KK = K * K

    # Per-call XLA glue: raw-input im2col (must be materialised somewhere) + label one-hot.
    p1 = _im2col_p1(object_crops, P1p).astype(jnp.bfloat16)            # (KK*Cin, N*P1p)
    onehot = jax.nn.one_hot(objs, num_obj, dtype=jnp.float32).T        # (num_obj, N)

    kernel = _make_kernel(N=N, C1=C1, C2=C2, P1p=P1p, P2p=P2p,
                          n1_valid=float(N * P1), n2_valid=float(N * P2))

    operands = (p1, consts["w1t"], consts["g1"], consts["be1"], consts["mask1"],
                consts["s2"], consts["w2f"], consts["g2"], consts["be2"], consts["mask2"],
                consts["pool"], consts["wfc"], consts["bfc"], consts["wr"], consts["br"],
                consts["wo"], consts["bo"], onehot)

    bytes_accessed = sum(int(np.prod(a.shape)) * a.dtype.itemsize for a in operands) + 8 * LANE * 4
    flops = 2 * (C1 * (KK * Cin) * N * P1p          # layer-1 matmul
                 + KK * N * C1 * P1p * P2p          # gather matmuls
                 + C2 * (KK * C1) * N * P2p         # merged layer-2 matmul
                 + C2 * N * P2p                     # pooling matmul
                 + HIDDEN * C2 * N                  # FC
                 + (1 + num_obj) * HIDDEN * N)      # heads
    transcendentals = num_obj * N + N + C1 + C2     # exp/log/rsqrt (hint only)

    slab = pl.pallas_call(
        kernel,
        out_shape=jax.ShapeDtypeStruct((8, LANE), jnp.float32),
        in_specs=[_vmem_spec()] * len(operands),
        out_specs=_vmem_spec(),
        scratch_shapes=[pltpu.VMEM((KK * C1, N * P2p), jnp.float32)],
        compiler_params=pltpu.CompilerParams(vmem_limit_bytes=32 * 1024 * 1024),
        cost_estimate=pl.CostEstimate(flops=flops, transcendentals=transcendentals,
                                      bytes_accessed=bytes_accessed),
    )(*operands)

    real_scores = slab[0, :N].reshape(N, 1)
    ac_loss = jnp.mean(slab[1, :N])
    return real_scores, ac_loss


_jitted_fwd = jax.jit(discriminator_forward)


def ac_crop_discriminator_forward(consts, imgs, objs, boxes, obj_to_img, object_crops=None):
    """AcCropDiscriminator.forward equivalent."""
    if object_crops is None:
        # TODO(synk): crop_bbox_batch (data-dependent bilinear ROI crop of imgs by boxes)
        # is not lowered to Pallas; pass pre-cropped object_crops instead.
        raise NotImplementedError("crop_bbox_batch not implemented; provide object_crops")
    real_scores, ac_loss = _jitted_fwd(consts, object_crops, objs)
    return real_scores, ac_loss, object_crops


# ------------------------------ params / reference ------------------------------

def init_params(key, num_objects=7):
    dims = [(3, 8), (8, 16)]   # arch='C4-8-2,C4-16-2', input_dim=3
    cnn = []
    for (cin, cout) in dims:
        key, kw_, kb_, kg_, ke_ = jax.random.split(key, 5)
        w = 0.05 * jax.random.normal(kw_, (cout, cin, K, K), jnp.float32)
        b = 0.05 * jax.random.normal(kb_, (cout,), jnp.float32)   # cancelled by train-mode BN
        gamma = 1.0 + 0.05 * jax.random.normal(kg_, (cout,), jnp.float32)
        beta = 0.05 * jax.random.normal(ke_, (cout,), jnp.float32)
        cnn.append((w, b, gamma, beta))
    D = dims[-1][1]
    key, k1, k2, k3, k4, k5, k6 = jax.random.split(key, 7)
    wfc = 0.05 * jax.random.normal(k1, (HIDDEN, D), jnp.float32)
    bfc = 0.05 * jax.random.normal(k2, (HIDDEN,), jnp.float32)
    wr = 0.05 * jax.random.normal(k3, (1, HIDDEN), jnp.float32)
    br = 0.05 * jax.random.normal(k4, (1,), jnp.float32)
    wo = 0.05 * jax.random.normal(k5, (num_objects, HIDDEN), jnp.float32)
    bo = 0.05 * jax.random.normal(k6, (num_objects,), jnp.float32)
    return {"cnn": cnn, "fc": (wfc, bfc), "real": (wr, br), "obj": (wo, bo)}


def reference(params, x, objs):
    """Pure-JAX f32 reference of the same forward."""
    h = x
    for (w, b, g, be) in params["cnn"]:
        h = lax.conv_general_dilated(h, w, (STRIDE, STRIDE), [(PAD, PAD), (PAD, PAD)],
                                     dimension_numbers=("NCHW", "OIHW", "NCHW"))
        h = h + b.reshape(1, -1, 1, 1)
        mean = jnp.mean(h, axis=(0, 2, 3), keepdims=True)
        var = jnp.mean((h - mean) ** 2, axis=(0, 2, 3), keepdims=True)
        h = (h - mean) / jnp.sqrt(var + BN_EPS) * g.reshape(1, -1, 1, 1) + be.reshape(1, -1, 1, 1)
        h = jnp.where(h >= 0, h, LEAK * h)
    v = jnp.mean(h, axis=(2, 3))                           # GlobalAvgPool -> (N, D)
    wfc, bfc = params["fc"]
    v = v @ wfc.T + bfc                                    # Linear(D, 1024)
    wr, br = params["real"]
    real = v @ wr.T + br                                   # (N, 1)
    wo, bo = params["obj"]
    logits = v @ wo.T + bo                                 # (N, num_obj)
    lse = jax.scipy.special.logsumexp(logits, axis=1)
    lab = jnp.take_along_axis(logits, objs[:, None], axis=1)[:, 0]
    return real, jnp.mean(lse - lab)


# ------------------------------ demo / test ------------------------------

if __name__ == "__main__":
    key = jax.random.PRNGKey(0)
    key, kx, ky = jax.random.split(key, 3)

    N, Cin, H, W = 2, 3, 16, 16
    NUM_OBJECTS = 7
    object_crops = jax.random.normal(kx, (N, Cin, H, W), jnp.float32)   # pre-cropped objects
    objs = jax.random.randint(ky, (N,), 0, NUM_OBJECTS)

    params = init_params(key, NUM_OBJECTS)
    consts = prepare(params, N, H, W)   # one-time constant / re-layout prep (hoisted glue)

    real, ac_loss, crops_out = ac_crop_discriminator_forward(
        consts, None, objs, None, None, object_crops=object_crops)
    real, ac_loss = jax.block_until_ready((real, ac_loss))
    assert real.shape == (N, 1), real.shape
    assert crops_out.shape == object_crops.shape

    real_ref, loss_ref = reference(params, object_crops, objs)
    real_ref, loss_ref = jax.block_until_ready((real_ref, loss_ref))

    # Tolerance covers bf16 MXU operands (exact 0/1 gathers, f32 accumulation / BN);
    # observed discrepancy is O(1e-3) while layout/indexing bugs would be O(1).
    np.testing.assert_allclose(np.asarray(real), np.asarray(real_ref), rtol=1e-2, atol=1e-2)
    np.testing.assert_allclose(np.asarray(ac_loss), np.asarray(loss_ref), rtol=1e-2, atol=1e-2)

    print("KERNEL_OK")
</pallas_src>

<mosaic_0001>
module attributes {stable_mosaic.version = 11 : i64} {
  func.func @kernel(%arg0: memref<48x256xbf16, #tpu.memory_space<vmem>>, %arg1: memref<8x48xbf16, #tpu.memory_space<vmem>>, %arg2: memref<8x1xf32, #tpu.memory_space<vmem>>, %arg3: memref<8x1xf32, #tpu.memory_space<vmem>>, %arg4: memref<1x256xf32, #tpu.memory_space<vmem>>, %arg5: memref<16x128x128xbf16, #tpu.memory_space<vmem>>, %arg6: memref<16x128xbf16, #tpu.memory_space<vmem>>, %arg7: memref<16x1xf32, #tpu.memory_space<vmem>>, %arg8: memref<16x1xf32, #tpu.memory_space<vmem>>, %arg9: memref<1x256xf32, #tpu.memory_space<vmem>>, %arg10: memref<256x2xf32, #tpu.memory_space<vmem>>, %arg11: memref<1024x16xbf16, #tpu.memory_space<vmem>>, %arg12: memref<1024x1xf32, #tpu.memory_space<vmem>>, %arg13: memref<1x1024xbf16, #tpu.memory_space<vmem>>, %arg14: memref<1x1xf32, #tpu.memory_space<vmem>>, %arg15: memref<7x1024xbf16, #tpu.memory_space<vmem>>, %arg16: memref<7x1xf32, #tpu.memory_space<vmem>>, %arg17: memref<7x2xf32, #tpu.memory_space<vmem>>, %arg18: memref<8x128xf32, #tpu.memory_space<vmem>>, %arg19: memref<128x256xf32, #tpu.memory_space<vmem>>) attributes {dimension_semantics = [], scalar_prefetch = 0 : i64, scratch_operands = 1 : i64, tpu.core_type = #tpu.core_type<tc>} {
    %c0 = arith.constant 0 : index
    %c0_0 = arith.constant 0 : index
    %0 = vector.load %arg1[%c0, %c0_0] : memref<8x48xbf16, #tpu.memory_space<vmem>>, vector<8x48xbf16>
    %c0_1 = arith.constant 0 : index
    %c0_2 = arith.constant 0 : index
    %1 = vector.load %arg0[%c0_1, %c0_2] : memref<48x256xbf16, #tpu.memory_space<vmem>>, vector<48x256xbf16>
    %cst = arith.constant dense<0.000000e+00> : vector<8x256xf32>
    %2 = tpu.matmul %0, %1, %cst {dimension_numbers = #tpu.dot_dimension_numbers<[1], [0], [0], [1], [0, 0, 1, 1], [], []>} : vector<8x48xbf16>, vector<48x256xbf16>, vector<8x256xf32> -> vector<8x256xf32>
    %c0_3 = arith.constant 0 : index
    %c0_4 = arith.constant 0 : index
    %3 = vector.load %arg2[%c0_3, %c0_4] : memref<8x1xf32, #tpu.memory_space<vmem>>, vector<8x1xf32>
    %c0_5 = arith.constant 0 : index
    %c0_6 = arith.constant 0 : index
    %4 = vector.load %arg3[%c0_5, %c0_6] : memref<8x1xf32, #tpu.memory_space<vmem>>, vector<8x1xf32>
    %c0_7 = arith.constant 0 : index
    %c0_8 = arith.constant 0 : index
    %5 = vector.load %arg4[%c0_7, %c0_8] : memref<1x256xf32, #tpu.memory_space<vmem>>, vector<1x256xf32>
    %6 = vector.broadcast %5 : vector<1x256xf32> to vector<8x256xf32>
    %7 = arith.mulf %2, %6 : vector<8x256xf32>
    %cst_9 = arith.constant dense<0.000000e+00> : vector<8xf32>
    %8 = vector.multi_reduction <add>, %7, %cst_9 [1] : vector<8x256xf32> to vector<8xf32>
    %9 = vector.shape_cast %8 : vector<8xf32> to vector<8x1xf32>
    %cst_10 = arith.constant 0.00617283955 : f32
    %10 = vector.broadcast %cst_10 : f32 to vector<8x1xf32>
    %11 = arith.mulf %9, %10 : vector<8x1xf32>
    %12 = vector.broadcast %11 : vector<8x1xf32> to vector<8x256xf32>
    %13 = arith.subf %2, %12 : vector<8x256xf32>
    %14 = vector.broadcast %5 : vector<1x256xf32> to vector<8x256xf32>
    %15 = arith.mulf %13, %14 : vector<8x256xf32>
    %16 = arith.mulf %15, %15 : vector<8x256xf32>
    %cst_11 = arith.constant dense<0.000000e+00> : vector<8xf32>
    %17 = vector.multi_reduction <add>, %16, %cst_11 [1] : vector<8x256xf32> to vector<8xf32>
    %18 = vector.shape_cast %17 : vector<8xf32> to vector<8x1xf32>
    %cst_12 = arith.constant 0.00617283955 : f32
    %19 = vector.broadcast %cst_12 : f32 to vector<8x1xf32>
    %20 = arith.mulf %18, %19 : vector<8x1xf32>
    %cst_13 = arith.constant 9.99999974E-6 : f32
    %21 = vector.broadcast %cst_13 : f32 to vector<8x1xf32>
    %22 = arith.addf %20, %21 : vector<8x1xf32>
    %23 = math.rsqrt %22 : vector<8x1xf32>
    %24 = arith.mulf %3, %23 : vector<8x1xf32>
    %25 = arith.mulf %11, %24 : vector<8x1xf32>
    %26 = arith.subf %4, %25 : vector<8x1xf32>
    %27 = vector.broadcast %24 : vector<8x1xf32> to vector<8x256xf32>
    %28 = arith.mulf %2, %27 : vector<8x256xf32>
    %29 = vector.broadcast %26 : vector<8x1xf32> to vector<8x256xf32>
    %30 = arith.addf %28, %29 : vector<8x256xf32>
    %cst_14 = arith.constant 0.000000e+00 : f32
    %31 = vector.broadcast %cst_14 : f32 to vector<8x256xf32>
    %32 = arith.cmpf oge, %30, %31 : vector<8x256xf32>
    %cst_15 = arith.constant 2.000000e-01 : f32
    %33 = vector.broadcast %cst_15 : f32 to vector<8x256xf32>
    %34 = arith.mulf %33, %30 : vector<8x256xf32>
    %35 = arith.select %32, %30, %34 : vector<8x256xi1>, vector<8x256xf32>
    %36 = arith.truncf %35 : vector<8x256xf32> to vector<8x256xbf16>
    %37 = vector.extract_strided_slice %36 {offsets = [0, 0], sizes = [8, 128], strides = [1, 1]} : vector<8x256xbf16> to vector<8x128xbf16>
    %38 = vector.extract_strided_slice %36 {offsets = [0, 128], sizes = [8, 128], strides = [1, 1]} : vector<8x256xbf16> to vector<8x128xbf16>
    %c0_16 = arith.constant 0 : index
    %c0_17 = arith.constant 0 : index
    %c0_18 = arith.constant 0 : index
    %39 = vector.load %arg5[%c0_16, %c0_17, %c0_18] : memref<16x128x128xbf16, #tpu.memory_space<vmem>>, vector<1x128x128xbf16>
    %40 = vector.shape_cast %39 : vector<1x128x128xbf16> to vector<128x128xbf16>
    %cst_19 = arith.constant dense<0.000000e+00> : vector<8x128xf32>
    %41 = tpu.matmul %37, %40, %cst_19 {dimension_numbers = #tpu.dot_dimension_numbers<[1], [0], [0], [1], [0, 0, 1, 1], [], []>} : vector<8x128xbf16>, vector<128x128xbf16>, vector<8x128xf32> -> vector<8x128xf32>
    %c0_20 = arith.constant 0 : index
    %c0_21 = arith.constant 0 : index
    %42 = vector.load %arg19[%c0_20, %c0_21] : memref<128x256xf32, #tpu.memory_space<vmem>>, vector<8x128xf32>
    tpu.vector_store %arg19[%c0_20, %c0_21], %41 {strides = array<i32>} : memref<128x256xf32, #tpu.memory_space<vmem>>, vector<8x128xf32>,
    %cst_22 = arith.constant dense<0.000000e+00> : vector<8x128xf32>
    %43 = tpu.matmul %38, %40, %cst_22 {dimension_numbers = #tpu.dot_dimension_numbers<[1], [0], [0], [1], [0, 0, 1, 1], [], []>} : vector<8x128xbf16>, vector<128x128xbf16>, vector<8x128xf32> -> vector<8x128xf32>
    %c0_23 = arith.constant 0 : index
    %c128 = arith.constant 128 : index
    %44 = vector.load %arg19[%c0_23, %c128] : memref<128x256xf32, #tpu.memory_space<vmem>>, vector<8x128xf32>
    tpu.vector_store %arg19[%c0_23, %c128], %43 {strides = array<i32>} : memref<128x256xf32, #tpu.memory_space<vmem>>, vector<8x128xf32>,
    %c1 = arith.constant 1 : index
    %c0_24 = arith.constant 0 : index
    %c0_25 = arith.constant 0 : index
    %45 = vector.load %arg5[%c1, %c0_24, %c0_25] : memref<16x128x128xbf16, #tpu.memory_space<vmem>>, vector<1x128x128xbf16>
    %46 = vector.shape_cast %45 : vector<1x128x128xbf16> to vector<128x128xbf16>
    %cst_26 = arith.constant dense<0.000000e+00> : vector<8x128xf32>
    %47 = tpu.matmul %37, %46, %cst_26 {dimension_numbers = #tpu.dot_dimension_numbers<[1], [0], [0], [1], [0, 0, 1, 1], [], []>} : vector<8x128xbf16>, vector<128x128xbf16>, vector<8x128xf32> -> vector<8x128xf32>
    %c8 = arith.constant 8 : index
    %c0_27 = arith.constant 0 : index
    %48 = vector.load %arg19[%c8, %c0_27] : memref<128x256xf32, #tpu.memory_space<vmem>>, vector<8x128xf32>
    tpu.vector_store %arg19[%c8, %c0_27], %47 {strides = array<i32>} : memref<128x256xf32, #tpu.memory_space<vmem>>, vector<8x128xf32>,
    %cst_28 = arith.constant dense<0.000000e+00> : vector<8x128xf32>
    %49 = tpu.matmul %38, %46, %cst_28 {dimension_numbers = #tpu.dot_dimension_numbers<[1], [0], [0], [1], [0, 0, 1, 1], [], []>} : vector<8x128xbf16>, vector<128x128xbf16>, vector<8x128xf32> -> vector<8x128xf32>
    %c8_29 = arith.constant 8 : index
    %c128_30 = arith.constant 128 : index
    %50 = vector.load %arg19[%c8_29, %c128_30] : memref<128x256xf32, #tpu.memory_space<vmem>>, vector<8x128xf32>
    tpu.vector_store %arg19[%c8_29, %c128_30], %49 {strides = array<i32>} : memref<128x256xf32, #tpu.memory_space<vmem>>, vector<8x128xf32>,
    %c2 = arith.constant 2 : index
    %c0_31 = arith.constant 0 : index
    %c0_32 = arith.constant 0 : index
    %51 = vector.load %arg5[%c2, %c0_31, %c0_32] : memref<16x128x128xbf16, #tpu.memory_space<vmem>>, vector<1x128x128xbf16>
    %52 = vector.shape_cast %51 : vector<1x128x128xbf16> to vector<128x128xbf16>
    %cst_33 = arith.constant dense<0.000000e+00> : vector<8x128xf32>
    %53 = tpu.matmul %37, %52, %cst_33 {dimension_numbers = #tpu.dot_dimension_numbers<[1], [0], [0], [1], [0, 0, 1, 1], [], []>} : vector<8x128xbf16>, vector<128x128xbf16>, vector<8x128xf32> -> vector<8x128xf32>
    %c16 = arith.constant 16 : index
    %c0_34 = arith.constant 0 : index
    %54 = vector.load %arg19[%c16, %c0_34] : memref<128x256xf32, #tpu.memory_space<vmem>>, vector<8x128xf32>
    tpu.vector_store %arg19[%c16, %c0_34], %53 {strides = array<i32>} : memref<128x256xf32, #tpu.memory_space<vmem>>, vector<8x128xf32>,
    %cst_35 = arith.constant dense<0.000000e+00> : vector<8x128xf32>
    %55 = tpu.matmul %38, %52, %cst_35 {dimension_numbers = #tpu.dot_dimension_numbers<[1], [0], [0], [1], [0, 0, 1, 1], [], []>} : vector<8x128xbf16>, vector<128x128xbf16>, vector<8x128xf32> -> vector<8x128xf32>
    %c16_36 = arith.constant 16 : index
    %c128_37 = arith.constant 128 : index
    %56 = vector.load %arg19[%c16_36, %c128_37] : memref<128x256xf32, #tpu.memory_space<vmem>>, vector<8x128xf32>
    tpu.vector_store %arg19[%c16_36, %c128_37], %55 {strides = array<i32>} : memref<128x256xf32, #tpu.memory_space<vmem>>, vector<8x128xf32>,
    %c3 = arith.constant 3 : index
    %c0_38 = arith.constant 0 : index
    %c0_39 = arith.constant 0 : index
    %57 = vector.load %arg5[%c3, %c0_38, %c0_39] : memref<16x128x128xbf16, #tpu.memory_space<vmem>>, vector<1x128x128xbf16>
    %58 = vector.shape_cast %57 : vector<1x128x128xbf16> to vector<128x128xbf16>
    %cst_40 = arith.constant dense<0.000000e+00> : vector<8x128xf32>
    %59 = tpu.matmul %37, %58, %cst_40 {dimension_numbers = #tpu.dot_dimension_numbers<[1], [0], [0], [1], [0, 0, 1, 1], [], []>} : vector<8x128xbf16>, vector<128x128xbf16>, vector<8x128xf32> -> vector<8x128xf32>
    %c24 = arith.constant 24 : index
    %c0_41 = arith.constant 0 : index
    %60 = vector.load %arg19[%c24, %c0_41] : memref<128x256xf32, #tpu.memory_space<vmem>>, vector<8x128xf32>
    tpu.vector_store %arg19[%c24, %c0_41], %59 {strides = array<i32>} : memref<128x256xf32, #tpu.memory_space<vmem>>, vector<8x128xf32>,
    %cst_42 = arith.constant dense<0.000000e+00> : vector<8x128xf32>
    %61 = tpu.matmul %38, %58, %cst_42 {dimension_numbers = #tpu.dot_dimension_numbers<[1], [0], [0], [1], [0, 0, 1, 1], [], []>} : vector<8x128xbf16>, vector<128x128xbf16>, vector<8x128xf32> -> vector<8x128xf32>
    %c24_43 = arith.constant 24 : index
    %c128_44 = arith.constant 128 : index
    %62 = vector.load %arg19[%c24_43, %c128_44] : memref<128x256xf32, #tpu.memory_space<vmem>>, vector<8x128xf32>
    tpu.vector_store %arg19[%c24_43, %c128_44], %61 {strides = array<i32>} : memref<128x256xf32, #tpu.memory_space<vmem>>, vector<8x128xf32>,
    %c4 = arith.constant 4 : index
    %c0_45 = arith.constant 0 : index
    %c0_46 = arith.constant 0 : index
    %63 = vector.load %arg5[%c4, %c0_45, %c0_46] : memref<16x128x128xbf16, #tpu.memory_space<vmem>>, vector<1x128x128xbf16>
    %64 = vector.shape_cast %63 : vector<1x128x128xbf16> to vector<128x128xbf16>
    %cst_47 = arith.constant dense<0.000000e+00> : vector<8x128xf32>
    %65 = tpu.matmul %37, %64, %cst_47 {dimension_numbers = #tpu.dot_dimension_numbers<[1], [0], [0], [1], [0, 0, 1, 1], [], []>} : vector<8x128xbf16>, vector<128x128xbf16>, vector<8x128xf32> -> vector<8x128xf32>
    %c32 = arith.constant 32 : index
    %c0_48 = arith.constant 0 : index
    %66 = vector.load %arg19[%c32, %c0_48] : memref<128x256xf32, #tpu.memory_space<vmem>>, vector<8x128xf32>
    tpu.vector_store %arg19[%c32, %c0_48], %65 {strides = array<i32>} : memref<128x256xf32, #tpu.memory_space<vmem>>, vector<8x128xf32>,
    %cst_49 = arith.constant dense<0.000000e+00> : vector<8x128xf32>
    %67 = tpu.matmul %38, %64, %cst_49 {dimension_numbers = #tpu.dot_dimension_numbers<[1], [0], [0], [1], [0, 0, 1, 1], [], []>} : vector<8x128xbf16>, vector<128x128xbf16>, vector<8x128xf32> -> vector<8x128xf32>
    %c32_50 = arith.constant 32 : index
    %c128_51 = arith.constant 128 : index
    %68 = vector.load %arg19[%c32_50, %c128_51] : memref<128x256xf32, #tpu.memory_space<vmem>>, vector<8x128xf32>
    tpu.vector_store %arg19[%c32_50, %c128_51], %67 {strides = array<i32>} : memref<128x256xf32, #tpu.memory_space<vmem>>, vector<8x128xf32>,
    %c5 = arith.constant 5 : index
    %c0_52 = arith.constant 0 : index
    %c0_53 = arith.constant 0 : index
    %69 = vector.load %arg5[%c5, %c0_52, %c0_53] : memref<16x128x128xbf16, #tpu.memory_space<vmem>>, vector<1x128x128xbf16>
    %70 = vector.shape_cast %69 : vector<1x128x128xbf16> to vector<128x128xbf16>
    %cst_54 = arith.constant dense<0.000000e+00> : vector<8x128xf32>
    %71 = tpu.matmul %37, %70, %cst_54 {dimension_numbers = #tpu.dot_dimension_numbers<[1], [0], [0], [1], [0, 0, 1, 1], [], []>} : vector<8x128xbf16>, vector<128x128xbf16>, vector<8x128xf32> -> vector<8x128xf32>
    %c40 = arith.constant 40 : index
    %c0_55 = arith.constant 0 : index
    %72 = vector.load %arg19[%c40, %c0_55] : memref<128x256xf32, #tpu.memory_space<vmem>>, vector<8x128xf32>
    tpu.vector_store %arg19[%c40, %c0_55], %71 {strides = array<i32>} : memref<128x256xf32, #tpu.memory_space<vmem>>, vector<8x128xf32>,
    %cst_56 = arith.constant dense<0.000000e+00> : vector<8x128xf32>
    %73 = tpu.matmul %38, %70, %cst_56 {dimension_numbers = #tpu.dot_dimension_numbers<[1], [0], [0], [1], [0, 0, 1, 1], [], []>} : vector<8x128xbf16>, vector<128x128xbf16>, vector<8x128xf32> -> vector<8x128xf32>
    %c40_57 = arith.constant 40 : index
    %c128_58 = arith.constant 128 : index
    %74 = vector.load %arg19[%c40_57, %c128_58] : memref<128x256xf32, #tpu.memory_space<vmem>>, vector<8x128xf32>
    tpu.vector_store %arg19[%c40_57, %c128_58], %73 {strides = array<i32>} : memref<128x256xf32, #tpu.memory_space<vmem>>, vector<8x128xf32>,
    %c6 = arith.constant 6 : index
    %c0_59 = arith.constant 0 : index
    %c0_60 = arith.constant 0 : index
    %75 = vector.load %arg5[%c6, %c0_59, %c0_60] : memref<16x128x128xbf16, #tpu.memory_space<vmem>>, vector<1x128x128xbf16>
    %76 = vector.shape_cast %75 : vector<1x128x128xbf16> to vector<128x128xbf16>
    %cst_61 = arith.constant dense<0.000000e+00> : vector<8x128xf32>
    %77 = tpu.matmul %37, %76, %cst_61 {dimension_numbers = #tpu.dot_dimension_numbers<[1], [0], [0], [1], [0, 0, 1, 1], [], []>} : vector<8x128xbf16>, vector<128x128xbf16>, vector<8x128xf32> -> vector<8x128xf32>
    %c48 = arith.constant 48 : index
    %c0_62 = arith.constant 0 : index
    %78 = vector.load %arg19[%c48, %c0_62] : memref<128x256xf32, #tpu.memory_space<vmem>>, vector<8x128xf32>
    tpu.vector_store %arg19[%c48, %c0_62], %77 {strides = array<i32>} : memref<128x256xf32, #tpu.memory_space<vmem>>, vector<8x128xf32>,
    %cst_63 = arith.constant dense<0.000000e+00> : vector<8x128xf32>
    %79 = tpu.matmul %38, %76, %cst_63 {dimension_numbers = #tpu.dot_dimension_numbers<[1], [0], [0], [1], [0, 0, 1, 1], [], []>} : vector<8x128xbf16>, vector<128x128xbf16>, vector<8x128xf32> -> vector<8x128xf32>
    %c48_64 = arith.constant 48 : index
    %c128_65 = arith.constant 128 : index
    %80 = vector.load %arg19[%c48_64, %c128_65] : memref<128x256xf32, #tpu.memory_space<vmem>>, vector<8x128xf32>
    tpu.vector_store %arg19[%c48_64, %c128_65], %79 {strides = array<i32>} : memref<128x256xf32, #tpu.memory_space<vmem>>, vector<8x128xf32>,
    %c7 = arith.constant 7 : index
    %c0_66 = arith.constant 0 : index
    %c0_67 = arith.constant 0 : index
    %81 = vector.load %arg5[%c7, %c0_66, %c0_67] : memref<16x128x128xbf16, #tpu.memory_space<vmem>>, vector<1x128x128xbf16>
    %82 = vector.shape_cast %81 : vector<1x128x128xbf16> to vector<128x128xbf16>
    %cst_68 = arith.constant dense<0.000000e+00> : vector<8x128xf32>
    %83 = tpu.matmul %37, %82, %cst_68 {dimension_numbers = #tpu.dot_dimension_numbers<[1], [0], [0], [1], [0, 0, 1, 1], [], []>} : vector<8x128xbf16>, vector<128x128xbf16>, vector<8x128xf32> -> vector<8x128xf32>
    %c56 = arith.constant 56 : index
    %c0_69 = arith.constant 0 : index
    %84 = vector.load %arg19[%c56, %c0_69] : memref<128x256xf32, #tpu.memory_space<vmem>>, vector<8x128xf32>
    tpu.vector_store %arg19[%c56, %c0_69], %83 {strides = array<i32>} : memref<128x256xf32, #tpu.memory_space<vmem>>, vector<8x128xf32>,
    %cst_70 = arith.constant dense<0.000000e+00> : vector<8x128xf32>
    %85 = tpu.matmul %38, %82, %cst_70 {dimension_numbers = #tpu.dot_dimension_numbers<[1], [0], [0], [1], [0, 0, 1, 1], [], []>} : vector<8x128xbf16>, vector<128x128xbf16>, vector<8x128xf32> -> vector<8x128xf32>
    %c56_71 = arith.constant 56 : index
    %c128_72 = arith.constant 128 : index
    %86 = vector.load %arg19[%c56_71, %c128_72] : memref<128x256xf32, #tpu.memory_space<vmem>>, vector<8x128xf32>
    tpu.vector_store %arg19[%c56_71, %c128_72], %85 {strides = array<i32>} : memref<128x256xf32, #tpu.memory_space<vmem>>, vector<8x128xf32>,
    %c8_73 = arith.constant 8 : index
    %c0_74 = arith.constant 0 : index
    %c0_75 = arith.constant 0 : index
    %87 = vector.load %arg5[%c8_73, %c0_74, %c0_75] : memref<16x128x128xbf16, #tpu.memory_space<vmem>>, vector<1x128x128xbf16>
    %88 = vector.shape_cast %87 : vector<1x128x128xbf16> to vector<128x128xbf16>
    %cst_76 = arith.constant dense<0.000000e+00> : vector<8x128xf32>
    %89 = tpu.matmul %37, %88, %cst_76 {dimension_numbers = #tpu.dot_dimension_numbers<[1], [0], [0], [1], [0, 0, 1, 1], [], []>} : vector<8x128xbf16>, vector<128x128xbf16>, vector<8x128xf32> -> vector<8x128xf32>
    %c64 = arith.constant 64 : index
    %c0_77 = arith.constant 0 : index
    %90 = vector.load %arg19[%c64, %c0_77] : memref<128x256xf32, #tpu.memory_space<vmem>>, vector<8x128xf32>
    tpu.vector_store %arg19[%c64, %c0_77], %89 {strides = array<i32>} : memref<128x256xf32, #tpu.memory_space<vmem>>, vector<8x128xf32>,
    %cst_78 = arith.constant dense<0.000000e+00> : vector<8x128xf32>
    %91 = tpu.matmul %38, %88, %cst_78 {dimension_numbers = #tpu.dot_dimension_numbers<[1], [0], [0], [1], [0, 0, 1, 1], [], []>} : vector<8x128xbf16>, vector<128x128xbf16>, vector<8x128xf32> -> vector<8x128xf32>
    %c64_79 = arith.constant 64 : index
    %c128_80 = arith.constant 128 : index
    %92 = vector.load %arg19[%c64_79, %c128_80] : memref<128x256xf32, #tpu.memory_space<vmem>>, vector<8x128xf32>
    tpu.vector_store %arg19[%c64_79, %c128_80], %91 {strides = array<i32>} : memref<128x256xf32, #tpu.memory_space<vmem>>, vector<8x128xf32>,
    %c9 = arith.constant 9 : index
    %c0_81 = arith.constant 0 : index
    %c0_82 = arith.constant 0 : index
    %93 = vector.load %arg5[%c9, %c0_81, %c0_82] : memref<16x128x128xbf16, #tpu.memory_space<vmem>>, vector<1x128x128xbf16>
    %94 = vector.shape_cast %93 : vector<1x128x128xbf16> to vector<128x128xbf16>
    %cst_83 = arith.constant dense<0.000000e+00> : vector<8x128xf32>
    %95 = tpu.matmul %37, %94, %cst_83 {dimension_numbers = #tpu.dot_dimension_numbers<[1], [0], [0], [1], [0, 0, 1, 1], [], []>} : vector<8x128xbf16>, vector<128x128xbf16>, vector<8x128xf32> -> vector<8x128xf32>
    %c72 = arith.constant 72 : index
    %c0_84 = arith.constant 0 : index
    %96 = vector.load %arg19[%c72, %c0_84] : memref<128x256xf32, #tpu.memory_space<vmem>>, vector<8x128xf32>
    tpu.vector_store %arg19[%c72, %c0_84], %95 {strides = array<i32>} : memref<128x256xf32, #tpu.memory_space<vmem>>, vector<8x128xf32>,
    %cst_85 = arith.constant dense<0.000000e+00> : vector<8x128xf32>
    %97 = tpu.matmul %38, %94, %cst_85 {dimension_numbers = #tpu.dot_dimension_numbers<[1], [0], [0], [1], [0, 0, 1, 1], [], []>} : vector<8x128xbf16>, vector<128x128xbf16>, vector<8x128xf32> -> vector<8x128xf32>
    %c72_86 = arith.constant 72 : index
    %c128_87 = arith.constant 128 : index
    %98 = vector.load %arg19[%c72_86, %c128_87] : memref<128x256xf32, #tpu.memory_space<vmem>>, vector<8x128xf32>
    tpu.vector_store %arg19[%c72_86, %c128_87], %97 {strides = array<i32>} : memref<128x256xf32, #tpu.memory_space<vmem>>, vector<8x128xf32>,
    %c10 = arith.constant 10 : index
    %c0_88 = arith.constant 0 : index
    %c0_89 = arith.constant 0 : index
    %99 = vector.load %arg5[%c10, %c0_88, %c0_89] : memref<16x128x128xbf16, #tpu.memory_space<vmem>>, vector<1x128x128xbf16>
    %100 = vector.shape_cast %99 : vector<1x128x128xbf16> to vector<128x128xbf16>
    %cst_90 = arith.constant dense<0.000000e+00> : vector<8x128xf32>
    %101 = tpu.matmul %37, %100, %cst_90 {dimension_numbers = #tpu.dot_dimension_numbers<[1], [0], [0], [1], [0, 0, 1, 1], [], []>} : vector<8x128xbf16>, vector<128x128xbf16>, vector<8x128xf32> -> vector<8x128xf32>
    %c80 = arith.constant 80 : index
    %c0_91 = arith.constant 0 : index
    %102 = vector.load %arg19[%c80, %c0_91] : memref<128x256xf32, #tpu.memory_space<vmem>>, vector<8x128xf32>
    tpu.vector_store %arg19[%c80, %c0_91], %101 {strides = array<i32>} : memref<128x256xf32, #tpu.memory_space<vmem>>, vector<8x128xf32>,
    %cst_92 = arith.constant dense<0.000000e+00> : vector<8x128xf32>
    %103 = tpu.matmul %38, %100, %cst_92 {dimension_numbers = #tpu.dot_dimension_numbers<[1], [0], [0], [1], [0, 0, 1, 1], [], []>} : vector<8x128xbf16>, vector<128x128xbf16>, vector<8x128xf32> -> vector<8x128xf32>
    %c80_93 = arith.constant 80 : index
    %c128_94 = arith.constant 128 : index
    %104 = vector.load %arg19[%c80_93, %c128_94] : memref<128x256xf32, #tpu.memory_space<vmem>>, vector<8x128xf32>
    tpu.vector_store %arg19[%c80_93, %c128_94], %103 {strides = array<i32>} : memref<128x256xf32, #tpu.memory_space<vmem>>, vector<8x128xf32>,
    %c11 = arith.constant 11 : index
    %c0_95 = arith.constant 0 : index
    %c0_96 = arith.constant 0 : index
    %105 = vector.load %arg5[%c11, %c0_95, %c0_96] : memref<16x128x128xbf16, #tpu.memory_space<vmem>>, vector<1x128x128xbf16>
    %106 = vector.shape_cast %105 : vector<1x128x128xbf16> to vector<128x128xbf16>
    %cst_97 = arith.constant dense<0.000000e+00> : vector<8x128xf32>
    %107 = tpu.matmul %37, %106, %cst_97 {dimension_numbers = #tpu.dot_dimension_numbers<[1], [0], [0], [1], [0, 0, 1, 1], [], []>} : vector<8x128xbf16>, vector<128x128xbf16>, vector<8x128xf32> -> vector<8x128xf32>
    %c88 = arith.constant 88 : index
    %c0_98 = arith.constant 0 : index
    %108 = vector.load %arg19[%c88, %c0_98] : memref<128x256xf32, #tpu.memory_space<vmem>>, vector<8x128xf32>
    tpu.vector_store %arg19[%c88, %c0_98], %107 {strides = array<i32>} : memref<128x256xf32, #tpu.memory_space<vmem>>, vector<8x128xf32>,
    %cst_99 = arith.constant dense<0.000000e+00> : vector<8x128xf32>
    %109 = tpu.matmul %38, %106, %cst_99 {dimension_numbers = #tpu.dot_dimension_numbers<[1], [0], [0], [1], [0, 0, 1, 1], [], []>} : vector<8x128xbf16>, vector<128x128xbf16>, vector<8x128xf32> -> vector<8x128xf32>
    %c88_100 = arith.constant 88 : index
    %c128_101 = arith.constant 128 : index
    %110 = vector.load %arg19[%c88_100, %c128_101] : memref<128x256xf32, #tpu.memory_space<vmem>>, vector<8x128xf32>
    tpu.vector_store %arg19[%c88_100, %c128_101], %109 {strides = array<i32>} : memref<128x256xf32, #tpu.memory_space<vmem>>, vector<8x128xf32>,
    %c12 = arith.constant 12 : index
    %c0_102 = arith.constant 0 : index
    %c0_103 = arith.constant 0 : index
    %111 = vector.load %arg5[%c12, %c0_102, %c0_103] : memref<16x128x128xbf16, #tpu.memory_space<vmem>>, vector<1x128x128xbf16>
    %112 = vector.shape_cast %111 : vector<1x128x128xbf16> to vector<128x128xbf16>
    %cst_104 = arith.constant dense<0.000000e+00> : vector<8x128xf32>
    %113 = tpu.matmul %37, %112, %cst_104 {dimension_numbers = #tpu.dot_dimension_numbers<[1], [0], [0], [1], [0, 0, 1, 1], [], []>} : vector<8x128xbf16>, vector<128x128xbf16>, vector<8x128xf32> -> vector<8x128xf32>
    %c96 = arith.constant 96 : index
    %c0_105 = arith.constant 0 : index
    %114 = vector.load %arg19[%c96, %c0_105] : memref<128x256xf32, #tpu.memory_space<vmem>>, vector<8x128xf32>
    tpu.vector_store %arg19[%c96, %c0_105], %113 {strides = array<i32>} : memref<128x256xf32, #tpu.memory_space<vmem>>, vector<8x128xf32>,
    %cst_106 = arith.constant dense<0.000000e+00> : vector<8x128xf32>
    %115 = tpu.matmul %38, %112, %cst_106 {dimension_numbers = #tpu.dot_dimension_numbers<[1], [0], [0], [1], [0, 0, 1, 1], [], []>} : vector<8x128xbf16>, vector<128x128xbf16>, vector<8x128xf32> -> vector<8x128xf32>
    %c96_107 = arith.constant 96 : index
    %c128_108 = arith.constant 128 : index
    %116 = vector.load %arg19[%c96_107, %c128_108] : memref<128x256xf32, #tpu.memory_space<vmem>>, vector<8x128xf32>
    tpu.vector_store %arg19[%c96_107, %c128_108], %115 {strides = array<i32>} : memref<128x256xf32, #tpu.memory_space<vmem>>, vector<8x128xf32>,
    %c13 = arith.constant 13 : index
    %c0_109 = arith.constant 0 : index
    %c0_110 = arith.constant 0 : index
    %117 = vector.load %arg5[%c13, %c0_109, %c0_110] : memref<16x128x128xbf16, #tpu.memory_space<vmem>>, vector<1x128x128xbf16>
    %118 = vector.shape_cast %117 : vector<1x128x128xbf16> to vector<128x128xbf16>
    %cst_111 = arith.constant dense<0.000000e+00> : vector<8x128xf32>
    %119 = tpu.matmul %37, %118, %cst_111 {dimension_numbers = #tpu.dot_dimension_numbers<[1], [0], [0], [1], [0, 0, 1, 1], [], []>} : vector<8x128xbf16>, vector<128x128xbf16>, vector<8x128xf32> -> vector<8x128xf32>
    %c104 = arith.constant 104 : index
    %c0_112 = arith.constant 0 : index
    %120 = vector.load %arg19[%c104, %c0_112] : memref<128x256xf32, #tpu.memory_space<vmem>>, vector<8x128xf32>
    tpu.vector_store %arg19[%c104, %c0_112], %119 {strides = array<i32>} : memref<128x256xf32, #tpu.memory_space<vmem>>, vector<8x128xf32>,
    %cst_113 = arith.constant dense<0.000000e+00> : vector<8x128xf32>
    %121 = tpu.matmul %38, %118, %cst_113 {dimension_numbers = #tpu.dot_dimension_numbers<[1], [0], [0], [1], [0, 0, 1, 1], [], []>} : vector<8x128xbf16>, vector<128x128xbf16>, vector<8x128xf32> -> vector<8x128xf32>
    %c104_114 = arith.constant 104 : index
    %c128_115 = arith.constant 128 : index
    %122 = vector.load %arg19[%c104_114, %c128_115] : memref<128x256xf32, #tpu.memory_space<vmem>>, vector<8x128xf32>
    tpu.vector_store %arg19[%c104_114, %c128_115], %121 {strides = array<i32>} : memref<128x256xf32, #tpu.memory_space<vmem>>, vector<8x128xf32>,
    %c14 = arith.constant 14 : index
    %c0_116 = arith.constant 0 : index
    %c0_117 = arith.constant 0 : index
    %123 = vector.load %arg5[%c14, %c0_116, %c0_117] : memref<16x128x128xbf16, #tpu.memory_space<vmem>>, vector<1x128x128xbf16>
    %124 = vector.shape_cast %123 : vector<1x128x128xbf16> to vector<128x128xbf16>
    %cst_118 = arith.constant dense<0.000000e+00> : vector<8x128xf32>
    %125 = tpu.matmul %37, %124, %cst_118 {dimension_numbers = #tpu.dot_dimension_numbers<[1], [0], [0], [1], [0, 0, 1, 1], [], []>} : vector<8x128xbf16>, vector<128x128xbf16>, vector<8x128xf32> -> vector<8x128xf32>
    %c112 = arith.constant 112 : index
    %c0_119 = arith.constant 0 : index
    %126 = vector.load %arg19[%c112, %c0_119] : memref<128x256xf32, #tpu.memory_space<vmem>>, vector<8x128xf32>
    tpu.vector_store %arg19[%c112, %c0_119], %125 {strides = array<i32>} : memref<128x256xf32, #tpu.memory_space<vmem>>, vector<8x128xf32>,
    %cst_120 = arith.constant dense<0.000000e+00> : vector<8x128xf32>
    %127 = tpu.matmul %38, %124, %cst_120 {dimension_numbers = #tpu.dot_dimension_numbers<[1], [0], [0], [1], [0, 0, 1, 1], [], []>} : vector<8x128xbf16>, vector<128x128xbf16>, vector<8x128xf32> -> vector<8x128xf32>
    %c112_121 = arith.constant 112 : index
    %c128_122 = arith.constant 128 : index
    %128 = vector.load %arg19[%c112_121, %c128_122] : memref<128x256xf32, #tpu.memory_space<vmem>>, vector<8x128xf32>
    tpu.vector_store %arg19[%c112_121, %c128_122], %127 {strides = array<i32>} : memref<128x256xf32, #tpu.memory_space<vmem>>, vector<8x128xf32>,
    %c15 = arith.constant 15 : index
    %c0_123 = arith.constant 0 : index
    %c0_124 = arith.constant 0 : index
    %129 = vector.load %arg5[%c15, %c0_123, %c0_124] : memref<16x128x128xbf16, #tpu.memory_space<vmem>>, vector<1x128x128xbf16>
    %130 = vector.shape_cast %129 : vector<1x128x128xbf16> to vector<128x128xbf16>
    %cst_125 = arith.constant dense<0.000000e+00> : vector<8x128xf32>
    %131 = tpu.matmul %37, %130, %cst_125 {dimension_numbers = #tpu.dot_dimension_numbers<[1], [0], [0], [1], [0, 0, 1, 1], [], []>} : vector<8x128xbf16>, vector<128x128xbf16>, vector<8x128xf32> -> vector<8x128xf32>
    %c120 = arith.constant 120 : index
    %c0_126 = arith.constant 0 : index
    %132 = vector.load %arg19[%c120, %c0_126] : memref<128x256xf32, #tpu.memory_space<vmem>>, vector<8x128xf32>
    tpu.vector_store %arg19[%c120, %c0_126], %131 {strides = array<i32>} : memref<128x256xf32, #tpu.memory_space<vmem>>, vector<8x128xf32>,
    %cst_127 = arith.constant dense<0.000000e+00> : vector<8x128xf32>
    %133 = tpu.matmul %38, %130, %cst_127 {dimension_numbers = #tpu.dot_dimension_numbers<[1], [0], [0], [1], [0, 0, 1, 1], [], []>} : vector<8x128xbf16>, vector<128x128xbf16>, vector<8x128xf32> -> vector<8x128xf32>
    %c120_128 = arith.constant 120 : index
    %c128_129 = arith.constant 128 : index
    %134 = vector.load %arg19[%c120_128, %c128_129] : memref<128x256xf32, #tpu.memory_space<vmem>>, vector<8x128xf32>
    tpu.vector_store %arg19[%c120_128, %c128_129], %133 {strides = array<i32>} : memref<128x256xf32, #tpu.memory_space<vmem>>, vector<8x128xf32>,
    %c0_130 = arith.constant 0 : index
    %c0_131 = arith.constant 0 : index
    %135 = vector.load %arg6[%c0_130, %c0_131] : memref<16x128xbf16, #tpu.memory_space<vmem>>, vector<16x128xbf16>
    %c0_132 = arith.constant 0 : index
    %c0_133 = arith.constant 0 : index
    %136 = vector.load %arg19[%c0_132, %c0_133] : memref<128x256xf32, #tpu.memory_space<vmem>>, vector<128x256xf32>
    %137 = arith.truncf %136 : vector<128x256xf32> to vector<128x256xbf16>
    %cst_134 = arith.constant dense<0.000000e+00> : vector<16x256xf32>
    %138 = tpu.matmul %135, %137, %cst_134 {dimension_numbers = #tpu.dot_dimension_numbers<[1], [0], [0], [1], [0, 0, 1, 1], [], []>} : vector<16x128xbf16>, vector<128x256xbf16>, vector<16x256xf32> -> vector<16x256xf32>
    %c0_135 = arith.constant 0 : index
    %c0_136 = arith.constant 0 : index
    %139 = vector.load %arg7[%c0_135, %c0_136] : memref<16x1xf32, #tpu.memory_space<vmem>>, vector<16x1xf32>
    %c0_137 = arith.constant 0 : index
    %c0_138 = arith.constant 0 : index
    %140 = vector.load %arg8[%c0_137, %c0_138] : memref<16x1xf32, #tpu.memory_space<vmem>>, vector<16x1xf32>
    %c0_139 = arith.constant 0 : index
    %c0_140 = arith.constant 0 : index
    %141 = vector.load %arg9[%c0_139, %c0_140] : memref<1x256xf32, #tpu.memory_space<vmem>>, vector<1x256xf32>
    %142 = vector.broadcast %141 : vector<1x256xf32> to vector<16x256xf32>
    %143 = arith.mulf %138, %142 : vector<16x256xf32>
    %cst_141 = arith.constant dense<0.000000e+00> : vector<16xf32>
    %144 = vector.multi_reduction <add>, %143, %cst_141 [1] : vector<16x256xf32> to vector<16xf32>
    %145 = vector.shape_cast %144 : vector<16xf32> to vector<16x1xf32>
    %cst_142 = arith.constant 2.000000e-02 : f32
    %146 = vector.broadcast %cst_142 : f32 to vector<16x1xf32>
    %147 = arith.mulf %145, %146 : vector<16x1xf32>
    %148 = vector.broadcast %147 : vector<16x1xf32> to vector<16x256xf32>
    %149 = arith.subf %138, %148 : vector<16x256xf32>
    %150 = vector.broadcast %141 : vector<1x256xf32> to vector<16x256xf32>
    %151 = arith.mulf %149, %150 : vector<16x256xf32>
    %152 = arith.mulf %151, %151 : vector<16x256xf32>
    %cst_143 = arith.constant dense<0.000000e+00> : vector<16xf32>
    %153 = vector.multi_reduction <add>, %152, %cst_143 [1] : vector<16x256xf32> to vector<16xf32>
    %154 = vector.shape_cast %153 : vector<16xf32> to vector<16x1xf32>
    %cst_144 = arith.constant 2.000000e-02 : f32
    %155 = vector.broadcast %cst_144 : f32 to vector<16x1xf32>
    %156 = arith.mulf %154, %155 : vector<16x1xf32>
    %cst_145 = arith.constant 9.99999974E-6 : f32
    %157 = vector.broadcast %cst_145 : f32 to vector<16x1xf32>
    %158 = arith.addf %156, %157 : vector<16x1xf32>
    %159 = math.rsqrt %158 : vector<16x1xf32>
    %160 = arith.mulf %139, %159 : vector<16x1xf32>
    %161 = arith.mulf %147, %160 : vector<16x1xf32>
    %162 = arith.subf %140, %161 : vector<16x1xf32>
    %163 = vector.broadcast %160 : vector<16x1xf32> to vector<16x256xf32>
    %164 = arith.mulf %138, %163 : vector<16x256xf32>
    %165 = vector.broadcast %162 : vector<16x1xf32> to vector<16x256xf32>
    %166 = arith.addf %164, %165 : vector<16x256xf32>
    %cst_146 = arith.constant 0.000000e+00 : f32
    %167 = vector.broadcast %cst_146 : f32 to vector<16x256xf32>
    %168 = arith.cmpf oge, %166, %167 : vector<16x256xf32>
    %cst_147 = arith.constant 2.000000e-01 : f32
    %169 = vector.broadcast %cst_147 : f32 to vector<16x256xf32>
    %170 = arith.mulf %169, %166 : vector<16x256xf32>
    %171 = arith.select %168, %166, %170 : vector<16x256xi1>, vector<16x256xf32>
    %c0_148 = arith.constant 0 : index
    %c0_149 = arith.constant 0 : index
    %172 = vector.load %arg10[%c0_148, %c0_149] : memref<256x2xf32, #tpu.memory_space<vmem>>, vector<256x2xf32>
    %cst_150 = arith.constant dense<0.000000e+00> : vector<16x2xf32>
    %173 = tpu.matmul %171, %172, %cst_150 {dimension_numbers = #tpu.dot_dimension_numbers<[1], [0], [0], [1], [0, 0, 1, 1], [], []>} : vector<16x256xf32>, vector<256x2xf32>, vector<16x2xf32> -> vector<16x2xf32>
    %c0_151 = arith.constant 0 : index
    %c0_152 = arith.constant 0 : index
    %174 = vector.load %arg11[%c0_151, %c0_152] : memref<1024x16xbf16, #tpu.memory_space<vmem>>, vector<1024x16xbf16>
    %175 = arith.truncf %173 : vector<16x2xf32> to vector<16x2xbf16>
    %cst_153 = arith.constant dense<0.000000e+00> : vector<1024x2xf32>
    %176 = tpu.matmul %174, %175, %cst_153 {dimension_numbers = #tpu.dot_dimension_numbers<[1], [0], [0], [1], [0, 0, 1, 1], [], []>} : vector<1024x16xbf16>, vector<16x2xbf16>, vector<1024x2xf32> -> vector<1024x2xf32>
    %c0_154 = arith.constant 0 : index
    %c0_155 = arith.constant 0 : index
    %177 = vector.load %arg12[%c0_154, %c0_155] : memref<1024x1xf32, #tpu.memory_space<vmem>>, vector<1024x1xf32>
    %178 = vector.broadcast %177 : vector<1024x1xf32> to vector<1024x2xf32>
    %179 = arith.addf %176, %178 : vector<1024x2xf32>
    %180 = arith.truncf %179 : vector<1024x2xf32> to vector<1024x2xbf16>
    %c0_156 = arith.constant 0 : index
    %c0_157 = arith.constant 0 : index
    %181 = vector.load %arg13[%c0_156, %c0_157] : memref<1x1024xbf16, #tpu.memory_space<vmem>>, vector<1x1024xbf16>
    %cst_158 = arith.constant dense<0.000000e+00> : vector<1x2xf32>
    %182 = tpu.matmul %181, %180, %cst_158 {dimension_numbers = #tpu.dot_dimension_numbers<[1], [0], [0], [1], [0, 0, 1, 1], [], []>} : vector<1x1024xbf16>, vector<1024x2xbf16>, vector<1x2xf32> -> vector<1x2xf32>
    %c0_159 = arith.constant 0 : index
    %c0_160 = arith.constant 0 : index
    %183 = vector.load %arg14[%c0_159, %c0_160] : memref<1x1xf32, #tpu.memory_space<vmem>>, vector<1x1xf32>
    %184 = vector.broadcast %183 : vector<1x1xf32> to vector<1x2xf32>
    %185 = arith.addf %182, %184 : vector<1x2xf32>
    %c0_161 = arith.constant 0 : index
    %c0_162 = arith.constant 0 : index
    %186 = vector.load %arg15[%c0_161, %c0_162] : memref<7x1024xbf16, #tpu.memory_space<vmem>>, vector<7x1024xbf16>
    %cst_163 = arith.constant dense<0.000000e+00> : vector<7x2xf32>
    %187 = tpu.matmul %186, %180, %cst_163 {dimension_numbers = #tpu.dot_dimension_numbers<[1], [0], [0], [1], [0, 0, 1, 1], [], []>} : vector<7x1024xbf16>, vector<1024x2xbf16>, vector<7x2xf32> -> vector<7x2xf32>
    %c0_164 = arith.constant 0 : index
    %c0_165 = arith.constant 0 : index
    %188 = vector.load %arg16[%c0_164, %c0_165] : memref<7x1xf32, #tpu.memory_space<vmem>>, vector<7x1xf32>
    %189 = vector.broadcast %188 : vector<7x1xf32> to vector<7x2xf32>
    %190 = arith.addf %187, %189 : vector<7x2xf32>
    %cst_166 = arith.constant dense<0xFF800000> : vector<2xf32>
    %191 = vector.multi_reduction <maximumf>, %190, %cst_166 [0] : vector<7x2xf32> to vector<2xf32>
    %192 = vector.shape_cast %191 : vector<2xf32> to vector<1x2xf32>
    %193 = vector.broadcast %192 : vector<1x2xf32> to vector<7x2xf32>
    %194 = arith.subf %190, %193 : vector<7x2xf32>
    %195 = math.exp %194 : vector<7x2xf32>
    %cst_167 = arith.constant dense<0.000000e+00> : vector<2xf32>
    %196 = vector.multi_reduction <add>, %195, %cst_167 [0] : vector<7x2xf32> to vector<2xf32>
    %197 = vector.shape_cast %196 : vector<2xf32> to vector<1x2xf32>
    %198 = math.log %197 : vector<1x2xf32>
    %199 = arith.addf %192, %198 : vector<1x2xf32>
    %c0_168 = arith.constant 0 : index
    %c0_169 = arith.constant 0 : index
    %200 = vector.load %arg17[%c0_168, %c0_169] : memref<7x2xf32, #tpu.memory_space<vmem>>, vector<7x2xf32>
    %201 = arith.mulf %190, %200 : vector<7x2xf32>
    %cst_170 = arith.constant dense<0.000000e+00> : vector<2xf32>
    %202 = vector.multi_reduction <add>, %201, %cst_170 [0] : vector<7x2xf32> to vector<2xf32>
    %203 = vector.shape_cast %202 : vector<2xf32> to vector<1x2xf32>
    %204 = arith.subf %199, %203 : vector<1x2xf32>
    %cst_171 = arith.constant 0.000000e+00 : f32
    %205 = vector.broadcast %cst_171 : f32 to vector<8x128xf32>
    %c0_172 = arith.constant 0 : index
    %c0_173 = arith.constant 0 : index
    %206 = vector.load %arg18[%c0_172, %c0_173] : memref<8x128xf32, #tpu.memory_space<vmem>>, vector<8x128xf32>
    tpu.vector_store %arg18[%c0_172, %c0_173], %205 {strides = array<i32>} : memref<8x128xf32, #tpu.memory_space<vmem>>, vector<8x128xf32>,
    %c0_174 = arith.constant 0 : index
    %c0_175 = arith.constant 0 : index
    %207 = vector.load %arg18[%c0_174, %c0_175] : memref<8x128xf32, #tpu.memory_space<vmem>>, vector<1x2xf32>
    tpu.vector_store %arg18[%c0_174, %c0_175], %185 {strides = array<i32>} : memref<8x128xf32, #tpu.memory_space<vmem>>, vector<1x2xf32>,
    %c1_176 = arith.constant 1 : index
    %c0_177 = arith.constant 0 : index
    %208 = vector.load %arg18[%c1_176, %c0_177] : memref<8x128xf32, #tpu.memory_space<vmem>>, vector<1x2xf32>
    tpu.vector_store %arg18[%c1_176, %c0_177], %204 {strides = array<i32>} : memref<8x128xf32, #tpu.memory_space<vmem>>, vector<1x2xf32>,
    return
  }
}

</mosaic_0001>

<bundles_post_ra>
// kernel: discriminator_forward.1
= control target key start
LH: loop header
LB: loop body
LE: loop exit
PB: predicated region body
PF: predicated region fallthrough
CT: control target
= control target key end

     0   :  { %v7449_v1 = vmov 0   ;;  %vm99_vm0 = vcmask 392192   ;;  %v148_v8 = vlaneseq  ;;  %v9889_v31 = vmov 0.0   ;;  %s9869_s0 = inlined_call_operand.vmem [shape: bf16[48,256], index: 0, kind: input, shape index: {}]   ;;  %s9870_s1 = inlined_call_operand.vmem [shape: bf16[8,48], index: 1, kind: input, shape index: {}]   ;;  %s9871_s4 = inlined_call_operand.vmem [shape: f32[1,256], index: 4, kind: input, shape index: {}]   ;;  %s9872_s5 = inlined_call_operand.vmem [shape: bf16[16,128,128], index: 5, kind: input, shape index: {}]   ;;  %s9873_s2 = inlined_call_operand.vmem [shape: f32[8,1], index: 2, kind: input, shape index: {}]   ;;  %s9874_s3 = inlined_call_operand.vmem [shape: f32[8,1], index: 3, kind: input, shape index: {}]   ;;  %s9875_s6 = inlined_call_operand.vmem [shape: bf16[16,128], index: 6, kind: input, shape index: {}]   ;;  %s9876_s9 = inlined_call_operand.vmem [shape: f32[1,256], index: 9, kind: input, shape index: {}]   ;;  %s9877_s10 = inlined_call_operand.vmem [shape: f32[256,2], index: 10, kind: input, shape index: {}]   ;;  %s9878_s7 = inlined_call_operand.vmem [shape: f32[16,1], index: 7, kind: input, shape index: {}]   ;;  %s9879_s8 = inlined_call_operand.vmem [shape: f32[16,1], index: 8, kind: input, shape index: {}]   ;;  %s9880_s12 = inlined_call_operand.vmem [shape: f32[1024,1], index: 12, kind: input, shape index: {}]   ;;  %s9881_s14 = inlined_call_operand.<no memory space> [shape: f32[1,1], index: 14, kind: input, shape index: {}]   ;;  %s9882_s11 = inlined_call_operand.vmem [shape: bf16[1024,16], index: 11, kind: input, shape index: {}]   ;;  %s9883_s16 = inlined_call_operand.vmem [shape: f32[7,1], index: 16, kind: input, shape index: {}]   ;;  %s9884_s13 = inlined_call_operand.vmem [shape: bf16[1,1024], index: 13, kind: input, shape index: {}]   ;;  %s9885_s15 = inlined_call_operand.vmem [shape: bf16[7,1024], index: 15, kind: input, shape index: {}]   ;;  %s9886_s18 = inlined_call_operand.vmem [shape: f32[8,128], index: 18, kind: output, shape index: {}]   ;;  %s9887_s17 = inlined_call_operand.vmem [shape: f32[7,2], index: 17, kind: input, shape index: {}]  }
   0x1   :  { %9921 = sst [smem:[#allocation34_spill]] %s9869_s0  ;;  %135 = vmatprep.mubr.bf16.mxu0 %v7449_v1  ;;  %7226 = vset.pattern.permute.xlu1 %v7449_v1  ;;  %v7237_v32 = vld [vmem:[%s9872_s5] sm:$0xff]   ;;  %v7238_v33 = vld [vmem:[%s9872_s5 + $0x8] sm:$0xff]   ;;  %v7239_v34 = vld [vmem:[%s9872_s5 + $0x10] sm:$0xff]   ;;  %vm7451_vm1 = vmmov 0   ;;  %vm4073_vm8 = vcmask 130048  }
   0x2   :  { %9922 = sst [smem:[#allocation35_spill]] %s9870_s1  ;;  %s9924_s29 = sld [smem:[#allocation34_spill]]  ;;  %7227 = vset.pattern.permute.xlu0 %v7449_v1  ;;  %v7572_v9 = vshrl.u32 %v148_v8, 7  ;;  %6420 = vmatprep.subr.bf16.mxu1 %v9889_v31  ;;  %v7240_v35 = vld [vmem:[%s9872_s5 + $0x18] sm:$0xff]   ;;  %v7241_v36 = vld [vmem:[%s9872_s5 + $0x20] sm:$0xff]   ;;  %v7242_v37 = vld [vmem:[%s9872_s5 + $0x28] sm:$0xff]  }
   0x3   :  { %9923 = sst [smem:[#allocation36_spill]] %s9871_s4  ;;  %s9925_s27 = sld [smem:[#allocation35_spill]]  ;;  %6421 = vmatpush3.bf16.msra.mxu1 %v7237_v32  ;;  %v144_v41 = vld [vmem:[%s9873_s2] sm:$0xff]  ;;  %v7243_v46 = vld [vmem:[%s9872_s5 + $0x30] sm:$0xff]   ;;  %v7244_v48 = vld [vmem:[%s9872_s5 + $0x38] sm:$0xff]   ;;  %6436 = vmatprep.mubr.msk.bf16.mxu1 %vm7451_vm1, %v9889_v31  ;;  %vm5334_vm9 = vcmask 8192  }
   0x4   :  { %v7575_v10 = vsub.s32 0, %v7572_v9  ;;  %s9927_s0 = sld [smem:[#allocation36_spill]]  ;;  %v154_v12 = vsub.s32 1, %v7572_v9  ;;  %6422 = vmatprep.subr.bf16.mxu1 %v9889_v31  ;;  %v145_v44 = vld [vmem:[%s9874_s3] sm:$0xff]  ;;  %v7246_v62 = vld [vmem:[%s9872_s5 + $0x48] sm:$0xff]   ;;  %v7247_v63 = vld [vmem:[%s9872_s5 + $0x50] sm:$0xff]  }
   0x5   :  { %v7245_v59 = vld [vmem:[%s9872_s5 + $0x40] sm:$0xff]   ;;  %v7255_v8 = vld [vmem:[%s9872_s5 + $0x90] sm:$0xff]   ;;  %vm5302_vm10 = vcmask 14336  }
   0x6   :  { %9926 = vst [vmem:[#allocation4_spill] sm:$0xff] %v7575_v10 }
   0x7   :  { %6423 = vmatpush3.bf16.msra.mxu1 %v7238_v33 }
   0x8   :  { %v7228_v0 = vld [vmem:[%s9924_s29 + $0x4] ss:$8 sps:$4 sm:$0xff]   ;;  %v7230_v2 = vld [vmem:[%s9924_s29] ss:$8 sps:$4 sm:$0xff]   ;;  %v7231_v3 = vld [vmem:[%s9924_s29 + $0x14] ss:$8 sps:$4 sm:$0xff]   ;;  %6424 = vmatprep.subr.bf16.mxu1 %v9889_v31 }
   0x9   :  { %103 = vmatprep.subr.bf16.mxu0 %v7228_v0  ;;  %v7233_v4 = vld [vmem:[%s9924_s29 + $0x10] ss:$8 sps:$4 sm:$0xff]   ;;  %v7234_v5 = vld [vmem:[%s9924_s29 + $0x24] ss:$8 sps:$4 sm:$0xff]   ;;  %v7236_v6 = vld [vmem:[%s9924_s29 + $0x20] ss:$8 sps:$4 sm:$0xff]  }
   0xa   :  { %104 = vmatpush1.bf16.msra.mxu0 %v7230_v2  ;;  %v62_v7 = vld [vmem:[%s9925_s27] sm:$0xf]  ;;  %v7248_v0 = vld [vmem:[%s9872_s5 + $0x58] sm:$0xff]  }
   0xb   :  { %105 = vmatprep.subr.bf16.mxu0 %v7231_v3  ;;  %v146_v11 = vld [vmem:[%s9927_s0] sm:$0x3]  ;;  %6425 = vmatpush3.bf16.msra.mxu1 %v7239_v34  ;;  %v7250_v3 = vld [vmem:[%s9872_s5 + $0x68] sm:$0xff]  }
   0xc   :  { %v151_v13 = vrot.slane %v146_v11, %v7575_v10  ;;  %v155_v14 = vrot.slane %v146_v11, %v154_v12  ;;  %6426 = vmatprep.subr.bf16.mxu1 %v9889_v31  ;;  %v7249_v2 = vld [vmem:[%s9872_s5 + $0x60] sm:$0xff]   ;;  %v7256_v11 = vld [vmem:[%s9872_s5 + $0x98] sm:$0xff]  }
   0xe   :  { %106 = vmatpush1.bf16.msra.mxu0 %v7233_v4  ;;  %v7251_v4 = vld [vmem:[%s9872_s5 + $0x70] sm:$0xff]  }
   0xf   :  { %107 = vmatprep.subr.bf16.mxu0 %v7234_v5  ;;  %6427 = vmatpush3.bf16.msra.mxu1 %v7240_v35  ;;  %v7252_v5 = vld [vmem:[%s9872_s5 + $0x78] sm:$0xff]  }
  0x10   :  { %6428 = vmatprep.subr.bf16.mxu1 %v9889_v31 }
  0x12   :  { %108 = vmatpush1.bf16.msra.mxu0 %v7236_v6  ;;  %v7253_v6 = vld [vmem:[%s9872_s5 + $0x80] sm:$0xff]  }
  0x13   :  { %6440 = vmatprep.subr.bf16.mxu0 %v9889_v31  ;;  %6429 = vmatpush3.bf16.msra.mxu1 %v7241_v36 }
  0x14   :  { %6430 = vmatprep.subr.bf16.mxu1 %v9889_v31 }
  0x15   :  { %5347 = vmatmul.mubr.msk.bf16.vlgmr.msra.gmra.mrb[0].mxu0 %vm99_vm0, %v62_v7  ;;  %v7254_v7 = vld [vmem:[%s9872_s5 + $0x88] sm:$0xff]  }
  0x16   :  { %6441 = vmatpush3.bf16.msra.mxu0 %v7237_v32  ;;  %6456 = vmatprep.mubr.msk.bf16.mxu0 %vm7451_vm1, %v9889_v31  ;;  %v7275_v32 = vld [vmem:[%s9872_s5 + $0x130] sm:$0xff]  }
  0x17   :  { %6442 = vmatprep.subr.bf16.mxu0 %v9889_v31  ;;  %6431 = vmatpush3.bf16.msra.mxu1 %v7242_v37 }
  0x18   :  { %6432 = vmatprep.subr.bf16.mxu1 %v9889_v31 }
  0x1a   :  { %6443 = vmatpush3.bf16.msra.mxu0 %v7238_v33  ;;  %v7276_v33 = vld [vmem:[%s9872_s5 + $0x138] sm:$0xff]  }
  0x1b   :  { %6444 = vmatprep.subr.bf16.mxu0 %v9889_v31  ;;  %6433 = vmatpush3.bf16.msra.mxu1 %v7243_v46 }
  0x1c   :  { %6434 = vmatprep.subr.bf16.mxu1 %v9889_v31 }
  0x1e   :  { %6445 = vmatpush3.bf16.msra.mxu0 %v7239_v34  ;;  %v7277_v34 = vld [vmem:[%s9872_s5 + $0x140] sm:$0xff]  }
  0x1f   :  { %6446 = vmatprep.subr.bf16.mxu0 %v9889_v31  ;;  %6435 = vmatpush3.bf16.msra.mxu1 %v7244_v48 }
  0x20   :  { %6460 = vmatprep.subr.bf16.mxu1 %v9889_v31 }
  0x22   :  { %6447 = vmatpush3.bf16.msra.mxu0 %v7240_v35  ;;  %v7278_v35 = vld [vmem:[%s9872_s5 + $0x148] sm:$0xff]  }
  0x23   :  { %6448 = vmatprep.subr.bf16.mxu0 %v9889_v31 }
  0x26   :  { %6449 = vmatpush3.bf16.msra.mxu0 %v7241_v36  ;;  %v7279_v36 = vld [vmem:[%s9872_s5 + $0x150] sm:$0xff]  }
  0x27   :  { %6450 = vmatprep.subr.bf16.mxu0 %v9889_v31 }
  0x2a   :  { %6451 = vmatpush3.bf16.msra.mxu0 %v7242_v37  ;;  %v7280_v37 = vld [vmem:[%s9872_s5 + $0x158] sm:$0xff]  }
  0x2b   :  { %6452 = vmatprep.subr.bf16.mxu0 %v9889_v31 }
  0x2e   :  { %6453 = vmatpush3.bf16.msra.mxu0 %v7243_v46  ;;  %v7289_v46 = vld [vmem:[%s9872_s5 + $0x1a0] sm:$0xff]  }
  0x2f   :  { %6454 = vmatprep.subr.bf16.mxu0 %v9889_v31 }
  0x32   :  { %6455 = vmatpush3.bf16.msra.mxu0 %v7244_v48  ;;  %v7291_v48 = vld [vmem:[%s9872_s5 + $0x1b0] sm:$0xff]  }
  0x33   :  { %6480 = vmatprep.subr.bf16.mxu0 %v9889_v31 }
  0xe8   :  { %v7584_v15 = vpop.f32.mrb[0].mxu0 }
  0xe9   :  { %v7586_v16 = vpop.f32.mrb[1].mxu0  ;;  %v158_v17 = vmul.f32 %v151_v13, %v7584_v15 }
  0xea   :  { %v141_v18 = vpop.f32.mrb[2].mxu0  ;;  %v159_v19 = vmul.f32 %v155_v14, %v7586_v16 }
  0xeb   :  { %v142_v20 = vpop.f32.mrb[3].mxu0  ;;  %v7262_v18 = vld [vmem:[%s9872_s5 + $0xc8] sm:$0xff]  }
  0xec   :  { %v160_v21 = vadd.f32 %v159_v19, %v158_v17  ;;  %v7261_v17 = vld [vmem:[%s9872_s5 + $0xc0] sm:$0xff]   ;;  %v7263_v19 = vld [vmem:[%s9872_s5 + $0xd0] sm:$0xff]   ;;  %v7264_v20 = vld [vmem:[%s9872_s5 + $0xd8] sm:$0xff]  }
  0xee   :  { %161 = vadd.xlane.f32.xlu0 %v160_v21  ;;  %v7265_v21 = vld [vmem:[%s9872_s5 + $0xe0] sm:$0xff]  }
 0x17b   :  { %v162_v22 = vpop.xlane.xlu0 %161 }
 0x17c   :  { %v163_v23 = vmul.f32 0.0061728396, %v162_v22  ;;  %v7266_v22 = vld [vmem:[%s9872_s5 + $0xe8] sm:$0xff]  }
 0x17e   :  { %v164_v24 = vsub.f32 %v7584_v15, %v163_v23  ;;  %v165_v25 = vsub.f32 %v7586_v16, %v163_v23 }
 0x180   :  { %v166_v26 = vmul.f32 %v164_v24, %v151_v13  ;;  %v167_v27 = vmul.f32 %v165_v25, %v155_v14  ;;  %v7257_v13 = vld [vmem:[%s9872_s5 + $0xa0] sm:$0xff]   ;;  %v7258_v14 = vld [vmem:[%s9872_s5 + $0xa8] sm:$0xff]   ;;  %v7268_v24 = vld [vmem:[%s9872_s5 + $0xf8] sm:$0xff]  }
 0x181   :  { %v7269_v25 = vld [vmem:[%s9872_s5 + $0x100] sm:$0xff]  }
 0x182   :  { %v168_v28 = vmul.f32 %v166_v26, %v166_v26  ;;  %v169_v29 = vmul.f32 %v167_v27, %v167_v27  ;;  %v7270_v26 = vld [vmem:[%s9872_s5 + $0x108] sm:$0xff]   ;;  %v7271_v27 = vld [vmem:[%s9872_s5 + $0x110] sm:$0xff]  }
 0x184   :  { %v170_v30 = vadd.f32 %v169_v29, %v168_v28  ;;  %v7272_v28 = vld [vmem:[%s9872_s5 + $0x118] sm:$0xff]   ;;  %v7273_v29 = vld [vmem:[%s9872_s5 + $0x120] sm:$0xff]  }
 0x186   :  { %171 = vadd.xlane.f32.xlu0 %v170_v30  ;;  %v7274_v30 = vld [vmem:[%s9872_s5 + $0x128] sm:$0xff]  }
 0x213   :  { %v172_v38 = vpop.xlane.xlu0 %171 }
 0x214   :  { %v173_v39 = vmul.f32 0.0061728396, %v172_v38  ;;  %v7281_v38 = vld [vmem:[%s9872_s5 + $0x160] sm:$0xff]  }
 0x216   :  { %v174_v40 = vadd.f32 1e-05, %v173_v39  ;;  %v7282_v39 = vld [vmem:[%s9872_s5 + $0x168] sm:$0xff]  }
 0x218   :  { %7439 = vrsqrt.f32 %v174_v40  ;;  %v7283_v40 = vld [vmem:[%s9872_s5 + $0x170] sm:$0xff]  }
 0x222   :  { %v7440_v42 = vpop.eup %7439 }
 0x223   :  { %v176_v43 = vmul.f32 %v7440_v42, %v144_v41  ;;  %v7284_v41 = vld [vmem:[%s9872_s5 + $0x178] sm:$0xff]   ;;  %v7285_v42 = vld [vmem:[%s9872_s5 + $0x180] sm:$0xff]  }
 0x225   :  { %181 = vperm.xlu1 %7226, %v176_v43   ;;  %v177_v45 = vmul.f32 %v176_v43, %v163_v23  ;;  %v7267_v23 = vld [vmem:[%s9872_s5 + $0xf0] sm:$0xff]   ;;  %v7286_v43 = vld [vmem:[%s9872_s5 + $0x188] sm:$0xff]  }
 0x227   :  { %v178_v47 = vsub.f32 %v145_v44, %v177_v45  ;;  %v7287_v44 = vld [vmem:[%s9872_s5 + $0x190] sm:$0xff]   ;;  %v7288_v45 = vld [vmem:[%s9872_s5 + $0x198] sm:$0xff]  }
 0x229   :  { %188 = vperm.xlu1 %7226, %v178_v47   ;;  %v7290_v47 = vld [vmem:[%s9872_s5 + $0x1a8] sm:$0xff]  }
 0x2a4   :  { %v182_v49 = vpop.permute.xlu1 %181 }
 0x2a5   :  { %v184_v50 = vmul.f32 %v182_v49, %v7584_v15  ;;  %v185_v51 = vmul.f32 %v182_v49, %v7586_v16  ;;  %v7259_v15 = vld [vmem:[%s9872_s5 + $0xb0] sm:$0xff]   ;;  %v7260_v16 = vld [vmem:[%s9872_s5 + $0xb8] sm:$0xff]  }
 0x2a6   :  { %v7292_v49 = vld [vmem:[%s9872_s5 + $0x1b8] sm:$0xff]  }
 0x2a8   :  { %v189_v52 = vpop.permute.xlu1 %188 }
 0x2a9   :  { %v191_v53 = vadd.f32 %v189_v52, %v184_v50  ;;  %v192_v54 = vadd.f32 %v189_v52, %v185_v51  ;;  %v7293_v50 = vld [vmem:[%s9872_s5 + $0x1c0] sm:$0xff]   ;;  %v7294_v51 = vld [vmem:[%s9872_s5 + $0x1c8] sm:$0xff]   ;;  %v7295_v52 = vld [vmem:[%s9872_s5 + $0x1d0] sm:$0xff]  }
 0x2ab   :  { %vm193_vm2 = vcmp.ge.f32.partialorder %v191_v53, 0.0  ;;  %vm194_vm3 = vcmp.ge.f32.partialorder %v192_v54, 0.0  ;;  %v195_v55 = vmul.f32 0.2, %v191_v53  ;;  %v196_v56 = vmul.f32 0.2, %v192_v54 }
 0x2ad   :  { %v197_v57 = vsel %vm193_vm2, %v191_v53, %v195_v55  ;;  %v198_v58 = vsel %vm194_vm3, %v192_v54, %v196_v56  ;;  %v7296_v53 = vld [vmem:[%s9872_s5 + $0x1d8] sm:$0xff]   ;;  %v7297_v54 = vld [vmem:[%s9872_s5 + $0x1e0] sm:$0xff]   ;;  %v7298_v55 = vld [vmem:[%s9872_s5 + $0x1e8] sm:$0xff]  }
 0x2ae   :  { %v7649_v60 = vpack.c.bf16 %v197_v57, %v197_v57  ;;  %v7651_v61 = vpack.c.bf16 %v198_v58, %v198_v58 }
 0x2b0   :  { %6437 = vmatmul.mubr.bf16.vlgmr.msra.gmra.mrb[0].mxu1 %v7649_v60  ;;  %6457 = vmatmul.mubr.bf16.vlgmr.msra.gmra.mrb[4].mxu0 %v7651_v61 }
 0x2b1   :  { %6461 = vmatpush3.bf16.msra.mxu1 %v7245_v59  ;;  %6481 = vmatpush3.bf16.msra.mxu0 %v7245_v59 }
 0x2b2   :  { %6462 = vmatprep.subr.bf16.mxu1 %v9889_v31  ;;  %6482 = vmatprep.subr.bf16.mxu0 %v9889_v31 }
 0x2b3   :  { %6476 = vmatprep.mubr.msk.bf16.mxu1 %vm7451_vm1, %v9889_v31  ;;  %6496 = vmatprep.mubr.msk.bf16.mxu0 %vm7451_vm1, %v9889_v31 }
 0x2b5   :  { %6463 = vmatpush3.bf16.msra.mxu1 %v7246_v62  ;;  %6483 = vmatpush3.bf16.msra.mxu0 %v7246_v62 }
 0x2b6   :  { %6464 = vmatprep.subr.bf16.mxu1 %v9889_v31  ;;  %6484 = vmatprep.subr.bf16.mxu0 %v9889_v31 }
 0x2b9   :  { %6465 = vmatpush3.bf16.msra.mxu1 %v7247_v63  ;;  %6485 = vmatpush3.bf16.msra.mxu0 %v7247_v63 }
 0x2ba   :  { %6466 = vmatprep.subr.bf16.mxu1 %v9889_v31  ;;  %6486 = vmatprep.subr.bf16.mxu0 %v9889_v31 }
 0x2bd   :  { %6467 = vmatpush3.bf16.msra.mxu1 %v7248_v0  ;;  %6487 = vmatpush3.bf16.msra.mxu0 %v7248_v0  ;;  %v7299_v0 = vld [vmem:[%s9872_s5 + $0x1f0] sm:$0xff]  }
 0x2be   :  { %6468 = vmatprep.subr.bf16.mxu1 %v9889_v31  ;;  %6488 = vmatprep.subr.bf16.mxu0 %v9889_v31 }
 0x2c1   :  { %6469 = vmatpush3.bf16.msra.mxu1 %v7249_v2  ;;  %6489 = vmatpush3.bf16.msra.mxu0 %v7249_v2 }
 0x2c2   :  { %6470 = vmatprep.subr.bf16.mxu1 %v9889_v31  ;;  %6490 = vmatprep.subr.bf16.mxu0 %v9889_v31 }
 0x2c5   :  { %6471 = vmatpush3.bf16.msra.mxu1 %v7250_v3  ;;  %6491 = vmatpush3.bf16.msra.mxu0 %v7250_v3 }
 0x2c6   :  { %6472 = vmatprep.subr.bf16.mxu1 %v9889_v31  ;;  %6492 = vmatprep.subr.bf16.mxu0 %v9889_v31 }
 0x2c9   :  { %6473 = vmatpush3.bf16.msra.mxu1 %v7251_v4  ;;  %6493 = vmatpush3.bf16.msra.mxu0 %v7251_v4  ;;  %v7300_v4 = vld [vmem:[%s9872_s5 + $0x1f8] sm:$0xff]  }
 0x2ca   :  { %6474 = vmatprep.subr.bf16.mxu1 %v9889_v31  ;;  %6494 = vmatprep.subr.bf16.mxu0 %v9889_v31 }
 0x2cd   :  { %6475 = vmatpush3.bf16.msra.mxu1 %v7252_v5  ;;  %6495 = vmatpush3.bf16.msra.mxu0 %v7252_v5  ;;  %v7301_v5 = vld [vmem:[%s9872_s5 + $0x200] sm:$0xff]  }
 0x2ce   :  { %6500 = vmatprep.subr.bf16.mxu1 %v9889_v31  ;;  %6520 = vmatprep.subr.bf16.mxu0 %v9889_v31 }
 0x2d0   :  { %6477 = vmatmul.mubr.bf16.vlgmr.msra.gmra.mrb[4].mxu1 %v7649_v60  ;;  %6497 = vmatmul.mubr.bf16.vlgmr.msra.gmra.mrb[8].mxu0 %v7651_v61 }
 0x2d1   :  { %6501 = vmatpush3.bf16.msra.mxu1 %v7253_v6  ;;  %6521 = vmatpush3.bf16.msra.mxu0 %v7253_v6  ;;  %v7302_v6 = vld [vmem:[%s9872_s5 + $0x208] sm:$0xff]  }
 0x2d2   :  { %6502 = vmatprep.subr.bf16.mxu1 %v9889_v31  ;;  %6522 = vmatprep.subr.bf16.mxu0 %v9889_v31 }
 0x2d3   :  { %6516 = vmatprep.mubr.msk.bf16.mxu1 %vm7451_vm1, %v9889_v31  ;;  %6536 = vmatprep.mubr.msk.bf16.mxu0 %vm7451_vm1, %v9889_v31 }
 0x2d5   :  { %6503 = vmatpush3.bf16.msra.mxu1 %v7254_v7  ;;  %6523 = vmatpush3.bf16.msra.mxu0 %v7254_v7  ;;  %v7303_v7 = vld [vmem:[%s9872_s5 + $0x210] sm:$0xff]  }
 0x2d6   :  { %6504 = vmatprep.subr.bf16.mxu1 %v9889_v31  ;;  %6524 = vmatprep.subr.bf16.mxu0 %v9889_v31 }
 0x2d9   :  { %6505 = vmatpush3.bf16.msra.mxu1 %v7255_v8  ;;  %6525 = vmatpush3.bf16.msra.mxu0 %v7255_v8  ;;  %v7304_v8 = vld [vmem:[%s9872_s5 + $0x218] sm:$0xff]  }
 0x2da   :  { %6506 = vmatprep.subr.bf16.mxu1 %v9889_v31  ;;  %6526 = vmatprep.subr.bf16.mxu0 %v9889_v31 }
 0x2dd   :  { %6507 = vmatpush3.bf16.msra.mxu1 %v7256_v11  ;;  %6527 = vmatpush3.bf16.msra.mxu0 %v7256_v11  ;;  %v7305_v11 = vld [vmem:[%s9872_s5 + $0x220] sm:$0xff]  }
 0x2de   :  { %6508 = vmatprep.subr.bf16.mxu1 %v9889_v31  ;;  %6528 = vmatprep.subr.bf16.mxu0 %v9889_v31 }
 0x2e1   :  { %6509 = vmatpush3.bf16.msra.mxu1 %v7257_v13  ;;  %6529 = vmatpush3.bf16.msra.mxu0 %v7257_v13  ;;  %v7306_v13 = vld [vmem:[%s9872_s5 + $0x228] sm:$0xff]  }
 0x2e2   :  { %6510 = vmatprep.subr.bf16.mxu1 %v9889_v31  ;;  %6530 = vmatprep.subr.bf16.mxu0 %v9889_v31 }
 0x2e5   :  { %6511 = vmatpush3.bf16.msra.mxu1 %v7258_v14  ;;  %6531 = vmatpush3.bf16.msra.mxu0 %v7258_v14 }
 0x2e6   :  { %6512 = vmatprep.subr.bf16.mxu1 %v9889_v31  ;;  %6532 = vmatprep.subr.bf16.mxu0 %v9889_v31 }
 0x2e9   :  { %6513 = vmatpush3.bf16.msra.mxu1 %v7259_v15  ;;  %6533 = vmatpush3.bf16.msra.mxu0 %v7259_v15 }
 0x2ea   :  { %6514 = vmatprep.subr.bf16.mxu1 %v9889_v31  ;;  %6534 = vmatprep.subr.bf16.mxu0 %v9889_v31 }
 0x2ed   :  { %6515 = vmatpush3.bf16.msra.mxu1 %v7260_v16  ;;  %6535 = vmatpush3.bf16.msra.mxu0 %v7260_v16 }
 0x2ee   :  { %6540 = vmatprep.subr.bf16.mxu1 %v9889_v31  ;;  %6560 = vmatprep.subr.bf16.mxu0 %v9889_v31 }
 0x2f0   :  { %6517 = vmatmul.mubr.bf16.vlgmr.msra.gmra.mrb[8].mxu1 %v7649_v60  ;;  %6537 = vmatmul.mubr.bf16.vlgmr.msra.gmra.mrb[12].mxu0 %v7651_v61 }
 0x2f1   :  { %6541 = vmatpush3.bf16.msra.mxu1 %v7261_v17  ;;  %6561 = vmatpush3.bf16.msra.mxu0 %v7261_v17 }
 0x2f2   :  { %6542 = vmatprep.subr.bf16.mxu1 %v9889_v31  ;;  %6562 = vmatprep.subr.bf16.mxu0 %v9889_v31 }
 0x2f3   :  { %6556 = vmatprep.mubr.msk.bf16.mxu1 %vm7451_vm1, %v9889_v31  ;;  %6576 = vmatprep.mubr.msk.bf16.mxu0 %vm7451_vm1, %v9889_v31 }
 0x2f5   :  { %6543 = vmatpush3.bf16.msra.mxu1 %v7262_v18  ;;  %6563 = vmatpush3.bf16.msra.mxu0 %v7262_v18 }
 0x2f6   :  { %6544 = vmatprep.subr.bf16.mxu1 %v9889_v31  ;;  %6564 = vmatprep.subr.bf16.mxu0 %v9889_v31 }
 0x2f9   :  { %6545 = vmatpush3.bf16.msra.mxu1 %v7263_v19  ;;  %6565 = vmatpush3.bf16.msra.mxu0 %v7263_v19 }
 0x2fa   :  { %6546 = vmatprep.subr.bf16.mxu1 %v9889_v31  ;;  %6566 = vmatprep.subr.bf16.mxu0 %v9889_v31 }
 0x2fd   :  { %6547 = vmatpush3.bf16.msra.mxu1 %v7264_v20  ;;  %6567 = vmatpush3.bf16.msra.mxu0 %v7264_v20 }
 0x2fe   :  { %6548 = vmatprep.subr.bf16.mxu1 %v9889_v31  ;;  %6568 = vmatprep.subr.bf16.mxu0 %v9889_v31 }
 0x301   :  { %6549 = vmatpush3.bf16.msra.mxu1 %v7265_v21  ;;  %6569 = vmatpush3.bf16.msra.mxu0 %v7265_v21 }
 0x302   :  { %6550 = vmatprep.subr.bf16.mxu1 %v9889_v31  ;;  %6570 = vmatprep.subr.bf16.mxu0 %v9889_v31 }
 0x305   :  { %6551 = vmatpush3.bf16.msra.mxu1 %v7266_v22  ;;  %6571 = vmatpush3.bf16.msra.mxu0 %v7266_v22  ;;  %v7307_v22 = vld [vmem:[%s9872_s5 + $0x230] sm:$0xff]  }
 0x306   :  { %6552 = vmatprep.subr.bf16.mxu1 %v9889_v31  ;;  %6572 = vmatprep.subr.bf16.mxu0 %v9889_v31 }
 0x309   :  { %6553 = vmatpush3.bf16.msra.mxu1 %v7267_v23  ;;  %6573 = vmatpush3.bf16.msra.mxu0 %v7267_v23 }
 0x30a   :  { %6554 = vmatprep.subr.bf16.mxu1 %v9889_v31  ;;  %6574 = vmatprep.subr.bf16.mxu0 %v9889_v31 }
 0x30d   :  { %6555 = vmatpush3.bf16.msra.mxu1 %v7268_v24  ;;  %6575 = vmatpush3.bf16.msra.mxu0 %v7268_v24 }
 0x30e   :  { %6580 = vmatprep.subr.bf16.mxu1 %v9889_v31  ;;  %6600 = vmatprep.subr.bf16.mxu0 %v9889_v31 }
 0x310   :  { %6557 = vmatmul.mubr.bf16.vlgmr.msra.gmra.mrb[12].mxu1 %v7649_v60  ;;  %6577 = vmatmul.mubr.bf16.vlgmr.msra.gmra.mrb[16].mxu0 %v7651_v61 }
 0x311   :  { %6581 = vmatpush3.bf16.msra.mxu1 %v7269_v25  ;;  %6601 = vmatpush3.bf16.msra.mxu0 %v7269_v25  ;;  %v7308_v25 = vld [vmem:[%s9872_s5 + $0x238] sm:$0xff]  }
 0x312   :  { %6582 = vmatprep.subr.bf16.mxu1 %v9889_v31  ;;  %6602 = vmatprep.subr.bf16.mxu0 %v9889_v31 }
 0x313   :  { %6596 = vmatprep.mubr.msk.bf16.mxu1 %vm7451_vm1, %v9889_v31  ;;  %6616 = vmatprep.mubr.msk.bf16.mxu0 %vm7451_vm1, %v9889_v31 }
 0x315   :  { %6583 = vmatpush3.bf16.msra.mxu1 %v7270_v26  ;;  %6603 = vmatpush3.bf16.msra.mxu0 %v7270_v26  ;;  %v7309_v26 = vld [vmem:[%s9872_s5 + $0x240] sm:$0xff]  }
 0x316   :  { %6584 = vmatprep.subr.bf16.mxu1 %v9889_v31  ;;  %6604 = vmatprep.subr.bf16.mxu0 %v9889_v31 }
 0x319   :  { %6585 = vmatpush3.bf16.msra.mxu1 %v7271_v27  ;;  %6605 = vmatpush3.bf16.msra.mxu0 %v7271_v27  ;;  %v7310_v27 = vld [vmem:[%s9872_s5 + $0x248] sm:$0xff]  }
 0x31a   :  { %6586 = vmatprep.subr.bf16.mxu1 %v9889_v31  ;;  %6606 = vmatprep.subr.bf16.mxu0 %v9889_v31 }
 0x31d   :  { %6587 = vmatpush3.bf16.msra.mxu1 %v7272_v28  ;;  %6607 = vmatpush3.bf16.msra.mxu0 %v7272_v28  ;;  %v7311_v28 = vld [vmem:[%s9872_s5 + $0x250] sm:$0xff]  }
 0x31e   :  { %6588 = vmatprep.subr.bf16.mxu1 %v9889_v31  ;;  %6608 = vmatprep.subr.bf16.mxu0 %v9889_v31 }
 0x321   :  { %6589 = vmatpush3.bf16.msra.mxu1 %v7273_v29  ;;  %6609 = vmatpush3.bf16.msra.mxu0 %v7273_v29  ;;  %v7312_v29 = vld [vmem:[%s9872_s5 + $0x258] sm:$0xff]  }
 0x322   :  { %6590 = vmatprep.subr.bf16.mxu1 %v9889_v31  ;;  %6610 = vmatprep.subr.bf16.mxu0 %v9889_v31 }
 0x325   :  { %6591 = vmatpush3.bf16.msra.mxu1 %v7274_v30  ;;  %6611 = vmatpush3.bf16.msra.mxu0 %v7274_v30  ;;  %v7313_v30 = vld [vmem:[%s9872_s5 + $0x260] sm:$0xff]  }
 0x326   :  { %6592 = vmatprep.subr.bf16.mxu1 %v9889_v31  ;;  %6612 = vmatprep.subr.bf16.mxu0 %v9889_v31 }
 0x329   :  { %6593 = vmatpush3.bf16.msra.mxu1 %v7275_v32  ;;  %6613 = vmatpush3.bf16.msra.mxu0 %v7275_v32  ;;  %v7314_v32 = vld [vmem:[%s9872_s5 + $0x268] sm:$0xff]  }
 0x32a   :  { %6594 = vmatprep.subr.bf16.mxu1 %v9889_v31  ;;  %6614 = vmatprep.subr.bf16.mxu0 %v9889_v31 }
 0x32d   :  { %6595 = vmatpush3.bf16.msra.mxu1 %v7276_v33  ;;  %6615 = vmatpush3.bf16.msra.mxu0 %v7276_v33 }
 0x32e   :  { %6620 = vmatprep.subr.bf16.mxu1 %v9889_v31  ;;  %6640 = vmatprep.subr.bf16.mxu0 %v9889_v31 }
 0x330   :  { %6597 = vmatmul.mubr.bf16.vlgmr.msra.gmra.mrb[16].mxu1 %v7649_v60  ;;  %6617 = vmatmul.mubr.bf16.vlgmr.msra.gmra.mrb[20].mxu0 %v7651_v61 }
 0x331   :  { %6621 = vmatpush3.bf16.msra.mxu1 %v7277_v34  ;;  %6641 = vmatpush3.bf16.msra.mxu0 %v7277_v34 }
 0x332   :  { %6622 = vmatprep.subr.bf16.mxu1 %v9889_v31  ;;  %6642 = vmatprep.subr.bf16.mxu0 %v9889_v31 }
 0x333   :  { %6636 = vmatprep.mubr.msk.bf16.mxu1 %vm7451_vm1, %v9889_v31  ;;  %6656 = vmatprep.mubr.msk.bf16.mxu0 %vm7451_vm1, %v9889_v31 }
 0x335   :  { %6623 = vmatpush3.bf16.msra.mxu1 %v7278_v35  ;;  %6643 = vmatpush3.bf16.msra.mxu0 %v7278_v35 }
 0x336   :  { %6624 = vmatprep.subr.bf16.mxu1 %v9889_v31  ;;  %6644 = vmatprep.subr.bf16.mxu0 %v9889_v31 }
 0x339   :  { %6625 = vmatpush3.bf16.msra.mxu1 %v7279_v36  ;;  %6645 = vmatpush3.bf16.msra.mxu0 %v7279_v36 }
 0x33a   :  { %6626 = vmatprep.subr.bf16.mxu1 %v9889_v31  ;;  %6646 = vmatprep.subr.bf16.mxu0 %v9889_v31 }
 0x33d   :  { %6627 = vmatpush3.bf16.msra.mxu1 %v7280_v37  ;;  %6647 = vmatpush3.bf16.msra.mxu0 %v7280_v37 }
 0x33e   :  { %6628 = vmatprep.subr.bf16.mxu1 %v9889_v31  ;;  %6648 = vmatprep.subr.bf16.mxu0 %v9889_v31 }
 0x341   :  { %6629 = vmatpush3.bf16.msra.mxu1 %v7281_v38  ;;  %6649 = vmatpush3.bf16.msra.mxu0 %v7281_v38 }
 0x342   :  { %6630 = vmatprep.subr.bf16.mxu1 %v9889_v31  ;;  %6650 = vmatprep.subr.bf16.mxu0 %v9889_v31 }
 0x345   :  { %6631 = vmatpush3.bf16.msra.mxu1 %v7282_v39  ;;  %6651 = vmatpush3.bf16.msra.mxu0 %v7282_v39  ;;  %v7315_v39 = vld [vmem:[%s9872_s5 + $0x270] sm:$0xff]  }
 0x346   :  { %6632 = vmatprep.subr.bf16.mxu1 %v9889_v31  ;;  %6652 = vmatprep.subr.bf16.mxu0 %v9889_v31 }
 0x349   :  { %6633 = vmatpush3.bf16.msra.mxu1 %v7283_v40  ;;  %6653 = vmatpush3.bf16.msra.mxu0 %v7283_v40 }
 0x34a   :  { %6634 = vmatprep.subr.bf16.mxu1 %v9889_v31  ;;  %6654 = vmatprep.subr.bf16.mxu0 %v9889_v31 }
 0x34d   :  { %6635 = vmatpush3.bf16.msra.mxu1 %v7284_v41  ;;  %6655 = vmatpush3.bf16.msra.mxu0 %v7284_v41 }
 0x34e   :  { %6660 = vmatprep.subr.bf16.mxu1 %v9889_v31  ;;  %6680 = vmatprep.subr.bf16.mxu0 %v9889_v31 }
 0x350   :  { %6637 = vmatmul.mubr.bf16.vlgmr.msra.gmra.mrb[20].mxu1 %v7649_v60  ;;  %6657 = vmatmul.mubr.bf16.vlgmr.msra.gmra.mrb[24].mxu0 %v7651_v61 }
 0x351   :  { %6661 = vmatpush3.bf16.msra.mxu1 %v7285_v42  ;;  %6681 = vmatpush3.bf16.msra.mxu0 %v7285_v42  ;;  %v7316_v42 = vld [vmem:[%s9872_s5 + $0x278] sm:$0xff]  }
 0x352   :  { %6662 = vmatprep.subr.bf16.mxu1 %v9889_v31  ;;  %6682 = vmatprep.subr.bf16.mxu0 %v9889_v31 }
 0x353   :  { %6676 = vmatprep.mubr.msk.bf16.mxu1 %vm7451_vm1, %v9889_v31  ;;  %6696 = vmatprep.mubr.msk.bf16.mxu0 %vm7451_vm1, %v9889_v31 }
 0x355   :  { %6663 = vmatpush3.bf16.msra.mxu1 %v7286_v43  ;;  %6683 = vmatpush3.bf16.msra.mxu0 %v7286_v43  ;;  %v7317_v43 = vld [vmem:[%s9872_s5 + $0x280] sm:$0xff]  }
 0x356   :  { %6664 = vmatprep.subr.bf16.mxu1 %v9889_v31  ;;  %6684 = vmatprep.subr.bf16.mxu0 %v9889_v31 }
 0x359   :  { %6665 = vmatpush3.bf16.msra.mxu1 %v7287_v44  ;;  %6685 = vmatpush3.bf16.msra.mxu0 %v7287_v44  ;;  %v7318_v44 = vld [vmem:[%s9872_s5 + $0x288] sm:$0xff]  }
 0x35a   :  { %6666 = vmatprep.subr.bf16.mxu1 %v9889_v31  ;;  %6686 = vmatprep.subr.bf16.mxu0 %v9889_v31 }
 0x35d   :  { %6667 = vmatpush3.bf16.msra.mxu1 %v7288_v45  ;;  %6687 = vmatpush3.bf16.msra.mxu0 %v7288_v45  ;;  %v7319_v45 = vld [vmem:[%s9872_s5 + $0x290] sm:$0xff]  }
 0x35e   :  { %6668 = vmatprep.subr.bf16.mxu1 %v9889_v31  ;;  %6688 = vmatprep.subr.bf16.mxu0 %v9889_v31 }
 0x361   :  { %6669 = vmatpush3.bf16.msra.mxu1 %v7289_v46  ;;  %6689 = vmatpush3.bf16.msra.mxu0 %v7289_v46  ;;  %v7320_v46 = vld [vmem:[%s9872_s5 + $0x298] sm:$0xff]  }
 0x362   :  { %6670 = vmatprep.subr.bf16.mxu1 %v9889_v31  ;;  %6690 = vmatprep.subr.bf16.mxu0 %v9889_v31 }
 0x365   :  { %6671 = vmatpush3.bf16.msra.mxu1 %v7290_v47  ;;  %6691 = vmatpush3.bf16.msra.mxu0 %v7290_v47  ;;  %v7321_v47 = vld [vmem:[%s9872_s5 + $0x2a0] sm:$0xff]  }
 0x366   :  { %6672 = vmatprep.subr.bf16.mxu1 %v9889_v31  ;;  %6692 = vmatprep.subr.bf16.mxu0 %v9889_v31 }
 0x369   :  { %6673 = vmatpush3.bf16.msra.mxu1 %v7291_v48  ;;  %6693 = vmatpush3.bf16.msra.mxu0 %v7291_v48  ;;  %v7322_v48 = vld [vmem:[%s9872_s5 + $0x2a8] sm:$0xff]  }
 0x36a   :  { %6674 = vmatprep.subr.bf16.mxu1 %v9889_v31  ;;  %6694 = vmatprep.subr.bf16.mxu0 %v9889_v31 }
 0x36d   :  { %6675 = vmatpush3.bf16.msra.mxu1 %v7292_v49  ;;  %6695 = vmatpush3.bf16.msra.mxu0 %v7292_v49 }
 0x36e   :  { %6700 = vmatprep.subr.bf16.mxu1 %v9889_v31  ;;  %6720 = vmatprep.subr.bf16.mxu0 %v9889_v31 }
 0x370   :  { %6677 = vmatmul.mubr.bf16.vlgmr.msra.gmra.mrb[24].mxu1 %v7649_v60  ;;  %6697 = vmatmul.mubr.bf16.vlgmr.msra.gmra.mrb[28].mxu0 %v7651_v61 }
 0x371   :  { %6701 = vmatpush3.bf16.msra.mxu1 %v7293_v50  ;;  %6721 = vmatpush3.bf16.msra.mxu0 %v7293_v50 }
 0x372   :  { %6702 = vmatprep.subr.bf16.mxu1 %v9889_v31  ;;  %6722 = vmatprep.subr.bf16.mxu0 %v9889_v31 }
 0x373   :  { %6716 = vmatprep.mubr.msk.bf16.mxu1 %vm7451_vm1, %v9889_v31  ;;  %6736 = vmatprep.mubr.msk.bf16.mxu0 %vm7451_vm1, %v9889_v31 }
 0x375   :  { %6703 = vmatpush3.bf16.msra.mxu1 %v7294_v51  ;;  %6723 = vmatpush3.bf16.msra.mxu0 %v7294_v51 }
 0x376   :  { %6704 = vmatprep.subr.bf16.mxu1 %v9889_v31  ;;  %6724 = vmatprep.subr.bf16.mxu0 %v9889_v31 }
 0x379   :  { %6705 = vmatpush3.bf16.msra.mxu1 %v7295_v52  ;;  %6725 = vmatpush3.bf16.msra.mxu0 %v7295_v52 }
 0x37a   :  { %6706 = vmatprep.subr.bf16.mxu1 %v9889_v31  ;;  %6726 = vmatprep.subr.bf16.mxu0 %v9889_v31 }
 0x37d   :  { %6707 = vmatpush3.bf16.msra.mxu1 %v7296_v53  ;;  %6727 = vmatpush3.bf16.msra.mxu0 %v7296_v53 }
 0x37e   :  { %6708 = vmatprep.subr.bf16.mxu1 %v9889_v31  ;;  %6728 = vmatprep.subr.bf16.mxu0 %v9889_v31 }
 0x381   :  { %6709 = vmatpush3.bf16.msra.mxu1 %v7297_v54  ;;  %6729 = vmatpush3.bf16.msra.mxu0 %v7297_v54 }
 0x382   :  { %6710 = vmatprep.subr.bf16.mxu1 %v9889_v31  ;;  %6730 = vmatprep.subr.bf16.mxu0 %v9889_v31 }
 0x383   :  { %v7960_v56 = vpop.f32.mrb[0].mxu1  ;;  %v7962_v57 = vpop.f32.mrb[4].mxu0 }
 0x384   :  { %v6438_v58 = vpop.f32.mrb[1].mxu1  ;;  %v6458_v59 = vpop.f32.mrb[5].mxu0 }
 0x385   :  { %6711 = vmatpush3.bf16.msra.mxu1 %v7298_v55  ;;  %6731 = vmatpush3.bf16.msra.mxu0 %v7298_v55  ;;  %v302_v62 = vpop.f32.mrb[2].mxu1  ;;  %v343_v63 = vpop.f32.mrb[6].mxu0  ;;  %v7323_v59 = vld [vmem:[%s9872_s5 + $0x2b0] sm:$0xff]  }
 0x386   :  { %v6439_v2 = vpop.f32.mrb[3].mxu1  ;;  %v6459_v3 = vpop.f32.mrb[7].mxu0  ;;  %6712 = vmatprep.subr.bf16.mxu1 %v9889_v31  ;;  %6732 = vmatprep.subr.bf16.mxu0 %v9889_v31 }
 0x387   :  { %v7325_v2 = vld [vmem:[%s9872_s5 + $0x2c0] sm:$0xff]   ;;  %v7326_v3 = vld [vmem:[%s9872_s5 + $0x2c8] sm:$0xff]  }
 0x389   :  { %6713 = vmatpush3.bf16.msra.mxu1 %v7299_v0  ;;  %6733 = vmatpush3.bf16.msra.mxu0 %v7299_v0  ;;  %v7324_v0 = vld [vmem:[%s9872_s5 + $0x2b8] sm:$0xff]  }
 0x38a   :  { %6714 = vmatprep.subr.bf16.mxu1 %v9889_v31  ;;  %6734 = vmatprep.subr.bf16.mxu0 %v9889_v31 }
 0x38d   :  { %6715 = vmatpush3.bf16.msra.mxu1 %v7300_v4  ;;  %6735 = vmatpush3.bf16.msra.mxu0 %v7300_v4  ;;  %v7327_v4 = vld [vmem:[%s9872_s5 + $0x2d0] sm:$0xff]  }
 0x38e   :  { %6740 = vmatprep.subr.bf16.mxu1 %v9889_v31  ;;  %6760 = vmatprep.subr.bf16.mxu0 %v9889_v31 }
 0x390   :  { %6717 = vmatmul.mubr.bf16.vlgmr.msra.gmra.mrb[28].mxu1 %v7649_v60  ;;  %6737 = vmatmul.mubr.bf16.vlgmr.msra.gmra.mrb[32].mxu0 %v7651_v61 }
 0x391   :  { %6741 = vmatpush3.bf16.msra.mxu1 %v7301_v5  ;;  %6761 = vmatpush3.bf16.msra.mxu0 %v7301_v5  ;;  %v7328_v5 = vld [vmem:[%s9872_s5 + $0x2d8] sm:$0xff]  }
 0x392   :  { %6742 = vmatprep.subr.bf16.mxu1 %v9889_v31  ;;  %6762 = vmatprep.subr.bf16.mxu0 %v9889_v31 }
 0x393   :  { %6756 = vmatprep.mubr.msk.bf16.mxu1 %vm7451_vm1, %v9889_v31  ;;  %6776 = vmatprep.mubr.msk.bf16.mxu0 %vm7451_vm1, %v9889_v31 }
 0x395   :  { %6743 = vmatpush3.bf16.msra.mxu1 %v7302_v6  ;;  %6763 = vmatpush3.bf16.msra.mxu0 %v7302_v6  ;;  %v7329_v6 = vld [vmem:[%s9872_s5 + $0x2e0] sm:$0xff]  }
 0x396   :  { %6744 = vmatprep.subr.bf16.mxu1 %v9889_v31  ;;  %6764 = vmatprep.subr.bf16.mxu0 %v9889_v31 }
 0x399   :  { %6745 = vmatpush3.bf16.msra.mxu1 %v7303_v7  ;;  %6765 = vmatpush3.bf16.msra.mxu0 %v7303_v7  ;;  %v7330_v7 = vld [vmem:[%s9872_s5 + $0x2e8] sm:$0xff]  }
 0x39a   :  { %6746 = vmatprep.subr.bf16.mxu1 %v9889_v31  ;;  %6766 = vmatprep.subr.bf16.mxu0 %v9889_v31 }
 0x39d   :  { %6747 = vmatpush3.bf16.msra.mxu1 %v7304_v8  ;;  %6767 = vmatpush3.bf16.msra.mxu0 %v7304_v8 }
 0x39e   :  { %6748 = vmatprep.subr.bf16.mxu1 %v9889_v31  ;;  %6768 = vmatprep.subr.bf16.mxu0 %v9889_v31 }
 0x3a1   :  { %6749 = vmatpush3.bf16.msra.mxu1 %v7305_v11  ;;  %6769 = vmatpush3.bf16.msra.mxu0 %v7305_v11 }
 0x3a2   :  { %6750 = vmatprep.subr.bf16.mxu1 %v9889_v31  ;;  %6770 = vmatprep.subr.bf16.mxu0 %v9889_v31 }
 0x3a3   :  { %v8010_v14 = vpop.f32.mrb[4].mxu1  ;;  %v8012_v15 = vpop.f32.mrb[8].mxu0 }
 0x3a4   :  { %v2586_v16 = vpack.c.bf16 %v8010_v14, %v7960_v56  ;;  %v2587_v17 = vpack.c.bf16 %v8012_v15, %v7962_v57  ;;  %v6478_v18 = vpop.f32.mrb[5].mxu1  ;;  %v6498_v19 = vpop.f32.mrb[9].mxu0 }
 0x3a5   :  { %v449_v20 = vpop.f32.mrb[6].mxu1  ;;  %v490_v21 = vpop.f32.mrb[10].mxu0  ;;  %6751 = vmatpush3.bf16.msra.mxu1 %v7306_v13  ;;  %6771 = vmatpush3.bf16.msra.mxu0 %v7306_v13 }
 0x3a6   :  { %v6479_v23 = vpop.f32.mrb[7].mxu1  ;;  %v6499_v24 = vpop.f32.mrb[11].mxu0  ;;  %6752 = vmatprep.subr.bf16.mxu1 %v9889_v31  ;;  %6772 = vmatprep.subr.bf16.mxu0 %v9889_v31  ;;  %v7331_v21 = vld [vmem:[%s9872_s5 + $0x2f0] sm:$0xff]  }
 0x3a7   :  { %v7332_v24 = vld [vmem:[%s9872_s5 + $0x2f8] sm:$0xff]  }
 0x3a9   :  { %6753 = vmatpush3.bf16.msra.mxu1 %v7307_v22  ;;  %6773 = vmatpush3.bf16.msra.mxu0 %v7307_v22 }
 0x3aa   :  { %6754 = vmatprep.subr.bf16.mxu1 %v9889_v31  ;;  %6774 = vmatprep.subr.bf16.mxu0 %v9889_v31 }
 0x3ad   :  { %6755 = vmatpush3.bf16.msra.mxu1 %v7308_v25  ;;  %6775 = vmatpush3.bf16.msra.mxu0 %v7308_v25  ;;  %v7333_v25 = vld [vmem:[%s9872_s5 + $0x300] sm:$0xff]  }
 0x3ae   :  { %6780 = vmatprep.subr.bf16.mxu1 %v9889_v31  ;;  %6800 = vmatprep.subr.bf16.mxu0 %v9889_v31 }
 0x3b0   :  { %6757 = vmatmul.mubr.bf16.vlgmr.msra.gmra.mrb[32].mxu1 %v7649_v60  ;;  %6777 = vmatmul.mubr.bf16.vlgmr.msra.gmra.mrb[36].mxu0 %v7651_v61 }
 0x3b1   :  { %6781 = vmatpush3.bf16.msra.mxu1 %v7309_v26  ;;  %6801 = vmatpush3.bf16.msra.mxu0 %v7309_v26  ;;  %v7334_v26 = vld [vmem:[%s9872_s5 + $0x308] sm:$0xff]  }
 0x3b2   :  { %6782 = vmatprep.subr.bf16.mxu1 %v9889_v31  ;;  %6802 = vmatprep.subr.bf16.mxu0 %v9889_v31 }
 0x3b3   :  { %6796 = vmatprep.mubr.msk.bf16.mxu1 %vm7451_vm1, %v9889_v31  ;;  %6816 = vmatprep.mubr.msk.bf16.mxu0 %vm7451_vm1, %v9889_v31 }
 0x3b5   :  { %6783 = vmatpush3.bf16.msra.mxu1 %v7310_v27  ;;  %6803 = vmatpush3.bf16.msra.mxu0 %v7310_v27  ;;  %v7335_v27 = vld [vmem:[%s9872_s5 + $0x310] sm:$0xff]  }
 0x3b6   :  { %6784 = vmatprep.subr.bf16.mxu1 %v9889_v31  ;;  %6804 = vmatprep.subr.bf16.mxu0 %v9889_v31 }
 0x3b9   :  { %6785 = vmatpush3.bf16.msra.mxu1 %v7311_v28  ;;  %6805 = vmatpush3.bf16.msra.mxu0 %v7311_v28  ;;  %v7336_v28 = vld [vmem:[%s9872_s5 + $0x318] sm:$0xff]  }
 0x3ba   :  { %6786 = vmatprep.subr.bf16.mxu1 %v9889_v31  ;;  %6806 = vmatprep.subr.bf16.mxu0 %v9889_v31 }
 0x3bd   :  { %6787 = vmatpush3.bf16.msra.mxu1 %v7312_v29  ;;  %6807 = vmatpush3.bf16.msra.mxu0 %v7312_v29  ;;  %v7337_v29 = vld [vmem:[%s9872_s5 + $0x320] sm:$0xff]  }
 0x3be   :  { %6788 = vmatprep.subr.bf16.mxu1 %v9889_v31  ;;  %6808 = vmatprep.subr.bf16.mxu0 %v9889_v31 }
 0x3c1   :  { %6789 = vmatpush3.bf16.msra.mxu1 %v7313_v30  ;;  %6809 = vmatpush3.bf16.msra.mxu0 %v7313_v30  ;;  %v7338_v30 = vld [vmem:[%s9872_s5 + $0x328] sm:$0xff]  }
 0x3c2   :  { %6790 = vmatprep.subr.bf16.mxu1 %v9889_v31  ;;  %6810 = vmatprep.subr.bf16.mxu0 %v9889_v31 }
 0x3c3   :  { %v8064_v33 = vpop.f32.mrb[8].mxu1  ;;  %v8066_v34 = vpop.f32.mrb[12].mxu0 }
 0x3c4   :  { %v6518_v35 = vpop.f32.mrb[9].mxu1  ;;  %v6538_v36 = vpop.f32.mrb[13].mxu0 }
 0x3c5   :  { %v596_v37 = vpop.f32.mrb[10].mxu1  ;;  %v637_v38 = vpop.f32.mrb[14].mxu0  ;;  %6791 = vmatpush3.bf16.msra.mxu1 %v7314_v32  ;;  %6811 = vmatpush3.bf16.msra.mxu0 %v7314_v32 }
 0x3c6   :  { %v6519_v40 = vpop.f32.mrb[11].mxu1  ;;  %v6539_v41 = vpop.f32.mrb[15].mxu0  ;;  %6792 = vmatprep.subr.bf16.mxu1 %v9889_v31  ;;  %6812 = vmatprep.subr.bf16.mxu0 %v9889_v31 }
 0x3c9   :  { %6793 = vmatpush3.bf16.msra.mxu1 %v7315_v39  ;;  %6813 = vmatpush3.bf16.msra.mxu0 %v7315_v39 }
 0x3ca   :  { %6794 = vmatprep.subr.bf16.mxu1 %v9889_v31  ;;  %6814 = vmatprep.subr.bf16.mxu0 %v9889_v31 }
 0x3cd   :  { %6795 = vmatpush3.bf16.msra.mxu1 %v7316_v42  ;;  %6815 = vmatpush3.bf16.msra.mxu0 %v7316_v42  ;;  %v7339_v42 = vld [vmem:[%s9872_s5 + $0x330] sm:$0xff]  }
 0x3ce   :  { %6820 = vmatprep.subr.bf16.mxu1 %v9889_v31  ;;  %6840 = vmatprep.subr.bf16.mxu0 %v9889_v31 }
 0x3d0   :  { %6797 = vmatmul.mubr.bf16.vlgmr.msra.gmra.mrb[36].mxu1 %v7649_v60  ;;  %6817 = vmatmul.mubr.bf16.vlgmr.msra.gmra.mrb[40].mxu0 %v7651_v61 }
 0x3d1   :  { %6821 = vmatpush3.bf16.msra.mxu1 %v7317_v43  ;;  %6841 = vmatpush3.bf16.msra.mxu0 %v7317_v43 }
 0x3d2   :  { %6822 = vmatprep.subr.bf16.mxu1 %v9889_v31  ;;  %6842 = vmatprep.subr.bf16.mxu0 %v9889_v31 }
 0x3d3   :  { %6836 = vmatprep.mubr.msk.bf16.mxu1 %vm7451_vm1, %v9889_v31  ;;  %6856 = vmatprep.mubr.msk.bf16.mxu0 %vm7451_vm1, %v9889_v31 }
 0x3d5   :  { %6823 = vmatpush3.bf16.msra.mxu1 %v7318_v44  ;;  %6843 = vmatpush3.bf16.msra.mxu0 %v7318_v44 }
 0x3d6   :  { %6824 = vmatprep.subr.bf16.mxu1 %v9889_v31  ;;  %6844 = vmatprep.subr.bf16.mxu0 %v9889_v31 }
 0x3d9   :  { %6825 = vmatpush3.bf16.msra.mxu1 %v7319_v45  ;;  %6845 = vmatpush3.bf16.msra.mxu0 %v7319_v45  ;;  %v7340_v45 = vld [vmem:[%s9872_s5 + $0x338] sm:$0xff]  }
 0x3da   :  { %6826 = vmatprep.subr.bf16.mxu1 %v9889_v31  ;;  %6846 = vmatprep.subr.bf16.mxu0 %v9889_v31 }
 0x3dd   :  { %6827 = vmatpush3.bf16.msra.mxu1 %v7320_v46  ;;  %6847 = vmatpush3.bf16.msra.mxu0 %v7320_v46  ;;  %v7341_v46 = vld [vmem:[%s9872_s5 + $0x340] sm:$0xff]  }
 0x3de   :  { %6828 = vmatprep.subr.bf16.mxu1 %v9889_v31  ;;  %6848 = vmatprep.subr.bf16.mxu0 %v9889_v31 }
 0x3e1   :  { %6829 = vmatpush3.bf16.msra.mxu1 %v7321_v47  ;;  %6849 = vmatpush3.bf16.msra.mxu0 %v7321_v47  ;;  %v7342_v47 = vld [vmem:[%s9872_s5 + $0x348] sm:$0xff]  }
 0x3e2   :  { %6830 = vmatprep.subr.bf16.mxu1 %v9889_v31  ;;  %6850 = vmatprep.subr.bf16.mxu0 %v9889_v31 }
 0x3e3   :  { %v8114_v49 = vpop.f32.mrb[12].mxu1  ;;  %v8116_v50 = vpop.f32.mrb[16].mxu0 }
 0x3e4   :  { %v2588_v51 = vpack.c.bf16 %v8114_v49, %v8064_v33  ;;  %v2589_v52 = vpack.c.bf16 %v8116_v50, %v8066_v34  ;;  %v6558_v53 = vpop.f32.mrb[13].mxu1  ;;  %v6578_v54 = vpop.f32.mrb[17].mxu0 }
 0x3e5   :  { %v743_v55 = vpop.f32.mrb[14].mxu1  ;;  %v784_v58 = vpop.f32.mrb[18].mxu0  ;;  %6831 = vmatpush3.bf16.msra.mxu1 %v7322_v48  ;;  %6851 = vmatpush3.bf16.msra.mxu0 %v7322_v48  ;;  %v7343_v48 = vld [vmem:[%s9872_s5 + $0x350] sm:$0xff]   ;;  %v7344_v53 = vld [vmem:[%s9872_s5 + $0x358] sm:$0xff]   ;;  %v7345_v54 = vld [vmem:[%s9872_s5 + $0x360] sm:$0xff]  }
 0x3e6   :  { %v6559_v62 = vpop.f32.mrb[15].mxu1  ;;  %v6579_v63 = vpop.f32.mrb[19].mxu0  ;;  %6832 = vmatprep.subr.bf16.mxu1 %v9889_v31  ;;  %6852 = vmatprep.subr.bf16.mxu0 %v9889_v31  ;;  %v7346_v55 = vld [vmem:[%s9872_s5 + $0x368] sm:$0xff]  }
 0x3e9   :  { %6833 = vmatpush3.bf16.msra.mxu1 %v7323_v59  ;;  %6853 = vmatpush3.bf16.msra.mxu0 %v7323_v59 }
 0x3ea   :  { %6834 = vmatprep.subr.bf16.mxu1 %v9889_v31  ;;  %6854 = vmatprep.subr.bf16.mxu0 %v9889_v31 }
 0x3ed   :  { %6835 = vmatpush3.bf16.msra.mxu1 %v7324_v0  ;;  %6855 = vmatpush3.bf16.msra.mxu0 %v7324_v0 }
 0x3ee   :  { %6860 = vmatprep.subr.bf16.mxu1 %v9889_v31  ;;  %6880 = vmatprep.subr.bf16.mxu0 %v9889_v31 }
 0x3f0   :  { %6837 = vmatmul.mubr.bf16.vlgmr.msra.gmra.mrb[40].mxu1 %v7649_v60  ;;  %6857 = vmatmul.mubr.bf16.vlgmr.msra.gmra.mrb[44].mxu0 %v7651_v61 }
 0x3f1   :  { %6861 = vmatpush3.bf16.msra.mxu1 %v7325_v2  ;;  %6881 = vmatpush3.bf16.msra.mxu0 %v7325_v2 }
 0x3f2   :  { %6862 = vmatprep.subr.bf16.mxu1 %v9889_v31  ;;  %6882 = vmatprep.subr.bf16.mxu0 %v9889_v31 }
 0x3f3   :  { %6876 = vmatprep.mubr.msk.bf16.mxu1 %vm7451_vm1, %v9889_v31  ;;  %6896 = vmatprep.mubr.msk.bf16.mxu0 %vm7451_vm1, %v9889_v31 }
 0x3f5   :  { %6863 = vmatpush3.bf16.msra.mxu1 %v7326_v3  ;;  %6883 = vmatpush3.bf16.msra.mxu0 %v7326_v3  ;;  %v7347_v3 = vld [vmem:[%s9872_s5 + $0x370] sm:$0xff]  }
 0x3f6   :  { %6864 = vmatprep.subr.bf16.mxu1 %v9889_v31  ;;  %6884 = vmatprep.subr.bf16.mxu0 %v9889_v31 }
 0x3f9   :  { %6865 = vmatpush3.bf16.msra.mxu1 %v7327_v4  ;;  %6885 = vmatpush3.bf16.msra.mxu0 %v7327_v4 }
 0x3fa   :  { %6866 = vmatprep.subr.bf16.mxu1 %v9889_v31  ;;  %6886 = vmatprep.subr.bf16.mxu0 %v9889_v31 }
 0x3fd   :  { %6867 = vmatpush3.bf16.msra.mxu1 %v7328_v5  ;;  %6887 = vmatpush3.bf16.msra.mxu0 %v7328_v5 }
 0x3fe   :  { %6868 = vmatprep.subr.bf16.mxu1 %v9889_v31  ;;  %6888 = vmatprep.subr.bf16.mxu0 %v9889_v31 }
 0x401   :  { %6869 = vmatpush3.bf16.msra.mxu1 %v7329_v6  ;;  %6889 = vmatpush3.bf16.msra.mxu0 %v7329_v6  ;;  %v7348_v6 = vld [vmem:[%s9872_s5 + $0x378] sm:$0xff]  }
 0x402   :  { %6870 = vmatprep.subr.bf16.mxu1 %v9889_v31  ;;  %6890 = vmatprep.subr.bf16.mxu0 %v9889_v31 }
 0x403   :  { %v8168_v8 = vpop.f32.mrb[16].mxu1  ;;  %v8170_v11 = vpop.f32.mrb[20].mxu0 }
 0x404   :  { %v6598_v13 = vpop.f32.mrb[17].mxu1  ;;  %v6618_v18 = vpop.f32.mrb[21].mxu0 }
 0x405   :  { %v890_v19 = vpop.f32.mrb[18].mxu1  ;;  %v931_v20 = vpop.f32.mrb[22].mxu0  ;;  %6871 = vmatpush3.bf16.msra.mxu1 %v7330_v7  ;;  %6891 = vmatpush3.bf16.msra.mxu0 %v7330_v7  ;;  %v7349_v7 = vld [vmem:[%s9872_s5 + $0x380] sm:$0xff]   ;;  %v7350_v13 = vld [vmem:[%s9872_s5 + $0x388] sm:$0xff]   ;;  %v7351_v18 = vld [vmem:[%s9872_s5 + $0x390] sm:$0xff]  }
 0x406   :  { %v6599_v22 = vpop.f32.mrb[19].mxu1  ;;  %v6619_v23 = vpop.f32.mrb[23].mxu0  ;;  %6872 = vmatprep.subr.bf16.mxu1 %v9889_v31  ;;  %6892 = vmatprep.subr.bf16.mxu0 %v9889_v31  ;;  %v7352_v19 = vld [vmem:[%s9872_s5 + $0x398] sm:$0xff]   ;;  %v7353_v20 = vld [vmem:[%s9872_s5 + $0x3a0] sm:$0xff]  }
 0x409   :  { %6873 = vmatpush3.bf16.msra.mxu1 %v7331_v21  ;;  %6893 = vmatpush3.bf16.msra.mxu0 %v7331_v21  ;;  %v7354_v21 = vld [vmem:[%s9872_s5 + $0x3a8] sm:$0xff]  }
 0x40a   :  { %6874 = vmatprep.subr.bf16.mxu1 %v9889_v31  ;;  %6894 = vmatprep.subr.bf16.mxu0 %v9889_v31 }
 0x40d   :  { %6875 = vmatpush3.bf16.msra.mxu1 %v7332_v24  ;;  %6895 = vmatpush3.bf16.msra.mxu0 %v7332_v24 }
 0x40e   :  { %6900 = vmatprep.subr.bf16.mxu1 %v9889_v31  ;;  %6920 = vmatprep.subr.bf16.mxu0 %v9889_v31 }
 0x410   :  { %6877 = vmatmul.mubr.bf16.vlgmr.msra.gmra.mrb[44].mxu1 %v7649_v60  ;;  %6897 = vmatmul.mubr.bf16.vlgmr.msra.gmra.mrb[48].mxu0 %v7651_v61 }
 0x411   :  { %6901 = vmatpush3.bf16.msra.mxu1 %v7333_v25  ;;  %6921 = vmatpush3.bf16.msra.mxu0 %v7333_v25 }
 0x412   :  { %6902 = vmatprep.subr.bf16.mxu1 %v9889_v31  ;;  %6922 = vmatprep.subr.bf16.mxu0 %v9889_v31 }
 0x413   :  { %6916 = vmatprep.mubr.msk.bf16.mxu1 %vm7451_vm1, %v9889_v31  ;;  %6936 = vmatprep.mubr.msk.bf16.mxu0 %vm7451_vm1, %v9889_v31 }
 0x415   :  { %6903 = vmatpush3.bf16.msra.mxu1 %v7334_v26  ;;  %6923 = vmatpush3.bf16.msra.mxu0 %v7334_v26 }
 0x416   :  { %6904 = vmatprep.subr.bf16.mxu1 %v9889_v31  ;;  %6924 = vmatprep.subr.bf16.mxu0 %v9889_v31 }
 0x419   :  { %6905 = vmatpush3.bf16.msra.mxu1 %v7335_v27  ;;  %6925 = vmatpush3.bf16.msra.mxu0 %v7335_v27 }
 0x41a   :  { %6906 = vmatprep.subr.bf16.mxu1 %v9889_v31  ;;  %6926 = vmatprep.subr.bf16.mxu0 %v9889_v31 }
 0x41d   :  { %6907 = vmatpush3.bf16.msra.mxu1 %v7336_v28  ;;  %6927 = vmatpush3.bf16.msra.mxu0 %v7336_v28 }
 0x41e   :  { %6908 = vmatprep.subr.bf16.mxu1 %v9889_v31  ;;  %6928 = vmatprep.subr.bf16.mxu0 %v9889_v31 }
 0x421   :  { %6909 = vmatpush3.bf16.msra.mxu1 %v7337_v29  ;;  %6929 = vmatpush3.bf16.msra.mxu0 %v7337_v29 }
 0x422   :  { %6910 = vmatprep.subr.bf16.mxu1 %v9889_v31  ;;  %6930 = vmatprep.subr.bf16.mxu0 %v9889_v31 }
 0x423   :  { %v8218_v32 = vpop.f32.mrb[20].mxu1  ;;  %v8220_v35 = vpop.f32.mrb[24].mxu0 }
 0x424   :  { %v2590_v36 = vpack.c.bf16 %v8218_v32, %v8168_v8  ;;  %v2591_v37 = vpack.c.bf16 %v8220_v35, %v8170_v11  ;;  %v6638_v38 = vpop.f32.mrb[21].mxu1  ;;  %v6658_v39 = vpop.f32.mrb[25].mxu0 }
 0x425   :  { %v1037_v40 = vpop.f32.mrb[22].mxu1  ;;  %v1078_v41 = vpop.f32.mrb[26].mxu0  ;;  %6911 = vmatpush3.bf16.msra.mxu1 %v7338_v30  ;;  %6931 = vmatpush3.bf16.msra.mxu0 %v7338_v30  ;;  %v7355_v30 = vld [vmem:[%s9872_s5 + $0x3b0] sm:$0xff]  }
 0x426   :  { %v6639_v43 = vpop.f32.mrb[23].mxu1  ;;  %v6659_v44 = vpop.f32.mrb[27].mxu0  ;;  %6912 = vmatprep.subr.bf16.mxu1 %v9889_v31  ;;  %6932 = vmatprep.subr.bf16.mxu0 %v9889_v31  ;;  %v7356_v40 = vld [vmem:[%s9872_s5 + $0x3b8] sm:$0xff]   ;;  %v7357_v41 = vld [vmem:[%s9872_s5 + $0x3c0] sm:$0xff]  }
 0x427   :  { %v7359_v43 = vld [vmem:[%s9872_s5 + $0x3d0] sm:$0xff]   ;;  %v7360_v44 = vld [vmem:[%s9872_s5 + $0x3d8] sm:$0xff]  }
 0x429   :  { %6913 = vmatpush3.bf16.msra.mxu1 %v7339_v42  ;;  %6933 = vmatpush3.bf16.msra.mxu0 %v7339_v42  ;;  %v7358_v42 = vld [vmem:[%s9872_s5 + $0x3c8] sm:$0xff]  }
 0x42a   :  { %6914 = vmatprep.subr.bf16.mxu1 %v9889_v31  ;;  %6934 = vmatprep.subr.bf16.mxu0 %v9889_v31 }
 0x42d   :  { %6915 = vmatpush3.bf16.msra.mxu1 %v7340_v45  ;;  %6935 = vmatpush3.bf16.msra.mxu0 %v7340_v45  ;;  %v7361_v45 = vld [vmem:[%s9872_s5 + $0x3e0] sm:$0xff]  }
 0x42e   :  { %6940 = vmatprep.subr.bf16.mxu1 %v9889_v31  ;;  %6960 = vmatprep.subr.bf16.mxu0 %v9889_v31 }
 0x430   :  { %6917 = vmatmul.mubr.bf16.vlgmr.msra.gmra.mrb[48].mxu1 %v7649_v60  ;;  %6937 = vmatmul.mubr.bf16.vlgmr.msra.gmra.mrb[52].mxu0 %v7651_v61 }
 0x431   :  { %6941 = vmatpush3.bf16.msra.mxu1 %v7341_v46  ;;  %6961 = vmatpush3.bf16.msra.mxu0 %v7341_v46  ;;  %v7362_v46 = vld [vmem:[%s9872_s5 + $0x3e8] sm:$0xff]  }
 0x432   :  { %6942 = vmatprep.subr.bf16.mxu1 %v9889_v31  ;;  %6962 = vmatprep.subr.bf16.mxu0 %v9889_v31 }
 0x433   :  { %6956 = vmatprep.mubr.msk.bf16.mxu1 %vm7451_vm1, %v9889_v31  ;;  %6976 = vmatprep.mubr.msk.bf16.mxu0 %vm7451_vm1, %v9889_v31 }
 0x435   :  { %6943 = vmatpush3.bf16.msra.mxu1 %v7342_v47  ;;  %6963 = vmatpush3.bf16.msra.mxu0 %v7342_v47 }
 0x436   :  { %6944 = vmatprep.subr.bf16.mxu1 %v9889_v31  ;;  %6964 = vmatprep.subr.bf16.mxu0 %v9889_v31 }
 0x439   :  { %6945 = vmatpush3.bf16.msra.mxu1 %v7343_v48  ;;  %6965 = vmatpush3.bf16.msra.mxu0 %v7343_v48 }
 0x43a   :  { %6946 = vmatprep.subr.bf16.mxu1 %v9889_v31  ;;  %6966 = vmatprep.subr.bf16.mxu0 %v9889_v31 }
 0x43d   :  { %6947 = vmatpush3.bf16.msra.mxu1 %v7344_v53  ;;  %6967 = vmatpush3.bf16.msra.mxu0 %v7344_v53 }
 0x43e   :  { %6948 = vmatprep.subr.bf16.mxu1 %v9889_v31  ;;  %6968 = vmatprep.subr.bf16.mxu0 %v9889_v31 }
 0x441   :  { %6949 = vmatpush3.bf16.msra.mxu1 %v7345_v54  ;;  %6969 = vmatpush3.bf16.msra.mxu0 %v7345_v54 }
 0x442   :  { %6950 = vmatprep.subr.bf16.mxu1 %v9889_v31  ;;  %6970 = vmatprep.subr.bf16.mxu0 %v9889_v31 }
 0x443   :  { %v8272_v58 = vpop.f32.mrb[24].mxu1  ;;  %v8274_v59 = vpop.f32.mrb[28].mxu0 }
 0x444   :  { %v6678_v62 = vpop.f32.mrb[25].mxu1  ;;  %v6698_v63 = vpop.f32.mrb[29].mxu0 }
 0x445   :  { %v1184_v0 = vpop.f32.mrb[26].mxu1  ;;  %v1225_v2 = vpop.f32.mrb[30].mxu0  ;;  %6951 = vmatpush3.bf16.msra.mxu1 %v7346_v55  ;;  %6971 = vmatpush3.bf16.msra.mxu0 %v7346_v55  ;;  %v7363_v63 = vld [vmem:[%s9872_s5 + $0x3f0] sm:$0xff]  }
 0x446   :  { %v6679_v4 = vpop.f32.mrb[27].mxu1  ;;  %v6699_v5 = vpop.f32.mrb[31].mxu0  ;;  %6952 = vmatprep.subr.bf16.mxu1 %v9889_v31  ;;  %6972 = vmatprep.subr.bf16.mxu0 %v9889_v31 }
 0x449   :  { %6953 = vmatpush3.bf16.msra.mxu1 %v7347_v3  ;;  %6973 = vmatpush3.bf16.msra.mxu0 %v7347_v3  ;;  %v7364_v3 = vld [vmem:[%s9872_s5 + $0x3f8] sm:$0xff]  }
 0x44a   :  { %6954 = vmatprep.subr.bf16.mxu1 %v9889_v31  ;;  %6974 = vmatprep.subr.bf16.mxu0 %v9889_v31 }
 0x44d   :  { %6955 = vmatpush3.bf16.msra.mxu1 %v7348_v6  ;;  %6975 = vmatpush3.bf16.msra.mxu0 %v7348_v6 }
 0x44e   :  { %6980 = vmatprep.subr.bf16.mxu1 %v9889_v31  ;;  %7000 = vmatprep.subr.bf16.mxu0 %v9889_v31 }
 0x450   :  { %6957 = vmatmul.mubr.bf16.vlgmr.msra.gmra.mrb[52].mxu1 %v7649_v60  ;;  %6977 = vmatmul.mubr.bf16.vlgmr.msra.gmra.mrb[56].mxu0 %v7651_v61 }
 0x451   :  { %6981 = vmatpush3.bf16.msra.mxu1 %v7349_v7  ;;  %7001 = vmatpush3.bf16.msra.mxu0 %v7349_v7 }
 0x452   :  { %6982 = vmatprep.subr.bf16.mxu1 %v9889_v31  ;;  %7002 = vmatprep.subr.bf16.mxu0 %v9889_v31 }
 0x453   :  { %6996 = vmatprep.mubr.msk.bf16.mxu1 %vm7451_vm1, %v9889_v31  ;;  %7016 = vmatprep.mubr.msk.bf16.mxu0 %vm7451_vm1, %v9889_v31 }
 0x455   :  { %6983 = vmatpush3.bf16.msra.mxu1 %v7350_v13  ;;  %7003 = vmatpush3.bf16.msra.mxu0 %v7350_v13 }
 0x456   :  { %6984 = vmatprep.subr.bf16.mxu1 %v9889_v31  ;;  %7004 = vmatprep.subr.bf16.mxu0 %v9889_v31 }
 0x459   :  { %6985 = vmatpush3.bf16.msra.mxu1 %v7351_v18  ;;  %7005 = vmatpush3.bf16.msra.mxu0 %v7351_v18 }
 0x45a   :  { %6986 = vmatprep.subr.bf16.mxu1 %v9889_v31  ;;  %7006 = vmatprep.subr.bf16.mxu0 %v9889_v31 }
 0x45d   :  { %6987 = vmatpush3.bf16.msra.mxu1 %v7352_v19  ;;  %7007 = vmatpush3.bf16.msra.mxu0 %v7352_v19 }
 0x45e   :  { %6988 = vmatprep.subr.bf16.mxu1 %v9889_v31  ;;  %7008 = vmatprep.subr.bf16.mxu0 %v9889_v31 }
 0x461   :  { %6989 = vmatpush3.bf16.msra.mxu1 %v7353_v20  ;;  %7009 = vmatpush3.bf16.msra.mxu0 %v7353_v20 }
 0x462   :  { %6990 = vmatprep.subr.bf16.mxu1 %v9889_v31  ;;  %7010 = vmatprep.subr.bf16.mxu0 %v9889_v31 }
 0x463   :  { %v8322_v22 = vpop.f32.mrb[28].mxu1  ;;  %v8324_v23 = vpop.f32.mrb[32].mxu0 }
 0x464   :  { %v2592_v24 = vpack.c.bf16 %v8322_v22, %v8272_v58  ;;  %v2593_v25 = vpack.c.bf16 %v8324_v23, %v8274_v59  ;;  %v6718_v26 = vpop.f32.mrb[29].mxu1  ;;  %v6738_v27 = vpop.f32.mrb[33].mxu0 }
 0x465   :  { %v1331_v28 = vpop.f32.mrb[30].mxu1  ;;  %v1372_v29 = vpop.f32.mrb[34].mxu0  ;;  %6991 = vmatpush3.bf16.msra.mxu1 %v7354_v21  ;;  %7011 = vmatpush3.bf16.msra.mxu0 %v7354_v21 }
 0x466   :  { %v6719_v38 = vpop.f32.mrb[31].mxu1  ;;  %v6739_v39 = vpop.f32.mrb[35].mxu0  ;;  %6992 = vmatprep.subr.bf16.mxu1 %v9889_v31  ;;  %7012 = vmatprep.subr.bf16.mxu0 %v9889_v31 }
 0x469   :  { %6993 = vmatpush3.bf16.msra.mxu1 %v7355_v30  ;;  %7013 = vmatpush3.bf16.msra.mxu0 %v7355_v30 }
 0x46a   :  { %6994 = vmatprep.subr.bf16.mxu1 %v9889_v31  ;;  %7014 = vmatprep.subr.bf16.mxu0 %v9889_v31 }
 0x46d   :  { %6995 = vmatpush3.bf16.msra.mxu1 %v7356_v40  ;;  %7015 = vmatpush3.bf16.msra.mxu0 %v7356_v40 }
 0x46e   :  { %7020 = vmatprep.subr.bf16.mxu1 %v9889_v31  ;;  %7040 = vmatprep.subr.bf16.mxu0 %v9889_v31 }
 0x470   :  { %6997 = vmatmul.mubr.bf16.vlgmr.msra.gmra.mrb[56].mxu1 %v7649_v60  ;;  %7017 = vmatmul.mubr.bf16.vlgmr.msra.gmra.mrb[60].mxu0 %v7651_v61 }
 0x471   :  { %7021 = vmatpush3.bf16.msra.mxu1 %v7357_v41  ;;  %7041 = vmatpush3.bf16.msra.mxu0 %v7357_v41 }
 0x472   :  { %7022 = vmatprep.subr.bf16.mxu1 %v9889_v31  ;;  %7042 = vmatprep.subr.bf16.mxu0 %v9889_v31 }
 0x473   :  { %7036 = vmatprep.mubr.msk.bf16.mxu1 %vm7451_vm1, %v9889_v31  ;;  %7056 = vmatprep.mubr.msk.bf16.mxu0 %vm7451_vm1, %v9889_v31 }
 0x475   :  { %7023 = vmatpush3.bf16.msra.mxu1 %v7358_v42  ;;  %7043 = vmatpush3.bf16.msra.mxu0 %v7358_v42 }
 0x476   :  { %7024 = vmatprep.subr.bf16.mxu1 %v9889_v31  ;;  %7044 = vmatprep.subr.bf16.mxu0 %v9889_v31 }
 0x479   :  { %7025 = vmatpush3.bf16.msra.mxu1 %v7359_v43  ;;  %7045 = vmatpush3.bf16.msra.mxu0 %v7359_v43 }
 0x47a   :  { %7026 = vmatprep.subr.bf16.mxu1 %v9889_v31  ;;  %7046 = vmatprep.subr.bf16.mxu0 %v9889_v31 }
 0x47d   :  { %7027 = vmatpush3.bf16.msra.mxu1 %v7360_v44  ;;  %7047 = vmatpush3.bf16.msra.mxu0 %v7360_v44 }
 0x47e   :  { %7028 = vmatprep.subr.bf16.mxu1 %v9889_v31  ;;  %7048 = vmatprep.subr.bf16.mxu0 %v9889_v31 }
 0x481   :  { %7029 = vmatpush3.bf16.msra.mxu1 %v7361_v45  ;;  %7049 = vmatpush3.bf16.msra.mxu0 %v7361_v45 }
 0x482   :  { %7030 = vmatprep.subr.bf16.mxu1 %v9889_v31  ;;  %7050 = vmatprep.subr.bf16.mxu0 %v9889_v31 }
 0x483   :  { %v1475_v47 = vpop.f32.mrb[32].mxu1  ;;  %v1516_v48 = vpop.f32.mrb[36].mxu0 }
 0x484   :  { %v6758_v53 = vpop.f32.mrb[33].mxu1  ;;  %v6778_v54 = vpop.f32.mrb[37].mxu0 }
 0x485   :  { %v1478_v55 = vpop.f32.mrb[34].mxu1  ;;  %v1519_v62 = vpop.f32.mrb[38].mxu0  ;;  %7031 = vmatpush3.bf16.msra.mxu1 %v7362_v46  ;;  %7051 = vmatpush3.bf16.msra.mxu0 %v7362_v46 }
 0x486   :  { %v6759_v0 = vpop.f32.mrb[35].mxu1  ;;  %v6779_v2 = vpop.f32.mrb[39].mxu0  ;;  %7032 = vmatprep.subr.bf16.mxu1 %v9889_v31  ;;  %7052 = vmatprep.subr.bf16.mxu0 %v9889_v31 }
 0x489   :  { %7033 = vmatpush3.bf16.msra.mxu1 %v7363_v63  ;;  %7053 = vmatpush3.bf16.msra.mxu0 %v7363_v63 }
 0x48a   :  { %7034 = vmatprep.subr.bf16.mxu1 %v9889_v31  ;;  %7054 = vmatprep.subr.bf16.mxu0 %v9889_v31 }
 0x48d   :  { %7035 = vmatpush3.bf16.msra.mxu1 %v7364_v3  ;;  %7055 = vmatpush3.bf16.msra.mxu0 %v7364_v3 }
 0x48e   :  { %2608 = vmatprep.subr.bf16.mxu1 %v2587_v17 }
 0x490   :  { %7037 = vmatmul.mubr.bf16.vlgmr.msra.gmra.mrb[60].mxu1 %v7649_v60  ;;  %7057 = vmatmul.mubr.bf16.vlgmr.msra.gmra.mrb[64].mxu0 %v7651_v61 }
 0x491   :  { %2609 = vmatpush1.bf16.msra.mxu1 %v2586_v16  ;;  %2640 = vmatprep.mubr.bf16.mxu1 %v7449_v1 }
 0x492   :  { %2610 = vmatprep.subr.bf16.mxu1 %v2589_v52 }
 0x495   :  { %2611 = vmatpush1.bf16.msra.mxu1 %v2588_v51 }
 0x496   :  { %2612 = vmatprep.subr.bf16.mxu1 %v2591_v37 }
 0x499   :  { %2613 = vmatpush1.bf16.msra.mxu1 %v2590_v36 }
 0x49a   :  { %2614 = vmatprep.subr.bf16.mxu1 %v2593_v25 }
 0x49d   :  { %2615 = vmatpush1.bf16.msra.mxu1 %v2592_v24 }
 0x4a3   :  { %v1622_v1 = vpop.f32.mrb[36].mxu1  ;;  %v1663_v60 = vpop.f32.mrb[40].mxu0 }
 0x4a4   :  { %v2594_v61 = vpack.c.bf16 %v1622_v1, %v1475_v47  ;;  %v2595_v56 = vpack.c.bf16 %v1663_v60, %v1516_v48  ;;  %v6798_v57 = vpop.f32.mrb[37].mxu1  ;;  %v6818_v14 = vpop.f32.mrb[41].mxu0 }
 0x4a5   :  { %v1625_v15 = vpop.f32.mrb[38].mxu1  ;;  %v1666_v16 = vpop.f32.mrb[42].mxu0  ;;  %v7365_v57 = vld [vmem:[%s9875_s6] sm:$0xff]  }
 0x4a6   :  { %v6799_v17 = vpop.f32.mrb[39].mxu1  ;;  %v6819_v33 = vpop.f32.mrb[43].mxu0  ;;  %2616 = vmatprep.subr.bf16.mxu1 %v2595_v56  ;;  %v2655_v14 = vld [vmem:[%s9876_s9] sm:$0x3] }
 0x4a7   :  { %2617 = vmatpush1.bf16.msra.mxu1 %v2594_v61  ;;  %v2660_v15 = vrot.slane %v2655_v14, %v7575_v10  ;;  %v2664_v16 = vrot.slane %v2655_v14, %v154_v12  ;;  %v2773_v14 = vld [vmem:[%s9877_s10 + $0xc0] sm:$0xff]  ;;  %v7421_v10 = vld [vmem:[%s9882_s11 + $0x1b8] sm:$0xff]  }
 0x4c3   :  { %v1769_v34 = vpop.f32.mrb[40].mxu1  ;;  %v1810_v49 = vpop.f32.mrb[44].mxu0 }
 0x4c4   :  { %v6838_v50 = vpop.f32.mrb[41].mxu1  ;;  %v6858_v51 = vpop.f32.mrb[45].mxu0 }
 0x4c5   :  { %v1772_v52 = vpop.f32.mrb[42].mxu1  ;;  %v1813_v8 = vpop.f32.mrb[46].mxu0 }
 0x4c6   :  { %v6839_v11 = vpop.f32.mrb[43].mxu1  ;;  %v6859_v32 = vpop.f32.mrb[47].mxu0 }
 0x4e3   :  { %v1916_v35 = vpop.f32.mrb[44].mxu1  ;;  %v1957_v36 = vpop.f32.mrb[48].mxu0 }
 0x4e4   :  { %v2596_v37 = vpack.c.bf16 %v1916_v35, %v1769_v34  ;;  %v2597_v58 = vpack.c.bf16 %v1957_v36, %v1810_v49  ;;  %v6878_v59 = vpop.f32.mrb[45].mxu1  ;;  %v6898_v4 = vpop.f32.mrb[49].mxu0 }
 0x4e5   :  { %v1919_v5 = vpop.f32.mrb[46].mxu1  ;;  %v1960_v6 = vpop.f32.mrb[50].mxu0 }
 0x4e6   :  { %v6879_v7 = vpop.f32.mrb[47].mxu1  ;;  %v6899_v13 = vpop.f32.mrb[51].mxu0  ;;  %2618 = vmatprep.subr.bf16.mxu1 %v2597_v58 }
 0x4e7   :  { %2619 = vmatpush1.bf16.msra.mxu1 %v2596_v37 }
 0x503   :  { %v2063_v18 = vpop.f32.mrb[48].mxu1  ;;  %v2104_v19 = vpop.f32.mrb[52].mxu0 }
 0x504   :  { %v6918_v20 = vpop.f32.mrb[49].mxu1  ;;  %v6938_v21 = vpop.f32.mrb[53].mxu0 }
 0x505   :  { %v2066_v22 = vpop.f32.mrb[50].mxu1  ;;  %v2107_v23 = vpop.f32.mrb[54].mxu0 }
 0x506   :  { %v6919_v24 = vpop.f32.mrb[51].mxu1  ;;  %v6939_v25 = vpop.f32.mrb[55].mxu0 }
 0x507   :  { %v2765_v25 = vld [vmem:[%s9877_s10 + $0x80] sm:$0xff] }
 0x523   :  { %v2210_v26 = vpop.f32.mrb[52].mxu1  ;;  %v2251_v27 = vpop.f32.mrb[56].mxu0 }
 0x524   :  { %v2598_v28 = vpack.c.bf16 %v2210_v26, %v2063_v18  ;;  %v2599_v29 = vpack.c.bf16 %v2251_v27, %v2104_v19  ;;  %v6958_v30 = vpop.f32.mrb[53].mxu1  ;;  %v6978_v38 = vpop.f32.mrb[57].mxu0  ;;  %v2766_v26 = vld [vmem:[%s9877_s10 + $0x88] sm:$0xff] }
 0x525   :  { %v2213_v39 = vpop.f32.mrb[54].mxu1  ;;  %v2254_v40 = vpop.f32.mrb[58].mxu0  ;;  %v7190_v27 = vpack.c.bf16 %v2766_v26, %v2765_v25  ;;  %v2767_v38 = vld [vmem:[%s9877_s10 + $0x90] sm:$0xff] }
 0x526   :  { %v6959_v41 = vpop.f32.mrb[55].mxu1  ;;  %v6979_v42 = vpop.f32.mrb[59].mxu0  ;;  %2620 = vmatprep.subr.bf16.mxu1 %v2599_v29  ;;  %v2750_v29 = vld [vmem:[%s9877_s10 + $0x8] sm:$0xff]  ;;  %v2768_v39 = vld [vmem:[%s9877_s10 + $0x98] sm:$0xff] }
 0x527   :  { %2621 = vmatpush1.bf16.msra.mxu1 %v2598_v28  ;;  %v2749_v28 = vld [vmem:[%s9877_s10] sm:$0xff]  ;;  %7191 = vmatprep.subr.bf16.mxu0 %v7190_v27  ;;  %v7194_v40 = vpack.c.bf16 %v2768_v39, %v2767_v38  ;;  %v2751_v41 = vld [vmem:[%s9877_s10 + $0x10] sm:$0xff]  ;;  %v2752_v42 = vld [vmem:[%s9877_s10 + $0x18] sm:$0xff] }
 0x528   :  { %v7192_v30 = vpack.c.bf16 %v2750_v29, %v2749_v28  ;;  %v2779_v27 = vld [vmem:[%s9877_s10 + $0xf0] sm:$0xff]  ;;  %v2780_v29 = vld [vmem:[%s9877_s10 + $0xf8] sm:$0xff] }
 0x529   :  { %v2764_v38 = vld [vmem:[%s9877_s10 + $0x78] sm:$0xff]  ;;  %v7218_v39 = vpack.c.bf16 %v2780_v29, %v2779_v27  ;;  %v3042_v27 = vld [vmem:[%s9880_s12 + $0x1c8] sm:$0xff] }
 0x52a   :  { %7193 = vmatpush3.bf16.msra.mxu0 %v7192_v30  ;;  %v2763_v30 = vld [vmem:[%s9877_s10 + $0x70] sm:$0xff]  ;;  %v3026_v29 = vld [vmem:[%s9880_s12 + $0x148] sm:$0xff] }
 0x52b   :  { %7195 = vmatprep.subr.bf16.mxu0 %v7194_v40  ;;  %v7220_v40 = vpack.c.bf16 %v2764_v38, %v2763_v30  ;;  %v3043_v30 = vld [vmem:[%s9880_s12 + $0x1d0] sm:$0xff]  ;;  %v3044_v38 = vld [vmem:[%s9880_s12 + $0x1d8] sm:$0xff] }
 0x543   :  { %v2357_v43 = vpop.f32.mrb[56].mxu1  ;;  %v2398_v44 = vpop.f32.mrb[60].mxu0 }
 0x544   :  { %v6998_v45 = vpop.f32.mrb[57].mxu1  ;;  %v7018_v46 = vpop.f32.mrb[61].mxu0 }
 0x545   :  { %v2360_v47 = vpop.f32.mrb[58].mxu1  ;;  %v2401_v48 = vpop.f32.mrb[62].mxu0  ;;  %v2769_v46 = vld [vmem:[%s9877_s10 + $0xa0] sm:$0xff] }
 0x546   :  { %v6999_v53 = vpop.f32.mrb[59].mxu1  ;;  %v7019_v54 = vpop.f32.mrb[63].mxu0  ;;  %v2770_v47 = vld [vmem:[%s9877_s10 + $0xa8] sm:$0xff] }
 0x547   :  { %v7198_v48 = vpack.c.bf16 %v2770_v47, %v2769_v46  ;;  %v2753_v53 = vld [vmem:[%s9877_s10 + $0x20] sm:$0xff]  ;;  %v2754_v54 = vld [vmem:[%s9877_s10 + $0x28] sm:$0xff]  ;;  %v3004_v46 = vld [vmem:[%s9880_s12 + $0x98] sm:$0xff] }
 0x548   :  { %v2987_v47 = vld [vmem:[%s9880_s12 + $0x10] sm:$0xff] }
 0x563   :  { %v2504_v55 = vpop.f32.mrb[60].mxu1  ;;  %v2545_v62 = vpop.f32.mrb[64].mxu0 }
 0x564   :  { %v2600_v63 = vpack.c.bf16 %v2504_v55, %v2357_v43  ;;  %v2601_v0 = vpack.c.bf16 %v2545_v62, %v2398_v44  ;;  %v7038_v2 = vpop.f32.mrb[61].mxu1  ;;  %v7058_v3 = vpop.f32.mrb[65].mxu0  ;;  %v7196_v43 = vpack.c.bf16 %v2752_v42, %v2751_v41  ;;  %v7200_v62 = vpack.c.bf16 %v2754_v54, %v2753_v53  ;;  %v3002_v42 = vld [vmem:[%s9880_s12 + $0x88] sm:$0xff]  ;;  %v3005_v53 = vld [vmem:[%s9880_s12 + $0xa0] sm:$0xff] }
 0x565   :  { %v2507_v1 = vpop.f32.mrb[62].mxu1  ;;  %v2548_v60 = vpop.f32.mrb[66].mxu0  ;;  %v2771_v2 = vld [vmem:[%s9877_s10 + $0xb0] sm:$0xff]  ;;  %v2772_v3 = vld [vmem:[%s9877_s10 + $0xb8] sm:$0xff]  ;;  %v3006_v54 = vld [vmem:[%s9880_s12 + $0xa8] sm:$0xff] }
 0x566   :  { %v7039_v61 = vpop.f32.mrb[63].mxu1  ;;  %v7059_v56 = vpop.f32.mrb[67].mxu0  ;;  %2622 = vmatprep.subr.bf16.mxu1 %v2601_v0  ;;  %7197 = vmatpush3.bf16.msra.mxu0 %v7196_v43  ;;  %v7202_v1 = vpack.c.bf16 %v2772_v3, %v2771_v2  ;;  %v2755_v60 = vld [vmem:[%s9877_s10 + $0x30] sm:$0xff]  ;;  %v2985_v43 = vld [vmem:[%s9880_s12] sm:$0xff]  ;;  %v2992_v3 = vld [vmem:[%s9880_s12 + $0x38] sm:$0xff] }
 0x567   :  { %2623 = vmatpush1.bf16.msra.mxu1 %v2600_v63  ;;  %7199 = vmatprep.subr.bf16.mxu0 %v7198_v48  ;;  %v2756_v61 = vld [vmem:[%s9877_s10 + $0x38] sm:$0xff]  ;;  %v2991_v2 = vld [vmem:[%s9880_s12 + $0x30] sm:$0xff] }
 0x568   :  { %v2988_v48 = vld [vmem:[%s9880_s12 + $0x18] sm:$0xff] }
 0x56a   :  { %2641 = vmatmul.mubr.bf16.vlgmr.msra.gmra.mrb[64].mxu1 %v7365_v57  ;;  %7201 = vmatpush3.bf16.msra.mxu0 %v7200_v62  ;;  %v7204_v57 = vpack.c.bf16 %v2756_v61, %v2755_v60  ;;  %v2990_v62 = vld [vmem:[%s9880_s12 + $0x28] sm:$0xff]  ;;  %v2993_v61 = vld [vmem:[%s9880_s12 + $0x40] sm:$0xff] }
 0x56b   :  { %7203 = vmatprep.subr.bf16.mxu0 %v7202_v1  ;;  %v3009_v1 = vld [vmem:[%s9880_s12 + $0xc0] sm:$0xff]  ;;  %v3010_v60 = vld [vmem:[%s9880_s12 + $0xc8] sm:$0xff] }
 0x56e   :  { %7205 = vmatpush3.bf16.msra.mxu0 %v7204_v57  ;;  %v3011_v57 = vld [vmem:[%s9880_s12 + $0xd0] sm:$0xff] }
 0x63d   :  { %v8422_v17 = vpop.f32.mrb[64].mxu1 }
 0x63e   :  { %v8424_v33 = vpop.f32.mrb[65].mxu1  ;;  %v2667_v34 = vmul.f32 %v2660_v15, %v8422_v17 }
 0x63f   :  { %v8427_v49 = vpop.f32.mrb[66].mxu1  ;;  %v2668_v50 = vmul.f32 %v2664_v16, %v8424_v33 }
 0x640   :  { %v8430_v51 = vpop.f32.mrb[67].mxu1  ;;  %v2669_v52 = vmul.f32 %v2660_v15, %v8427_v49 }
 0x641   :  { %v2671_v8 = vadd.f32 %v2668_v50, %v2667_v34  ;;  %v2670_v11 = vmul.f32 %v2664_v16, %v8430_v51  ;;  %v2757_v34 = vld [vmem:[%s9877_s10 + $0x40] sm:$0xff]  ;;  %v2758_v50 = vld [vmem:[%s9877_s10 + $0x48] sm:$0xff] }
 0x643   :  { %2672 = vadd.xlane.f32.xlu0 %v2671_v8  ;;  %v2674_v32 = vadd.f32 %v2670_v11, %v2669_v52  ;;  %v7208_v52 = vpack.c.bf16 %v2758_v50, %v2757_v34  ;;  %v2651_v8 = vld [vmem:[%s9878_s7] sm:$0xff]  ;;  %v2775_v11 = vld [vmem:[%s9877_s10 + $0xd0] sm:$0xff]  ;;  %v3014_v50 = vld [vmem:[%s9880_s12 + $0xe8] sm:$0xff] }
 0x644   :  { %v3013_v34 = vld [vmem:[%s9880_s12 + $0xe0] sm:$0xff] }
 0x645   :  { %2675 = vadd.xlane.f32.xlu1 %v2674_v32  ;;  %v2776_v32 = vld [vmem:[%s9877_s10 + $0xd8] sm:$0xff] }
 0x6d0   :  { %v2673_v12 = vpop.xlane.xlu0 %2672 }
 0x6d1   :  { %v8434_v35 = vmul.f32 0.02, %v2673_v12  ;;  %v7210_v12 = vpack.c.bf16 %v2776_v32, %v2775_v11  ;;  %v3015_v11 = vld [vmem:[%s9880_s12 + $0xf0] sm:$0xff]  ;;  %v3016_v32 = vld [vmem:[%s9880_s12 + $0xf8] sm:$0xff] }
 0x6d2   :  { %v2676_v36 = vpop.xlane.xlu1 %2675 }
 0x6d3   :  { %v8436_v37 = vmul.f32 0.02, %v2676_v36  ;;  %v2679_v58 = vsub.f32 %v8422_v17, %v8434_v35  ;;  %v2680_v59 = vsub.f32 %v8424_v33, %v8434_v35  ;;  %v2759_v36 = vld [vmem:[%s9877_s10 + $0x50] sm:$0xff] }
 0x6d5   :  { %v2683_v4 = vmul.f32 %v2679_v58, %v2660_v15  ;;  %v2684_v5 = vmul.f32 %v2680_v59, %v2664_v16  ;;  %v2681_v6 = vsub.f32 %v8427_v49, %v8436_v37  ;;  %v2682_v7 = vsub.f32 %v8430_v51, %v8436_v37  ;;  %v2760_v58 = vld [vmem:[%s9877_s10 + $0x58] sm:$0xff] }
 0x6d7   :  { %v2687_v13 = vmul.f32 %v2683_v4, %v2683_v4  ;;  %v2688_v18 = vmul.f32 %v2684_v5, %v2684_v5  ;;  %v2685_v19 = vmul.f32 %v2681_v6, %v2660_v15  ;;  %v2686_v20 = vmul.f32 %v2682_v7, %v2664_v16  ;;  %v2774_v15 = vld [vmem:[%s9877_s10 + $0xc8] sm:$0xff]  ;;  %v2653_v6 = vld [vmem:[%s9879_s8] sm:$0xff] }
 0x6d8   :  { %v7206_v16 = vpack.c.bf16 %v2774_v15, %v2773_v14  ;;  %v7212_v4 = vpack.c.bf16 %v2760_v58, %v2759_v36  ;;  %v2652_v7 = vld [vmem:[%s9878_s7 + $0x8] sm:$0xff]  ;;  %v3012_v14 = vld [vmem:[%s9880_s12 + $0xd8] sm:$0xff]  ;;  %v2995_v15 = vld [vmem:[%s9880_s12 + $0x50] sm:$0xff] }
 0x6d9   :  { %v2691_v21 = vadd.f32 %v2688_v18, %v2687_v13  ;;  %v2689_v22 = vmul.f32 %v2685_v19, %v2685_v19  ;;  %v2690_v23 = vmul.f32 %v2686_v20, %v2686_v20  ;;  %v2777_v13 = vld [vmem:[%s9877_s10 + $0xe0] sm:$0xff]  ;;  %v2778_v19 = vld [vmem:[%s9877_s10 + $0xe8] sm:$0xff]  ;;  %v3000_v36 = vld [vmem:[%s9880_s12 + $0x78] sm:$0xff] }
 0x6da   :  { %7207 = vmatprep.subr.bf16.mxu0 %v7206_v16  ;;  %v2761_v20 = vld [vmem:[%s9877_s10 + $0x60] sm:$0xff]  ;;  %v2996_v16 = vld [vmem:[%s9880_s12 + $0x58] sm:$0xff] }
 0x6db   :  { %2692 = vadd.xlane.f32.xlu0 %v2691_v21  ;;  %v2694_v24 = vadd.f32 %v2690_v23, %v2689_v22  ;;  %7209 = vmatpush3.bf16.msra.mxu0 %v7208_v52  ;;  %v2762_v21 = vld [vmem:[%s9877_s10 + $0x68] sm:$0xff]  ;;  %v7214_v23 = vpack.c.bf16 %v2778_v19, %v2777_v13  ;;  %v2997_v52 = vld [vmem:[%s9880_s12 + $0x60] sm:$0xff]  ;;  %v3019_v13 = vld [vmem:[%s9880_s12 + $0x110] sm:$0xff] }
 0x6dc   :  { %7211 = vmatprep.subr.bf16.mxu0 %v7210_v12  ;;  %v2999_v12 = vld [vmem:[%s9880_s12 + $0x70] sm:$0xff]  ;;  %v3033_v58 = vld [vmem:[%s9880_s12 + $0x180] sm:$0xff] }
 0x6dd   :  { %v3037_v19 = vld [vmem:[%s9880_s12 + $0x1a0] sm:$0xff] }
 0x6df   :  { %2695 = vadd.xlane.f32.xlu0 %v2694_v24  ;;  %7213 = vmatpush3.bf16.msra.mxu0 %v7212_v4  ;;  %v7216_v24 = vpack.c.bf16 %v2762_v21, %v2761_v20  ;;  %v3017_v4 = vld [vmem:[%s9880_s12 + $0x100] sm:$0xff]  ;;  %v3038_v20 = vld [vmem:[%s9880_s12 + $0x1a8] sm:$0xff] }
 0x6e0   :  { %7215 = vmatprep.subr.bf16.mxu0 %v7214_v23  ;;  %v3021_v21 = vld [vmem:[%s9880_s12 + $0x120] sm:$0xff]  ;;  %v3039_v23 = vld [vmem:[%s9880_s12 + $0x1b0] sm:$0xff] }
 0x6e3   :  { %7217 = vmatpush3.bf16.msra.mxu0 %v7216_v24  ;;  %v3040_v24 = vld [vmem:[%s9880_s12 + $0x1b8] sm:$0xff] }
 0x6e4   :  { %7219 = vmatprep.subr.bf16.mxu0 %v7218_v39  ;;  %v3027_v39 = vld [vmem:[%s9880_s12 + $0x150] sm:$0xff] }
 0x6e7   :  { %7221 = vmatpush3.bf16.msra.mxu0 %v7220_v40  ;;  %v3028_v40 = vld [vmem:[%s9880_s12 + $0x158] sm:$0xff] }
 0x768   :  { %v2693_v44 = vpop.xlane.xlu0 %2692 }
 0x769   :  { %v2697_v45 = vmul.f32 0.02, %v2693_v44  ;;  %v2986_v44 = vld [vmem:[%s9880_s12 + $0x8] sm:$0xff] }
 0x76b   :  { %v2699_v55 = vadd.f32 1e-05, %v2697_v45  ;;  %v3003_v45 = vld [vmem:[%s9880_s12 + $0x90] sm:$0xff] }
 0x76c   :  { %v2696_v63 = vpop.xlane.xlu0 %2695 }
 0x76d   :  { %7441 = vrsqrt.f32 %v2699_v55  ;;  %v2698_v0 = vmul.f32 0.02, %v2696_v63  ;;  %v2989_v55 = vld [vmem:[%s9880_s12 + $0x20] sm:$0xff]  ;;  %v3007_v63 = vld [vmem:[%s9880_s12 + $0xb0] sm:$0xff] }
 0x76f   :  { %v2700_v56 = vadd.f32 1e-05, %v2698_v0  ;;  %v3008_v0 = vld [vmem:[%s9880_s12 + $0xb8] sm:$0xff] }
 0x771   :  { %7443 = vrsqrt.f32 %v2700_v56  ;;  %v2994_v56 = vld [vmem:[%s9880_s12 + $0x48] sm:$0xff] }
 0x777   :  { %v7442_v59 = vpop.eup %7441 }
 0x778   :  { %v2703_v5 = vmul.f32 %v7442_v59, %v2651_v8  ;;  %v2998_v8 = vld [vmem:[%s9880_s12 + $0x68] sm:$0xff] }
 0x779   :  { %v3034_v59 = vld [vmem:[%s9880_s12 + $0x188] sm:$0xff] }
 0x77a   :  { %2711 = vperm.xlu0 %7227, %v2703_v5   ;;  %v2705_v18 = vmul.f32 %v2703_v5, %v8434_v35  ;;  %v2654_v35 = vld [vmem:[%s9879_s8 + $0x8] sm:$0xff] }
 0x77b   :  { %v7444_v22 = vpop.eup %7443  ;;  %v3018_v5 = vld [vmem:[%s9880_s12 + $0x108] sm:$0xff] }
 0x77c   :  { %v2707_v25 = vsub.f32 %v2653_v6, %v2705_v18  ;;  %v2704_v26 = vmul.f32 %v7444_v22, %v2652_v7  ;;  %v3035_v6 = vld [vmem:[%s9880_s12 + $0x190] sm:$0xff]  ;;  %v3036_v7 = vld [vmem:[%s9880_s12 + $0x198] sm:$0xff]  ;;  %v3022_v22 = vld [vmem:[%s9880_s12 + $0x128] sm:$0xff] }
 0x77d   :  { %v3020_v18 = vld [vmem:[%s9880_s12 + $0x118] sm:$0xff] }
 0x77e   :  { %2725 = vperm.xlu1 %7226, %v2707_v25   ;;  %v2706_v28 = vmul.f32 %v2704_v26, %v8436_v37  ;;  %v3001_v37 = vld [vmem:[%s9880_s12 + $0x80] sm:$0xff]  ;;  %v3023_v25 = vld [vmem:[%s9880_s12 + $0x130] sm:$0xff] }
 0x780   :  { %v2708_v41 = vsub.f32 %v2654_v35, %v2706_v28  ;;  %v3041_v35 = vld [vmem:[%s9880_s12 + $0x1c0] sm:$0xff] }
 0x781   :  { %v3025_v28 = vld [vmem:[%s9880_s12 + $0x140] sm:$0xff] }
 0x782   :  { %2716 = vperm.xlu1 %7226, %v2704_v26   ;;  %2730 = vperm.xlu0 %7227, %v2708_v41   ;;  %v3024_v26 = vld [vmem:[%s9880_s12 + $0x138] sm:$0xff]  ;;  %v3045_v41 = vld [vmem:[%s9880_s12 + $0x1e0] sm:$0xff] }
 0x786   :  { %3195 = vperm.xlu1 %7226, %v3001_v37   ;;  %3200 = vperm.xlu0 %7227, %v3002_v42   ;;  %v3046_v37 = vld [vmem:[%s9880_s12 + $0x1e8] sm:$0xff]  ;;  %v3029_v42 = vld [vmem:[%s9880_s12 + $0x160] sm:$0xff] }
 0x78a   :  { %3115 = vperm.xlu1 %7226, %v2985_v43   ;;  %3120 = vperm.xlu0 %7227, %v2986_v44   ;;  %v3030_v43 = vld [vmem:[%s9880_s12 + $0x168] sm:$0xff] }
 0x78e   :  { %3205 = vperm.xlu1 %7226, %v3003_v45   ;;  %3210 = vperm.xlu0 %7227, %v3004_v46   ;;  %v3047_v45 = vld [vmem:[%s9880_s12 + $0x1f0] sm:$0xff]  ;;  %v3048_v46 = vld [vmem:[%s9880_s12 + $0x1f8] sm:$0xff] }
 0x792   :  { %3125 = vperm.xlu1 %7226, %v2987_v47   ;;  %3130 = vperm.xlu0 %7227, %v2988_v48  }
 0x796   :  { %3215 = vperm.xlu1 %7226, %v3005_v53   ;;  %3220 = vperm.xlu0 %7227, %v3006_v54  }
 0x79a   :  { %3135 = vperm.xlu1 %7226, %v2989_v55   ;;  %3140 = vperm.xlu0 %7227, %v2990_v62   ;;  %v23_v62 = vstv %s9881_s14 }
 0x79b   :  { %24 = vst [vmem:[#allocation3] sm:$0x1] %v23_v62  ;;  %v3082_v62 = vld [vmem:[%s9880_s12 + $0x308] sm:$0xff] }
 0x79e   :  { %3225 = vperm.xlu1 %7226, %v3007_v63   ;;  %3230 = vperm.xlu0 %7227, %v3008_v0   ;;  %v3031_v63 = vld [vmem:[%s9880_s12 + $0x170] sm:$0xff]  ;;  %v3032_v0 = vld [vmem:[%s9880_s12 + $0x178] sm:$0xff] }
 0x7a2   :  { %3145 = vperm.xlu1 %7226, %v2991_v2   ;;  %3150 = vperm.xlu0 %7227, %v2992_v3  }
 0x7a6   :  { %3235 = vperm.xlu1 %7226, %v3009_v1   ;;  %3240 = vperm.xlu0 %7227, %v3010_v60  }
 0x7aa   :  { %3155 = vperm.xlu1 %7226, %v2993_v61   ;;  %3160 = vperm.xlu0 %7227, %v2994_v56  }
 0x7ae   :  { %3245 = vperm.xlu1 %7226, %v3011_v57   ;;  %3250 = vperm.xlu0 %7227, %v3012_v14   ;;  %v3065_v57 = vld [vmem:[%s9880_s12 + $0x280] sm:$0xff]  ;;  %v3066_v14 = vld [vmem:[%s9880_s12 + $0x288] sm:$0xff] }
 0x7b2   :  { %3165 = vperm.xlu1 %7226, %v2995_v15   ;;  %3170 = vperm.xlu0 %7227, %v2996_v16  }
 0x7b6   :  { %3255 = vperm.xlu1 %7226, %v3013_v34   ;;  %3260 = vperm.xlu0 %7227, %v3014_v50   ;;  %v3049_v34 = vld [vmem:[%s9880_s12 + $0x200] sm:$0xff]  ;;  %v3050_v50 = vld [vmem:[%s9880_s12 + $0x208] sm:$0xff] }
 0x7ba   :  { %3175 = vperm.xlu1 %7226, %v2997_v52   ;;  %3180 = vperm.xlu0 %7227, %v2998_v8  }
 0x7be   :  { %3265 = vperm.xlu1 %7226, %v3015_v11   ;;  %3270 = vperm.xlu0 %7227, %v3016_v32   ;;  %v3067_v11 = vld [vmem:[%s9880_s12 + $0x290] sm:$0xff]  ;;  %v3068_v32 = vld [vmem:[%s9880_s12 + $0x298] sm:$0xff] }
 0x7c2   :  { %3185 = vperm.xlu1 %7226, %v2999_v12   ;;  %3190 = vperm.xlu0 %7227, %v3000_v36   ;;  %v3051_v12 = vld [vmem:[%s9880_s12 + $0x210] sm:$0xff]  ;;  %v3052_v36 = vld [vmem:[%s9880_s12 + $0x218] sm:$0xff] }
 0x7c6   :  { %3355 = vperm.xlu1 %7226, %v3033_v58   ;;  %3360 = vperm.xlu0 %7227, %v3034_v59   ;;  %v3069_v58 = vld [vmem:[%s9880_s12 + $0x2a0] sm:$0xff]  ;;  %v3070_v59 = vld [vmem:[%s9880_s12 + $0x2a8] sm:$0xff] }
 0x7ca   :  { %3275 = vperm.xlu1 %7226, %v3017_v4   ;;  %3280 = vperm.xlu0 %7227, %v3018_v5   ;;  %v3053_v4 = vld [vmem:[%s9880_s12 + $0x220] sm:$0xff]  ;;  %v3054_v5 = vld [vmem:[%s9880_s12 + $0x228] sm:$0xff] }
 0x7ce   :  { %3365 = vperm.xlu1 %7226, %v3035_v6   ;;  %3370 = vperm.xlu0 %7227, %v3036_v7   ;;  %v3071_v6 = vld [vmem:[%s9880_s12 + $0x2b0] sm:$0xff]  ;;  %v3072_v7 = vld [vmem:[%s9880_s12 + $0x2b8] sm:$0xff] }
 0x7d2   :  { %3285 = vperm.xlu1 %7226, %v3019_v13   ;;  %3290 = vperm.xlu0 %7227, %v3020_v18   ;;  %v3055_v13 = vld [vmem:[%s9880_s12 + $0x230] sm:$0xff]  ;;  %v3056_v18 = vld [vmem:[%s9880_s12 + $0x238] sm:$0xff] }
 0x7d6   :  { %3375 = vperm.xlu1 %7226, %v3037_v19   ;;  %3380 = vperm.xlu0 %7227, %v3038_v20   ;;  %v3073_v19 = vld [vmem:[%s9880_s12 + $0x2c0] sm:$0xff]  ;;  %v3074_v20 = vld [vmem:[%s9880_s12 + $0x2c8] sm:$0xff] }
 0x7da   :  { %3295 = vperm.xlu1 %7226, %v3021_v21   ;;  %3300 = vperm.xlu0 %7227, %v3022_v22   ;;  %v3057_v21 = vld [vmem:[%s9880_s12 + $0x240] sm:$0xff]  ;;  %v3058_v22 = vld [vmem:[%s9880_s12 + $0x248] sm:$0xff] }
 0x7de   :  { %3385 = vperm.xlu1 %7226, %v3039_v23   ;;  %3390 = vperm.xlu0 %7227, %v3040_v24   ;;  %v3075_v23 = vld [vmem:[%s9880_s12 + $0x2d0] sm:$0xff]  ;;  %v3076_v24 = vld [vmem:[%s9880_s12 + $0x2d8] sm:$0xff] }
 0x7e2   :  { %3305 = vperm.xlu1 %7226, %v3023_v25   ;;  %3310 = vperm.xlu0 %7227, %v3024_v26  }
 0x7e6   :  { %3395 = vperm.xlu1 %7226, %v3041_v35   ;;  %3400 = vperm.xlu0 %7227, %v3042_v27   ;;  %v3059_v35 = vld [vmem:[%s9880_s12 + $0x250] sm:$0xff]  ;;  %v3060_v27 = vld [vmem:[%s9880_s12 + $0x258] sm:$0xff] }
 0x7ea   :  { %3315 = vperm.xlu1 %7226, %v3025_v28   ;;  %3320 = vperm.xlu0 %7227, %v3026_v29  }
 0x7ee   :  { %3405 = vperm.xlu1 %7226, %v3043_v30   ;;  %3410 = vperm.xlu0 %7227, %v3044_v38   ;;  %v3077_v30 = vld [vmem:[%s9880_s12 + $0x2e0] sm:$0xff]  ;;  %v3078_v38 = vld [vmem:[%s9880_s12 + $0x2e8] sm:$0xff] }
 0x7f2   :  { %3325 = vperm.xlu1 %7226, %v3027_v39   ;;  %3330 = vperm.xlu0 %7227, %v3028_v40   ;;  %v3061_v39 = vld [vmem:[%s9880_s12 + $0x260] sm:$0xff]  ;;  %v3062_v40 = vld [vmem:[%s9880_s12 + $0x268] sm:$0xff] }
 0x7f6   :  { %3415 = vperm.xlu1 %7226, %v3045_v41   ;;  %3420 = vperm.xlu0 %7227, %v3046_v37  }
 0x7f9   :  { %v2712_v44 = vpop.permute.xlu0 %2711 }
 0x7fa   :  { %3335 = vperm.xlu1 %7226, %v3029_v42   ;;  %3340 = vperm.xlu0 %7227, %v3030_v43   ;;  %v2719_v47 = vmul.f32 %v2712_v44, %v8422_v17  ;;  %v2720_v48 = vmul.f32 %v2712_v44, %v8424_v33  ;;  %v3079_v42 = vld [vmem:[%s9880_s12 + $0x2f0] sm:$0xff]  ;;  %v3080_v43 = vld [vmem:[%s9880_s12 + $0x2f8] sm:$0xff] }
 0x7fd   :  { %v2726_v53 = vpop.permute.xlu1 %2725 }
 0x7fe   :  { %v2733_v54 = vadd.f32 %v2726_v53, %v2719_v47  ;;  %v2734_v55 = vadd.f32 %v2726_v53, %v2720_v48  ;;  %3425 = vperm.xlu1 %7226, %v3047_v45   ;;  %3430 = vperm.xlu0 %7227, %v3048_v46   ;;  %v3064_v46 = vld [vmem:[%s9880_s12 + $0x278] sm:$0xff]  ;;  %v3063_v47 = vld [vmem:[%s9880_s12 + $0x270] sm:$0xff]  ;;  %v3098_v48 = vld [vmem:[%s9880_s12 + $0x388] sm:$0xff] }
 0x7ff   :  { %v3097_v53 = vld [vmem:[%s9880_s12 + $0x380] sm:$0xff] }
 0x800   :  { %vm2738_vm4 = vcmp.ge.f32.partialorder %v2734_v55, 0.0  ;;  %v2742_v17 = vmul.f32 0.2, %v2734_v55  ;;  %vm2737_vm5 = vcmp.ge.f32.partialorder %v2733_v54, 0.0  ;;  %v2741_v33 = vmul.f32 0.2, %v2733_v54 }
 0x801   :  { %v2717_v2 = vpop.permute.xlu1 %2716  ;;  %v2731_v61 = vpop.permute.xlu0 %2730 }
 0x802   :  { %v2721_v3 = vmul.f32 %v2717_v2, %v8427_v49  ;;  %v2722_v1 = vmul.f32 %v2717_v2, %v8430_v51  ;;  %3345 = vperm.xlu1 %7226, %v3031_v63   ;;  %3350 = vperm.xlu0 %7227, %v3032_v0   ;;  %v2746_v60 = vsel %vm2738_vm4, %v2734_v55, %v2742_v17  ;;  %v3081_v63 = vld [vmem:[%s9880_s12 + $0x300] sm:$0xff]  ;;  %v3099_v2 = vld [vmem:[%s9880_s12 + $0x390] sm:$0xff] }
 0x803   :  { %2845 = vmatprep.mubr.f32.mxu0 %v2746_v60  ;;  %v2745_v56 = vsel %vm2737_vm5, %v2733_v54, %v2741_v33  ;;  %v3100_v33 = vld [vmem:[%s9880_s12 + $0x398] sm:$0xff] }
 0x804   :  { %v2735_v15 = vadd.f32 %v2731_v61, %v2721_v3  ;;  %v2736_v16 = vadd.f32 %v2731_v61, %v2722_v1  ;;  %2846 = vmatmul.mubr.f32.vlgmr.msra.gmra.mrb[68].mxu0 %v2745_v56  ;;  %v3084_v3 = vld [vmem:[%s9880_s12 + $0x318] sm:$0xff]  ;;  %v3083_v1 = vld [vmem:[%s9880_s12 + $0x310] sm:$0xff]  ;;  %v3102_v56 = vld [vmem:[%s9880_s12 + $0x3a8] sm:$0xff] }
 0x805   :  { %v8821_v25 = vpop.permute.xlu0 %3200  ;;  %v8823_v26 = vpop.permute.xlu1 %3195 }
 0x806   :  { %3515 = vperm.xlu1 %7226, %v3065_v57   ;;  %3520 = vperm.xlu0 %7227, %v3066_v14   ;;  %vm2740_vm6 = vcmp.ge.f32.partialorder %v2736_v16, 0.0  ;;  %v2744_v49 = vmul.f32 0.2, %v2736_v16  ;;  %vm2739_vm7 = vcmp.ge.f32.partialorder %v2735_v15, 0.0  ;;  %v2743_v51 = vmul.f32 0.2, %v2735_v15 }
 0x807   :  { %v3101_v57 = vld [vmem:[%s9880_s12 + $0x3a0] sm:$0xff] }
 0x808   :  { %v2748_v52 = vsel %vm2740_vm6, %v2736_v16, %v2744_v49  ;;  %v2747_v8 = vsel %vm2739_vm7, %v2735_v15, %v2743_v51  ;;  %v3086_v16 = vld [vmem:[%s9880_s12 + $0x328] sm:$0xff]  ;;  %v3085_v49 = vld [vmem:[%s9880_s12 + $0x320] sm:$0xff]  ;;  %v3104_v51 = vld [vmem:[%s9880_s12 + $0x3b8] sm:$0xff] }
 0x809   :  { %2850 = vmatprep.mubr.f32.mxu0 %v2748_v52  ;;  %v8831_v28 = vpop.permute.xlu0 %3120  ;;  %v8833_v29 = vpop.permute.xlu1 %3115 }
 0x80a   :  { %3435 = vperm.xlu1 %7226, %v3049_v34   ;;  %3440 = vperm.xlu0 %7227, %v3050_v50   ;;  %v3103_v34 = vld [vmem:[%s9880_s12 + $0x3b0] sm:$0xff] }
 0x80b   :  { %2851 = vmatmul.mubr.f32.gmra.mrb[70].mxu0 %v2747_v8  ;;  %v3088_v8 = vld [vmem:[%s9880_s12 + $0x338] sm:$0xff] }
 0x80d   :  { %v8847_v41 = vpop.permute.xlu0 %3210  ;;  %v8849_v37 = vpop.permute.xlu1 %3205 }
 0x80e   :  { %3525 = vperm.xlu1 %7226, %v3067_v11   ;;  %3530 = vperm.xlu0 %7227, %v3068_v32   ;;  %v3087_v11 = vld [vmem:[%s9880_s12 + $0x330] sm:$0xff] }
 0x811   :  { %v8857_v44 = vpop.permute.xlu0 %3130  ;;  %v8859_v45 = vpop.permute.xlu1 %3125 }
 0x812   :  { %3445 = vperm.xlu1 %7226, %v3051_v12   ;;  %3450 = vperm.xlu0 %7227, %v3052_v36   ;;  %v3106_v36 = vld [vmem:[%s9880_s12 + $0x3c8] sm:$0xff] }
 0x815   :  { %v8873_v54 = vpop.permute.xlu0 %3220  ;;  %v8875_v55 = vpop.permute.xlu1 %3215 }
 0x816   :  { %3535 = vperm.xlu1 %7226, %v3069_v58   ;;  %3540 = vperm.xlu0 %7227, %v3070_v59   ;;  %v3105_v58 = vld [vmem:[%s9880_s12 + $0x3c0] sm:$0xff]  ;;  %v3090_v59 = vld [vmem:[%s9880_s12 + $0x348] sm:$0xff] }
 0x819   :  { %v8883_v0 = vpop.permute.xlu0 %3140  ;;  %v8885_v17 = vpop.permute.xlu1 %3135 }
 0x81a   :  { %3455 = vperm.xlu1 %7226, %v3053_v4   ;;  %3460 = vperm.xlu0 %7227, %v3054_v5   ;;  %v7366_v4 = vld [vmem:[%s9882_s11] sm:$0xff]  }
 0x81b   :  { %v3089_v5 = vld [vmem:[%s9880_s12 + $0x340] sm:$0xff]  ;;  %7062 = vmatprep.mubr.msk.bf16.mxu1 %vm4073_vm8, %v7366_v4  ;;  %v7373_v4 = vld [vmem:[%s9882_s11 + $0x38] sm:$0xff]  }
 0x81d   :  { %v8899_v60 = vpop.permute.xlu0 %3230  ;;  %v8901_v61 = vpop.permute.xlu1 %3225 }
 0x81e   :  { %3545 = vperm.xlu1 %7226, %v3071_v6   ;;  %3550 = vperm.xlu0 %7227, %v3072_v7  }
 0x821   :  { %v8909_v14 = vpop.permute.xlu0 %3150  ;;  %v8911_v15 = vpop.permute.xlu1 %3145 }
 0x822   :  { %3465 = vperm.xlu1 %7226, %v3055_v13   ;;  %3470 = vperm.xlu0 %7227, %v3056_v18   ;;  %v3108_v13 = vld [vmem:[%s9880_s12 + $0x3d8] sm:$0xff]  ;;  %v3107_v18 = vld [vmem:[%s9880_s12 + $0x3d0] sm:$0xff] }
 0x825   :  { %v8925_v50 = vpop.permute.xlu0 %3240  ;;  %v8927_v52 = vpop.permute.xlu1 %3235 }
 0x826   :  { %3555 = vperm.xlu1 %7226, %v3073_v19   ;;  %3560 = vperm.xlu0 %7227, %v3074_v20   ;;  %v3092_v19 = vld [vmem:[%s9880_s12 + $0x358] sm:$0xff]  ;;  %v3091_v20 = vld [vmem:[%s9880_s12 + $0x350] sm:$0xff] }
 0x829   :  { %v8935_v32 = vpop.permute.xlu0 %3160  ;;  %v8937_v12 = vpop.permute.xlu1 %3155 }
 0x82a   :  { %3475 = vperm.xlu1 %7226, %v3057_v21   ;;  %3480 = vperm.xlu0 %7227, %v3058_v22  }
 0x82d   :  { %v8955_v6 = vpop.permute.xlu0 %3250  ;;  %v8957_v7 = vpop.permute.xlu1 %3245 }
 0x82e   :  { %3565 = vperm.xlu1 %7226, %v3075_v23   ;;  %3570 = vperm.xlu0 %7227, %v3076_v24   ;;  %v3110_v23 = vld [vmem:[%s9880_s12 + $0x3e8] sm:$0xff]  ;;  %v3109_v24 = vld [vmem:[%s9880_s12 + $0x3e0] sm:$0xff] }
 0x831   :  { %v8971_v21 = vpop.permute.xlu0 %3170  ;;  %v8973_v22 = vpop.permute.xlu1 %3165 }
 0x832   :  { %3485 = vperm.xlu1 %7226, %v3059_v35   ;;  %3490 = vperm.xlu0 %7227, %v3060_v27  }
 0x835   :  { %v8981_v35 = vpop.permute.xlu0 %3260  ;;  %v8983_v27 = vpop.permute.xlu1 %3255 }
 0x836   :  { %3575 = vperm.xlu1 %7226, %v3077_v30   ;;  %3580 = vperm.xlu0 %7227, %v3078_v38   ;;  %v3094_v30 = vld [vmem:[%s9880_s12 + $0x368] sm:$0xff]  ;;  %v3093_v38 = vld [vmem:[%s9880_s12 + $0x360] sm:$0xff] }
 0x83a   :  { %3495 = vperm.xlu1 %7226, %v3061_v39   ;;  %3500 = vperm.xlu0 %7227, %v3062_v40   ;;  %v3112_v39 = vld [vmem:[%s9880_s12 + $0x3f8] sm:$0xff]  ;;  %v3111_v40 = vld [vmem:[%s9880_s12 + $0x3f0] sm:$0xff] }
 0x83e   :  { %3585 = vperm.xlu1 %7226, %v3079_v42   ;;  %3590 = vperm.xlu0 %7227, %v3080_v43   ;;  %v8997_v42 = vpop.permute.xlu0 %3180  ;;  %v8999_v43 = vpop.permute.xlu1 %3175 }
 0x842   :  { %3510 = vperm.xlu0 %7227, %v3064_v46   ;;  %3505 = vperm.xlu1 %7226, %v3063_v47   ;;  %v3096_v46 = vld [vmem:[%s9880_s12 + $0x378] sm:$0xff]  ;;  %v3095_v47 = vld [vmem:[%s9880_s12 + $0x370] sm:$0xff] }
 0x846   :  { %3680 = vperm.xlu0 %7227, %v3098_v48   ;;  %3675 = vperm.xlu1 %7226, %v3097_v53   ;;  %v9007_v48 = vpop.permute.xlu0 %3270  ;;  %v9009_v53 = vpop.permute.xlu1 %3265 }
 0x84a   :  { %3600 = vperm.xlu0 %7227, %v3082_v62   ;;  %3595 = vperm.xlu1 %7226, %v3081_v63   ;;  %v4876_v62 = vld [vmem:[#allocation3] sm:$0x1] }
 0x84b   :  { %v5108_v63 = vld [vmem:[%s9883_s16] sm:$0x7f] }
 0x84e   :  { %3690 = vperm.xlu0 %7227, %v3100_v33   ;;  %3685 = vperm.xlu1 %7226, %v3099_v2   ;;  %v9014_v33 = vpop.permute.xlu0 %3190  ;;  %v9016_v2 = vpop.permute.xlu1 %3185 }
 0x852   :  { %3610 = vperm.xlu0 %7227, %v3084_v3   ;;  %3605 = vperm.xlu1 %7226, %v3083_v1  }
 0x856   :  { %3700 = vperm.xlu0 %7227, %v3102_v56   ;;  %3695 = vperm.xlu1 %7226, %v3101_v57  }
 0x85a   :  { %3620 = vperm.xlu0 %7227, %v3086_v16   ;;  %3615 = vperm.xlu1 %7226, %v3085_v49  }
 0x85e   :  { %3710 = vperm.xlu0 %7227, %v3104_v51   ;;  %3705 = vperm.xlu1 %7226, %v3103_v34   ;;  %v7367_v34 = vld [vmem:[%s9882_s11 + $0x8] sm:$0xff]  }
 0x862   :  { %3630 = vperm.xlu0 %7227, %v3088_v8   ;;  %3625 = vperm.xlu1 %7226, %v3087_v11   ;;  %v7368_v8 = vld [vmem:[%s9882_s11 + $0x10] sm:$0xff]   ;;  %v7369_v11 = vld [vmem:[%s9882_s11 + $0x18] sm:$0xff]  }
 0x866   :  { %3720 = vperm.xlu0 %7227, %v3106_v36   ;;  %3715 = vperm.xlu1 %7226, %v3105_v58   ;;  %v7370_v36 = vld [vmem:[%s9882_s11 + $0x20] sm:$0xff]   ;;  %v7371_v58 = vld [vmem:[%s9882_s11 + $0x28] sm:$0xff]  }
 0x86a   :  { %3640 = vperm.xlu0 %7227, %v3090_v59   ;;  %3635 = vperm.xlu1 %7226, %v3089_v5   ;;  %v7372_v59 = vld [vmem:[%s9882_s11 + $0x30] sm:$0xff]   ;;  %v7374_v5 = vld [vmem:[%s9882_s11 + $0x40] sm:$0xff]  }
 0x86e   :  { %3730 = vperm.xlu0 %7227, %v3108_v13   ;;  %3725 = vperm.xlu1 %7226, %v3107_v18   ;;  %v7375_v13 = vld [vmem:[%s9882_s11 + $0x48] sm:$0xff]   ;;  %v7376_v18 = vld [vmem:[%s9882_s11 + $0x50] sm:$0xff]  }
 0x872   :  { %3650 = vperm.xlu0 %7227, %v3092_v19   ;;  %3645 = vperm.xlu1 %7226, %v3091_v20   ;;  %v7377_v19 = vld [vmem:[%s9882_s11 + $0x58] sm:$0xff]   ;;  %v7378_v20 = vld [vmem:[%s9882_s11 + $0x60] sm:$0xff]  }
 0x876   :  { %3740 = vperm.xlu0 %7227, %v3110_v23   ;;  %3735 = vperm.xlu1 %7226, %v3109_v24   ;;  %v7379_v23 = vld [vmem:[%s9882_s11 + $0x68] sm:$0xff]   ;;  %v7380_v24 = vld [vmem:[%s9882_s11 + $0x70] sm:$0xff]  }
 0x87a   :  { %3660 = vperm.xlu0 %7227, %v3094_v30   ;;  %3655 = vperm.xlu1 %7226, %v3093_v38   ;;  %v7381_v30 = vld [vmem:[%s9882_s11 + $0x78] sm:$0xff]   ;;  %v7382_v38 = vld [vmem:[%s9882_s11 + $0x80] sm:$0xff]  }
 0x87e   :  { %3750 = vperm.xlu0 %7227, %v3112_v39   ;;  %3745 = vperm.xlu1 %7226, %v3111_v40   ;;  %v7383_v39 = vld [vmem:[%s9882_s11 + $0x88] sm:$0xff]   ;;  %v7384_v40 = vld [vmem:[%s9882_s11 + $0x90] sm:$0xff]  }
 0x882   :  { %3670 = vperm.xlu0 %7227, %v3096_v46   ;;  %3665 = vperm.xlu1 %7226, %v3095_v47   ;;  %v7385_v46 = vld [vmem:[%s9882_s11 + $0x98] sm:$0xff]   ;;  %v7386_v47 = vld [vmem:[%s9882_s11 + $0xa0] sm:$0xff]  }
 0x886   :  { %4879 = vperm.xlu0 %7227, %v4876_v62   ;;  %5111 = vperm.xlu1 %7226, %v5108_v63   ;;  %v7387_v62 = vld [vmem:[%s9882_s11 + $0xa8] sm:$0xff]   ;;  %v7388_v63 = vld [vmem:[%s9882_s11 + $0xb0] sm:$0xff]  }
 0x8d7   :  { %v6173_v3 = vpop.f32.mrb[68].mxu0 }
 0x8d8   :  { %v6174_v1 = vpop.f32.mrb[69].mxu0 }
 0x8d9   :  { %v6175_v56 = vadd.f32 %v6174_v1, %v6173_v3  ;;  %v7389_v3 = vld [vmem:[%s9882_s11 + $0xb8] sm:$0xff]   ;;  %v7390_v1 = vld [vmem:[%s9882_s11 + $0xc0] sm:$0xff]  }
 0x8de   :  { %v6176_v57 = vpop.f32.mrb[70].mxu0 }
 0x8df   :  { %v6177_v16 = vpop.f32.mrb[71].mxu0 }
 0x8e0   :  { %v6178_v49 = vadd.f32 %v6177_v16, %v6176_v57  ;;  %v7392_v57 = vld [vmem:[%s9882_s11 + $0xd0] sm:$0xff]   ;;  %v7393_v16 = vld [vmem:[%s9882_s11 + $0xd8] sm:$0xff]  }
 0x8e2   :  { %v2984_v51 = vpack.c.bf16 %v6178_v49, %v6175_v56  ;;  %v7391_v56 = vld [vmem:[%s9882_s11 + $0xc8] sm:$0xff]   ;;  %v7394_v49 = vld [vmem:[%s9882_s11 + $0xe0] sm:$0xff]  }
 0x8e4   :  { %7060 = vmatprep.subr.bf16.mxu1 %v2984_v51 }
 0x8e5   :  { %7061 = vmatpush3.bf16.msra.mxu1 %v2984_v51  ;;  %v7395_v51 = vld [vmem:[%s9882_s11 + $0xe8] sm:$0xff]  }
 0x8e8   :  { %7063 = vmatmul.mubr.msk.bf16.vlgmr.msra.gmra.mrb[68].mxu1 %vm4073_vm8, %v7367_v34  ;;  %v7396_v34 = vld [vmem:[%s9882_s11 + $0xf0] sm:$0xff]  }
 0x8e9   :  { %7066 = vmatprep.mubr.msk.bf16.mxu1 %vm4073_vm8, %v7368_v8  ;;  %v7397_v8 = vld [vmem:[%s9882_s11 + $0xf8] sm:$0xff]  }
 0x8f0   :  { %7067 = vmatmul.mubr.msk.bf16.gmra.mrb[72].mxu1 %vm4073_vm8, %v7369_v11  ;;  %v7398_v11 = vld [vmem:[%s9882_s11 + $0x100] sm:$0xff]  }
 0x8f1   :  { %7070 = vmatprep.mubr.msk.bf16.mxu1 %vm4073_vm8, %v7370_v36  ;;  %v7399_v36 = vld [vmem:[%s9882_s11 + $0x108] sm:$0xff]  }
 0x8f8   :  { %7071 = vmatmul.mubr.msk.bf16.gmra.mrb[76].mxu1 %vm4073_vm8, %v7371_v58  ;;  %v7400_v58 = vld [vmem:[%s9882_s11 + $0x110] sm:$0xff]  }
 0x8f9   :  { %7074 = vmatprep.mubr.msk.bf16.mxu1 %vm4073_vm8, %v7372_v59  ;;  %v7401_v59 = vld [vmem:[%s9882_s11 + $0x118] sm:$0xff]  }
 0x900   :  { %7075 = vmatmul.mubr.msk.bf16.gmra.mrb[80].mxu1 %vm4073_vm8, %v7373_v4  ;;  %v7402_v4 = vld [vmem:[%s9882_s11 + $0x120] sm:$0xff]  }
 0x901   :  { %7078 = vmatprep.mubr.msk.bf16.mxu1 %vm4073_vm8, %v7374_v5  ;;  %v7452_v5 = vmov 1966171168  }
 0x908   :  { %7079 = vmatmul.mubr.msk.bf16.gmra.mrb[84].mxu1 %vm4073_vm8, %v7375_v13  ;;  %v4889_v13 = vunpack.c.l.s4 %v7452_v5  ;;  %v7413_v5 = vld [vmem:[%s9882_s11 + $0x178] sm:$0xff]  }
 0x909   :  { %7082 = vmatprep.mubr.msk.bf16.mxu1 %vm4073_vm8, %v7376_v18 }
 0x90a   :  { %v4890_v18 = vunpack.c.0.s8 %v4889_v13  ;;  %v7414_v13 = vld [vmem:[%s9882_s11 + $0x180] sm:$0xff]  }
 0x910   :  { %7083 = vmatmul.mubr.msk.bf16.gmra.mrb[88].mxu1 %vm4073_vm8, %v7377_v19  ;;  %v7403_v19 = vld [vmem:[%s9882_s11 + $0x128] sm:$0xff]  }
 0x911   :  { %7086 = vmatprep.mubr.msk.bf16.mxu1 %vm4073_vm8, %v7378_v20  ;;  %v7404_v20 = vld [vmem:[%s9882_s11 + $0x130] sm:$0xff]  }
 0x918   :  { %7087 = vmatmul.mubr.msk.bf16.gmra.mrb[92].mxu1 %vm4073_vm8, %v7379_v23  ;;  %v9169_v23 = vsub.s32 %v4890_v18, %v7572_v9 }
 0x919   :  { %7090 = vmatprep.mubr.msk.bf16.mxu1 %vm4073_vm8, %v7380_v24  ;;  %v9173_v24 = vpop.permute.xlu0 %3360 }
 0x91a   :  { %9928 = vst [vmem:[#allocation5_spill] sm:$0xff] %v9173_v24 }
 0x920   :  { %7091 = vmatmul.mubr.msk.bf16.gmra.mrb[96].mxu1 %vm4073_vm8, %v7381_v30  ;;  %v9175_v30 = vpop.permute.xlu1 %3355 }
 0x921   :  { %7094 = vmatprep.mubr.msk.bf16.mxu1 %vm4073_vm8, %v7382_v38  ;;  %v9180_v38 = vld [vmem:[%s9884_s13] sm:$0xff] }
 0x922   :  { %9929 = vst [vmem:[#allocation6_spill] sm:$0xff] %v9180_v38  ;;  %v9187_v9 = vrot.slane %v9180_v38, %v9169_v23 }
 0x928   :  { %7095 = vmatmul.mubr.msk.bf16.gmra.mrb[100].mxu1 %vm4073_vm8, %v7383_v39  ;;  %v7405_v39 = vld [vmem:[%s9882_s11 + $0x138] sm:$0xff]  }
 0x929   :  { %7098 = vmatprep.mubr.msk.bf16.mxu1 %vm4073_vm8, %v7384_v40  ;;  %v7406_v40 = vld [vmem:[%s9882_s11 + $0x140] sm:$0xff]  }
 0x930   :  { %7099 = vmatmul.mubr.msk.bf16.gmra.mrb[104].mxu1 %vm4073_vm8, %v7385_v46  ;;  %v4902_v46 = vcombine.high %v9187_v9, %v9187_v9 }
 0x931   :  { %7102 = vmatprep.mubr.msk.bf16.mxu1 %vm4073_vm8, %v7386_v47  ;;  %v9194_v47 = vpop.permute.xlu0 %3280 }
 0x938   :  { %7103 = vmatmul.mubr.msk.bf16.gmra.mrb[108].mxu1 %vm4073_vm8, %v7387_v62  ;;  %v9198_v62 = vrot.slane %v4902_v46, %v9169_v23  ;;  %v7416_v46 = vld [vmem:[%s9882_s11 + $0x190] sm:$0xff]  }
 0x939   :  { %7106 = vmatprep.mubr.msk.bf16.mxu1 %vm4073_vm8, %v7388_v63  ;;  %v9200_v63 = vpop.permute.xlu1 %3275 }
 0x93a   :  { %4976 = vmatprep.mubr.bf16.mxu0 %v9198_v62 }
 0x940   :  { %7107 = vmatmul.mubr.msk.bf16.gmra.mrb[112].mxu1 %vm4073_vm8, %v7389_v3  ;;  %v7407_v3 = vld [vmem:[%s9882_s11 + $0x148] sm:$0xff]  }
 0x941   :  { %7110 = vmatprep.mubr.msk.bf16.mxu1 %vm4073_vm8, %v7390_v1  ;;  %v7408_v1 = vld [vmem:[%s9882_s11 + $0x150] sm:$0xff]  }
 0x948   :  { %7111 = vmatmul.mubr.msk.bf16.gmra.mrb[116].mxu1 %vm4073_vm8, %v7391_v56  ;;  %v9210_v56 = vpop.permute.xlu0 %3370 }
 0x949   :  { %7114 = vmatprep.mubr.msk.bf16.mxu1 %vm4073_vm8, %v7392_v57  ;;  %v9212_v57 = vpop.permute.xlu1 %3365 }
 0x950   :  { %7115 = vmatmul.mubr.msk.bf16.gmra.mrb[120].mxu1 %vm4073_vm8, %v7393_v16  ;;  %v9216_v16 = vpop.permute.xlu0 %3290 }
 0x951   :  { %7118 = vmatprep.mubr.msk.bf16.mxu1 %vm4073_vm8, %v7394_v49  ;;  %v7409_v49 = vld [vmem:[%s9882_s11 + $0x158] sm:$0xff]  }
 0x958   :  { %7119 = vmatmul.mubr.msk.bf16.gmra.mrb[124].mxu1 %vm4073_vm8, %v7395_v51  ;;  %v9221_v51 = vpop.permute.xlu1 %3285 }
 0x959   :  { %7122 = vmatprep.mubr.msk.bf16.mxu1 %vm4073_vm8, %v7396_v34  ;;  %v7410_v34 = vld [vmem:[%s9882_s11 + $0x160] sm:$0xff]  }
 0x960   :  { %7123 = vmatmul.mubr.msk.bf16.gmra.mrb[128].mxu1 %vm4073_vm8, %v7397_v8  ;;  %v9228_v8 = vpop.permute.xlu0 %3380 }
 0x961   :  { %7126 = vmatprep.mubr.msk.bf16.mxu1 %vm4073_vm8, %v7398_v11  ;;  %9930 = vst [vmem:[#allocation7_spill] sm:$0xff] %v9228_v8  ;;  %v9230_v11 = vpop.permute.xlu1 %3375 }
 0x962   :  { %9931 = vst [vmem:[#allocation8_spill] sm:$0xff] %v9230_v11 }
 0x968   :  { %7127 = vmatmul.mubr.msk.bf16.gmra.mrb[132].mxu1 %vm4073_vm8, %v7399_v36  ;;  %v7411_v36 = vld [vmem:[%s9882_s11 + $0x168] sm:$0xff]  }
 0x969   :  { %7130 = vmatprep.mubr.msk.bf16.mxu1 %vm4073_vm8, %v7400_v58  ;;  %v7412_v58 = vld [vmem:[%s9882_s11 + $0x170] sm:$0xff]  }
 0x970   :  { %7131 = vmatmul.mubr.msk.bf16.gmra.mrb[136].mxu1 %vm4073_vm8, %v7401_v59  ;;  %v9238_v59 = vpop.permute.xlu0 %3300 }
 0x971   :  { %7134 = vmatprep.mubr.msk.bf16.mxu1 %vm4073_vm8, %v7402_v4  ;;  %v9241_v4 = vpop.permute.xlu1 %3295 }
 0x974   :  { %v9250_v18 = vpop.permute.xlu0 %3390 }
 0x975   :  { %9932 = vst [vmem:[#allocation9_spill] sm:$0xff] %v9250_v18 }
 0x978   :  { %7135 = vmatmul.mubr.msk.bf16.gmra.mrb[140].mxu1 %vm4073_vm8, %v7403_v19  ;;  %v9252_v19 = vpop.permute.xlu1 %3385 }
 0x979   :  { %7138 = vmatprep.mubr.msk.bf16.mxu1 %vm4073_vm8, %v7404_v20  ;;  %9933 = vst [vmem:[#allocation10_spill] sm:$0xff] %v9252_v19  ;;  %v9256_v20 = vpop.permute.xlu0 %3310 }
 0x980   :  { %7139 = vmatmul.mubr.msk.bf16.gmra.mrb[144].mxu1 %vm4073_vm8, %v7405_v39  ;;  %v7415_v39 = vld [vmem:[%s9882_s11 + $0x188] sm:$0xff]  }
 0x981   :  { %7142 = vmatprep.mubr.msk.bf16.mxu1 %vm4073_vm8, %v7406_v40  ;;  %v9261_v40 = vpop.permute.xlu1 %3305 }
 0x988   :  { %7143 = vmatmul.mubr.msk.bf16.gmra.mrb[148].mxu1 %vm4073_vm8, %v7407_v3  ;;  %v9268_v3 = vpop.permute.xlu0 %3400 }
 0x989   :  { %7146 = vmatprep.mubr.msk.bf16.mxu1 %vm4073_vm8, %v7408_v1  ;;  %9934 = vst [vmem:[#allocation11_spill] sm:$0xff] %v9268_v3  ;;  %v9270_v1 = vpop.permute.xlu1 %3395 }
 0x98a   :  { %9935 = vst [vmem:[#allocation12_spill] sm:$0xff] %v9270_v1  ;;  %v7422_v1 = vld [vmem:[%s9882_s11 + $0x1c0] sm:$0xff]  }
 0x990   :  { %7147 = vmatmul.mubr.msk.bf16.gmra.mrb[152].mxu1 %vm4073_vm8, %v7409_v49  ;;  %v7417_v49 = vld [vmem:[%s9882_s11 + $0x198] sm:$0xff]  }
 0x991   :  { %7150 = vmatprep.mubr.msk.bf16.mxu1 %vm4073_vm8, %v7410_v34  ;;  %v7418_v34 = vld [vmem:[%s9882_s11 + $0x1a0] sm:$0xff]  }
 0x998   :  { %7151 = vmatmul.mubr.msk.bf16.gmra.mrb[156].mxu1 %vm4073_vm8, %v7411_v36  ;;  %v9278_v36 = vpop.permute.xlu0 %3320 }
 0x999   :  { %7154 = vmatprep.mubr.msk.bf16.mxu1 %vm4073_vm8, %v7412_v58  ;;  %v9281_v58 = vpop.permute.xlu1 %3315 }
 0x9a0   :  { %7155 = vmatmul.mubr.msk.bf16.gmra.mrb[160].mxu1 %vm4073_vm8, %v7413_v5  ;;  %v7419_v5 = vld [vmem:[%s9882_s11 + $0x1a8] sm:$0xff]  }
 0x9a1   :  { %7158 = vmatprep.mubr.msk.bf16.mxu1 %vm4073_vm8, %v7414_v13  ;;  %v7420_v13 = vld [vmem:[%s9882_s11 + $0x1b0] sm:$0xff]  }
 0x9a8   :  { %7159 = vmatmul.mubr.msk.bf16.gmra.mrb[164].mxu1 %vm4073_vm8, %v7415_v39  ;;  %v9290_v39 = vpop.permute.xlu0 %3410 }
 0x9a9   :  { %7162 = vmatprep.mubr.msk.bf16.mxu1 %vm4073_vm8, %v7416_v46  ;;  %9936 = vst [vmem:[#allocation13_spill] sm:$0xff] %v9290_v39  ;;  %v9292_v46 = vpop.permute.xlu1 %3405 }
 0x9aa   :  { %9937 = vst [vmem:[#allocation14_spill] sm:$0xff] %v9292_v46 }
 0x9ac   :  { %v9296_v31 = vpop.permute.xlu0 %3330 }
 0x9ad   :  { %v9301_v38 = vpop.permute.xlu1 %3325 }
 0x9b0   :  { %7163 = vmatmul.mubr.msk.bf16.gmra.mrb[168].mxu1 %vm4073_vm8, %v7417_v49  ;;  %v9316_v19 = vpop.permute.xlu0 %3420 }
 0x9b1   :  { %7166 = vmatprep.mubr.msk.bf16.mxu1 %vm4073_vm8, %v7418_v34  ;;  %9938 = vst [vmem:[#allocation15_spill] sm:$0xff] %v9316_v19  ;;  %v9318_v24 = vpop.permute.xlu1 %3415 }
 0x9b2   :  { %9939 = vst [vmem:[#allocation16_spill] sm:$0xff] %v9318_v24 }
 0x9b8   :  { %7167 = vmatmul.mubr.msk.bf16.gmra.mrb[172].mxu1 %vm4073_vm8, %v7419_v5 }
 0x9b9   :  { %7170 = vmatprep.mubr.msk.bf16.mxu1 %vm4073_vm8, %v7420_v13 }
 0x9bb   :  { %v7064_v49 = vpop.f32.mrb[68].mxu1 }
 0x9bc   :  { %v4300_v34 = vpop.f32.mrb[69].mxu1  ;;  %v4309_v39 = vadd.f32 %v7064_v49, %v8859_v45 }
 0x9bd   :  { %v7065_v3 = vpop.f32.mrb[70].mxu1  ;;  %v4301_v46 = vadd.f32 %v4300_v34, %v8833_v29  ;;  %v7423_v29 = vld [vmem:[%s9882_s11 + $0x1c8] sm:$0xff]  }
 0x9be   :  { %v4312_v5 = vadd.f32 %v7065_v3, %v8857_v44  ;;  %v4303_v13 = vpop.f32.mrb[71].mxu1 }
 0x9bf   :  { %v4304_v8 = vadd.f32 %v4303_v13, %v8831_v28  ;;  %v7424_v28 = vld [vmem:[%s9882_s11 + $0x1d0] sm:$0xff]  }
 0x9c0   :  { %v9310_v11 = vpack.c.bf16 %v4312_v5, %v4309_v39  ;;  %7171 = vmatmul.mubr.msk.bf16.gmra.mrb[176].mxu1 %vm4073_vm8, %v7421_v10  ;;  %v9335_v5 = vpop.permute.xlu1 %3335 }
 0x9c1   :  { %v9313_v18 = vpack.c.bf16 %v4304_v8, %v4301_v46  ;;  %7174 = vmatprep.mubr.msk.bf16.mxu1 %vm4073_vm8, %v7422_v1  ;;  %v9330_v46 = vpop.permute.xlu0 %3340 }
 0x9c3   :  { %v7068_v45 = vpop.f32.mrb[72].mxu1 }
 0x9c4   :  { %v4316_v49 = vpop.f32.mrb[73].mxu1  ;;  %v4325_v10 = vadd.f32 %v7068_v45, %v8911_v15 }
 0x9c5   :  { %v7069_v44 = vpop.f32.mrb[74].mxu1  ;;  %v4317_v1 = vadd.f32 %v4316_v49, %v8885_v17  ;;  %v7425_v17 = vld [vmem:[%s9882_s11 + $0x1d8] sm:$0xff]   ;;  %v9346_v49 = vpop.permute.xlu0 %3430 }
 0x9c6   :  { %v4328_v8 = vadd.f32 %v7069_v44, %v8909_v14  ;;  %v4319_v3 = vpop.f32.mrb[75].mxu1 }
 0x9c7   :  { %v4320_v39 = vadd.f32 %v4319_v3, %v8883_v0  ;;  %v7426_v0 = vld [vmem:[%s9882_s11 + $0x1e0] sm:$0xff]  }
 0x9c8   :  { %v9332_v34 = vpack.c.bf16 %v4328_v8, %v4325_v10  ;;  %7175 = vmatmul.mubr.msk.bf16.gmra.mrb[180].mxu1 %vm4073_vm8, %v7423_v29  ;;  %v9350_v8 = vpop.permute.xlu1 %3425 }
 0x9c9   :  { %v9337_v13 = vpack.c.bf16 %v4320_v39, %v4317_v1  ;;  %7178 = vmatprep.mubr.msk.bf16.mxu1 %vm4073_vm8, %v7424_v28  ;;  %v9360_v24 = vpop.permute.xlu0 %3350 }
 0x9cb   :  { %v7072_v15 = vpop.f32.mrb[76].mxu1 }
 0x9cc   :  { %v4332_v45 = vpop.f32.mrb[77].mxu1  ;;  %v4341_v29 = vadd.f32 %v7072_v15, %v8973_v22  ;;  %v9365_v15 = vpop.permute.xlu1 %3345 }
 0x9cd   :  { %v7073_v14 = vpop.f32.mrb[78].mxu1  ;;  %v4333_v28 = vadd.f32 %v4332_v45, %v8937_v12 }
 0x9ce   :  { %v4344_v44 = vadd.f32 %v7073_v14, %v8971_v21  ;;  %v4335_v10 = vpop.f32.mrb[79].mxu1  ;;  %v7427_v21 = vld [vmem:[%s9882_s11 + $0x1e8] sm:$0xff]  }
 0x9cf   :  { %v4336_v3 = vadd.f32 %v4335_v10, %v8935_v32  ;;  %v7428_v32 = vld [vmem:[%s9882_s11 + $0x1f0] sm:$0xff]  }
 0x9d0   :  { %v9354_v1 = vpack.c.bf16 %v4344_v44, %v4341_v29  ;;  %7179 = vmatmul.mubr.msk.bf16.gmra.mrb[184].mxu1 %vm4073_vm8, %v7425_v17 }
 0x9d1   :  { %v9357_v39 = vpack.c.bf16 %v4336_v3, %v4333_v28  ;;  %7182 = vmatprep.mubr.msk.bf16.mxu1 %vm4073_vm8, %v7426_v0  ;;  %v9380_v28 = vpop.permute.xlu0 %3520  ;;  %v9382_v3 = vpop.permute.xlu1 %3515 }
 0x9d2   :  { %9940 = vst [vmem:[#allocation17_spill] sm:$0xff] %v9354_v1 }
 0x9d3   :  { %v7076_v19 = vpop.f32.mrb[80].mxu1 }
 0x9d4   :  { %v4348_v22 = vpop.f32.mrb[81].mxu1  ;;  %v4357_v45 = vadd.f32 %v7076_v19, %v9016_v2 }
 0x9d5   :  { %v7077_v12 = vpop.f32.mrb[82].mxu1  ;;  %v4349_v0 = vadd.f32 %v4348_v22, %v8999_v43  ;;  %v7429_v43 = vld [vmem:[%s9882_s11 + $0x1f8] sm:$0xff]  }
 0x9d6   :  { %v4360_v17 = vadd.f32 %v7077_v12, %v9014_v33  ;;  %v4351_v14 = vpop.f32.mrb[83].mxu1 }
 0x9d7   :  { %v4352_v29 = vadd.f32 %v4351_v14, %v8997_v42  ;;  %v9396_v14 = vpop.permute.xlu1 %3435 }
 0x9d8   :  { %v9374_v44 = vpack.c.bf16 %v4360_v17, %v4357_v45  ;;  %7183 = vmatmul.mubr.msk.bf16.gmra.mrb[188].mxu1 %vm4073_vm8, %v7427_v21  ;;  %v9391_v45 = vpop.permute.xlu0 %3440 }
 0x9d9   :  { %v9377_v10 = vpack.c.bf16 %v4352_v29, %v4349_v0  ;;  %7186 = vmatprep.mubr.msk.bf16.mxu1 %vm4073_vm8, %v7428_v32 }
 0x9da   :  { %9941 = vst [vmem:[#allocation18_spill] sm:$0xff] %v9374_v44 }
 0x9db   :  { %9942 = vst [vmem:[#allocation19_spill] sm:$0xff] %v9377_v10  ;;  %v7080_v2 = vpop.f32.mrb[84].mxu1 }
 0x9dc   :  { %v4364_v19 = vpop.f32.mrb[85].mxu1  ;;  %v4373_v42 = vadd.f32 %v7080_v2, %v8849_v37 }
 0x9dd   :  { %v7081_v33 = vpop.f32.mrb[86].mxu1  ;;  %v4365_v12 = vadd.f32 %v4364_v19, %v8823_v26 }
 0x9de   :  { %v4376_v22 = vadd.f32 %v7081_v33, %v8847_v41  ;;  %v4367_v21 = vpop.f32.mrb[87].mxu1 }
 0x9df   :  { %v4368_v32 = vadd.f32 %v4367_v21, %v8821_v25  ;;  %v9403_v25 = vpop.permute.xlu0 %3530 }
 0x9e0   :  { %v9393_v17 = vpack.c.bf16 %v4376_v22, %v4373_v42  ;;  %7187 = vmatmul.mubr.msk.bf16.gmra.mrb[192].mxu1 %vm4073_vm8, %v7429_v43  ;;  %v9407_v43 = vpop.permute.xlu1 %3525 }
 0x9e1   :  { %v9398_v0 = vpack.c.bf16 %v4368_v32, %v4365_v12 }
 0x9e3   :  { %v7084_v29 = vpop.f32.mrb[88].mxu1  ;;  %6244 = vmatprep.subr.bf16.mxu0 %v9398_v0  ;;  %v9417_v32 = vpop.permute.xlu0 %3450 }
 0x9e4   :  { %v4380_v37 = vpop.f32.mrb[89].mxu1  ;;  %6245 = vmatpush3.bf16.msra.mxu0 %v9313_v18  ;;  %v4389_v26 = vadd.f32 %v7084_v29, %v8901_v61 }
 0x9e5   :  { %v7085_v41 = vpop.f32.mrb[90].mxu1  ;;  %6246 = vmatprep.subr.bf16.mxu0 %v9393_v17  ;;  %v4381_v33 = vadd.f32 %v4380_v37, %v8875_v55 }
 0x9e6   :  { %v4392_v2 = vadd.f32 %v7085_v41, %v8899_v60  ;;  %v4383_v19 = vpop.f32.mrb[91].mxu1  ;;  %v9420_v60 = vpop.permute.xlu1 %3445 }
 0x9e7   :  { %v4384_v42 = vadd.f32 %v4383_v19, %v8873_v54 }
 0x9e8   :  { %v9411_v22 = vpack.c.bf16 %v4392_v2, %v4389_v26  ;;  %6247 = vmatpush3.bf16.msra.mxu0 %v9310_v11 }
 0x9e9   :  { %v9414_v21 = vpack.c.bf16 %v4384_v42, %v4381_v33  ;;  %v9432_v33 = vpop.permute.xlu0 %3540 }
 0x9ea   :  { %9943 = vst [vmem:[#allocation20_spill] sm:$0xff] %v9411_v22  ;;  %v9434_v42 = vpop.permute.xlu1 %3535 }
 0x9eb   :  { %v7088_v12 = vpop.f32.mrb[92].mxu1  ;;  %6248 = vmatprep.subr.bf16.mxu0 %v9414_v21 }
 0x9ec   :  { %v4396_v61 = vpop.f32.mrb[93].mxu1  ;;  %6249 = vmatpush3.bf16.msra.mxu0 %v9337_v13  ;;  %v4405_v54 = vadd.f32 %v7088_v12, %v8957_v7 }
 0x9ed   :  { %v7089_v29 = vpop.f32.mrb[94].mxu1  ;;  %6250 = vmatprep.subr.bf16.mxu0 %v9411_v22  ;;  %v4397_v41 = vadd.f32 %v4396_v61, %v8927_v52 }
 0x9ee   :  { %v4408_v55 = vadd.f32 %v7089_v29, %v8955_v6  ;;  %v4399_v37 = vpop.f32.mrb[95].mxu1 }
 0x9ef   :  { %v4400_v26 = vadd.f32 %v4399_v37, %v8925_v50  ;;  %v9448_v37 = vpop.permute.xlu1 %3455 }
 0x9f0   :  { %v9427_v2 = vpack.c.bf16 %v4408_v55, %v4405_v54  ;;  %6251 = vmatpush3.bf16.msra.mxu0 %v9332_v34  ;;  %v9443_v54 = vpop.permute.xlu0 %3460 }
 0x9f1   :  { %v9430_v19 = vpack.c.bf16 %v4400_v26, %v4397_v41 }
 0x9f2   :  { %9944 = vst [vmem:[#allocation21_spill] sm:$0xff] %v9427_v2 }
 0x9f3   :  { %v7092_v22 = vpop.f32.mrb[96].mxu1  ;;  %6252 = vmatprep.subr.bf16.mxu0 %v9430_v19 }
 0x9f4   :  { %v4412_v7 = vpop.f32.mrb[97].mxu1  ;;  %6253 = vmatpush3.bf16.msra.mxu0 %v9357_v39  ;;  %v4421_v50 = vadd.f32 %v7092_v22, %v9009_v53 }
 0x9f5   :  { %v7093_v6 = vpop.f32.mrb[98].mxu1  ;;  %6254 = vmatprep.subr.bf16.mxu0 %v9427_v2  ;;  %v4413_v61 = vadd.f32 %v4412_v7, %v8983_v27 }
 0x9f6   :  { %v4424_v52 = vadd.f32 %v7093_v6, %v9007_v48  ;;  %v4415_v12 = vpop.f32.mrb[99].mxu1  ;;  %v9459_v6 = vpop.permute.xlu1 %3545 }
 0x9f7   :  { %v4416_v29 = vadd.f32 %v4415_v12, %v8981_v35  ;;  %v9455_v35 = vpop.permute.xlu0 %3550  ;;  %v9465_v12 = vrot.slane %v9187_v9, %v9169_v23 }
 0x9f8   :  { %v9445_v55 = vpack.c.bf16 %v4424_v52, %v4421_v50  ;;  %6255 = vmatpush3.bf16.msra.mxu0 %v9354_v1 }
 0x9f9   :  { %v9450_v41 = vpack.c.bf16 %v4416_v29, %v4413_v61 }
 0x9fa   :  { %9945 = vst [vmem:[#allocation22_spill] sm:$0xff] %v9445_v55 }
 0x9fb   :  { %9946 = vst [vmem:[#allocation23_spill] sm:$0xff] %v9450_v41  ;;  %v7096_v26 = vpop.f32.mrb[100].mxu1  ;;  %6256 = vmatprep.subr.bf16.mxu0 %v9450_v41 }
 0x9fc   :  { %v4428_v53 = vpop.f32.mrb[101].mxu1  ;;  %6257 = vmatpush3.bf16.msra.mxu0 %v9377_v10  ;;  %v4437_v27 = vadd.f32 %v7096_v26, %v9221_v51  ;;  %v4934_v51 = vcombine.high %v9198_v62, %v9198_v62  ;;  %v9475_v26 = vpop.permute.xlu0 %3470 }
 0x9fd   :  { %v7097_v48 = vpop.f32.mrb[102].mxu1  ;;  %6258 = vmatprep.subr.bf16.mxu0 %v9445_v55  ;;  %v4429_v50 = vadd.f32 %v4428_v53, %v9200_v63 }
 0x9fe   :  { %v4440_v22 = vadd.f32 %v7097_v48, %v9216_v16  ;;  %v4431_v7 = vpop.f32.mrb[103].mxu1 }
 0x9ff   :  { %v4432_v52 = vadd.f32 %v4431_v7, %v9194_v47  ;;  %v9477_v47 = vpop.permute.xlu1 %3465 }
 0xa00   :  { %v9467_v61 = vpack.c.bf16 %v4440_v22, %v4437_v27  ;;  %6259 = vmatpush3.bf16.msra.mxu0 %v9374_v44 }
 0xa01   :  { %v9472_v29 = vpack.c.bf16 %v4432_v52, %v4429_v50  ;;  %v9487_v52 = vpop.permute.xlu0 %3560 }
 0xa02   :  { %9947 = vst [vmem:[#allocation24_spill] sm:$0xff] %v9467_v61 }
 0xa03   :  { %9948 = vst [vmem:[#allocation25_spill] sm:$0xff] %v9472_v29  ;;  %v7100_v16 = vpop.f32.mrb[104].mxu1  ;;  %4977 = vmatmul.mubr.bf16.vlgmr.msra.gmra.mrb[72].mxu0 %v9465_v12  ;;  %v9489_v44 = vpop.permute.xlu1 %3555 }
 0xa04   :  { %v4444_v63 = vpop.f32.mrb[105].mxu1  ;;  %5016 = vmatprep.mubr.bf16.mxu0 %v4934_v51  ;;  %v4453_v53 = vadd.f32 %v7100_v16, %v9261_v40 }
 0xa05   :  { %v7101_v9 = vpop.f32.mrb[106].mxu1  ;;  %v4445_v22 = vadd.f32 %v4444_v63, %v9241_v4  ;;  %v9495_v63 = vpop.permute.xlu0 %3480 }
 0xa06   :  { %v4456_v48 = vadd.f32 %v7101_v9, %v9256_v20  ;;  %v4447_v27 = vpop.f32.mrb[107].mxu1 }
 0xa07   :  { %v4448_v62 = vadd.f32 %v4447_v27, %v9238_v59 }
 0xa08   :  { %v9483_v7 = vpack.c.bf16 %v4456_v48, %v4453_v53  ;;  %v9499_v53 = vpop.permute.xlu1 %3475 }
 0xa09   :  { %v9485_v50 = vpack.c.bf16 %v4448_v62, %v4445_v22  ;;  %v9503_v41 = vpop.permute.xlu0 %3570 }
 0xa0a   :  { %9949 = vst [vmem:[#allocation26_spill] sm:$0xff] %v9483_v7 }
 0xa0b   :  { %9950 = vst [vmem:[#allocation27_spill] sm:$0xff] %v9485_v50  ;;  %v7104_v51 = vpop.f32.mrb[108].mxu1 }
 0xa0c   :  { %v4460_v55 = vpop.f32.mrb[109].mxu1  ;;  %v4469_v40 = vadd.f32 %v7104_v51, %v9301_v38 }
 0xa0d   :  { %v7105_v10 = vpop.f32.mrb[110].mxu1  ;;  %v4461_v4 = vadd.f32 %v4460_v55, %v9281_v58 }
 0xa0e   :  { %v4472_v20 = vadd.f32 %v7105_v10, %v9296_v31  ;;  %v4463_v16 = vpop.f32.mrb[111].mxu1  ;;  %v9507_v10 = vpop.permute.xlu1 %3565 }
 0xa0f   :  { %v4464_v59 = vadd.f32 %v4463_v16, %v9278_v36  ;;  %v9515_v16 = vpop.permute.xlu0 %3490 }
 0xa10   :  { %v9497_v9 = vpack.c.bf16 %v4472_v20, %v4469_v40 }
 0xa11   :  { %v9501_v48 = vpack.c.bf16 %v4464_v59, %v4461_v4 }
 0xa12   :  { %9951 = vst [vmem:[#allocation28_spill] sm:$0xff] %v9497_v9  ;;  %v9517_v59 = vpop.permute.xlu1 %3485 }
 0xa13   :  { %9952 = vst [vmem:[#allocation29_spill] sm:$0xff] %v9501_v48  ;;  %v7108_v27 = vpop.f32.mrb[112].mxu1 }
 0xa14   :  { %v4476_v22 = vpop.f32.mrb[113].mxu1  ;;  %v4485_v31 = vadd.f32 %v7108_v27, %v9365_v15 }
 0xa15   :  { %v7109_v62 = vpop.f32.mrb[114].mxu1  ;;  %v4477_v36 = vadd.f32 %v4476_v22, %v9335_v5  ;;  %v9955_v22 = vld [vmem:[#allocation5_spill] sm:$0xff] }
 0xa16   :  { %v4488_v38 = vadd.f32 %v7109_v62, %v9360_v24  ;;  %v4479_v58 = vpop.f32.mrb[115].mxu1 }
 0xa17   :  { %v4480_v55 = vadd.f32 %v4479_v58, %v9330_v46  ;;  %v9527_v58 = vpop.permute.xlu0 %3580 }
 0xa18   :  { %v9511_v51 = vpack.c.bf16 %v4488_v38, %v4485_v31 }
 0xa19   :  { %v9513_v40 = vpack.c.bf16 %v4480_v55, %v4477_v36  ;;  %v9529_v36 = vpop.permute.xlu1 %3575 }
 0xa1a   :  { %9953 = vst [vmem:[#allocation30_spill] sm:$0xff] %v9511_v51 }
 0xa1b   :  { %9954 = vst [vmem:[#allocation31_spill] sm:$0xff] %v9513_v40  ;;  %v7112_v20 = vpop.f32.mrb[116].mxu1 }
 0xa1c   :  { %v4492_v4 = vpop.f32.mrb[117].mxu1  ;;  %v4501_v24 = vadd.f32 %v7112_v20, %v9212_v57  ;;  %v9959_v20 = vld [vmem:[#allocation9_spill] sm:$0xff] }
 0xa1d   :  { %v7113_v15 = vpop.f32.mrb[118].mxu1  ;;  %v4493_v5 = vadd.f32 %v4492_v4, %v9175_v30  ;;  %v9958_v30 = vld [vmem:[#allocation10_spill] sm:$0xff] }
 0xa1e   :  { %v4504_v27 = vadd.f32 %v7113_v15, %v9210_v56  ;;  %v4495_v62 = vpop.f32.mrb[119].mxu1 }
 0xa1f   :  { %v4496_v46 = vadd.f32 %v4495_v62, %v9955_v22  ;;  %v9961_v62 = vld [vmem:[#allocation7_spill] sm:$0xff]  ;;  %v9538_v22 = vpop.permute.xlu0 %3500 }
 0xa20   :  { %v9523_v31 = vpack.c.bf16 %v4504_v27, %v4501_v24  ;;  %v9960_v24 = vld [vmem:[#allocation8_spill] sm:$0xff] }
 0xa21   :  { %v9525_v38 = vpack.c.bf16 %v4496_v46, %v4493_v5 }
 0xa22   :  { %9956 = vst [vmem:[#allocation5_spill] sm:$0xff] %v9523_v31 }
 0xa23   :  { %9957 = vst [vmem:[#allocation32_spill] sm:$0xff] %v9525_v38  ;;  %v7116_v55 = vpop.f32.mrb[120].mxu1  ;;  %6266 = vmatprep.subr.bf16.mxu0 %v9525_v38  ;;  %v9543_v38 = vpop.permute.xlu1 %3495 }
 0xa24   :  { %v4508_v1 = vpop.f32.mrb[121].mxu1  ;;  %6267 = vmatpush3.bf16.msra.mxu0 %v9472_v29  ;;  %v4517_v57 = vadd.f32 %v7116_v55, %v9958_v30  ;;  %v9964_v30 = vld [vmem:[#allocation14_spill] sm:$0xff] }
 0xa25   :  { %v7117_v56 = vpop.f32.mrb[122].mxu1  ;;  %6268 = vmatprep.subr.bf16.mxu0 %v9523_v31  ;;  %v4509_v27 = vadd.f32 %v4508_v1, %v9960_v24  ;;  %v9550_v1 = vpop.permute.xlu0 %3590 }
 0xa26   :  { %v4520_v4 = vadd.f32 %v7117_v56, %v9959_v20  ;;  %v4511_v15 = vpop.f32.mrb[123].mxu1  ;;  %v9965_v20 = vld [vmem:[#allocation13_spill] sm:$0xff] }
 0xa27   :  { %v4512_v5 = vadd.f32 %v4511_v15, %v9961_v62  ;;  %v9554_v24 = vpop.permute.xlu1 %3585 }
 0xa28   :  { %v9540_v46 = vpack.c.bf16 %v4520_v4, %v4517_v57  ;;  %6269 = vmatpush3.bf16.msra.mxu0 %v9467_v61 }
 0xa29   :  { %v9545_v29 = vpack.c.bf16 %v4512_v5, %v4509_v27  ;;  %v9966_v27 = vld [vmem:[#allocation12_spill] sm:$0xff]  ;;  %v9967_v5 = vld [vmem:[#allocation11_spill] sm:$0xff]  ;;  %v9564_v2 = vpop.permute.xlu0 %3510 }
 0xa2a   :  { %9962 = vst [vmem:[#allocation10_spill] sm:$0xff] %v9540_v46 }
 0xa2b   :  { %9963 = vst [vmem:[#allocation9_spill] sm:$0xff] %v9545_v29  ;;  %v7120_v31 = vpop.f32.mrb[124].mxu1  ;;  %6270 = vmatprep.subr.bf16.mxu0 %v9545_v29 }
 0xa2c   :  { %v4524_v55 = vpop.f32.mrb[125].mxu1  ;;  %6271 = vmatpush3.bf16.msra.mxu0 %v9485_v50  ;;  %v4533_v57 = vadd.f32 %v7120_v31, %v9964_v30 }
 0xa2d   :  { %v7121_v56 = vpop.f32.mrb[126].mxu1  ;;  %6272 = vmatprep.subr.bf16.mxu0 %v9540_v46  ;;  %v4525_v62 = vadd.f32 %v4524_v55, %v9966_v27  ;;  %v9569_v55 = vpop.permute.xlu1 %3505 }
 0xa2e   :  { %v4536_v4 = vadd.f32 %v7121_v56, %v9965_v20  ;;  %v4527_v15 = vpop.f32.mrb[127].mxu1  ;;  %v9970_v56 = vld [vmem:[#allocation6_spill] sm:$0xff] }
 0xa2f   :  { %v4528_v61 = vadd.f32 %v4527_v15, %v9967_v5  ;;  %v4887_v30 = vcombine.high %v9970_v56, %v9970_v56  ;;  %v9971_v15 = vld [vmem:[#allocation16_spill] sm:$0xff] }
 0xa30   :  { %v9558_v29 = vpack.c.bf16 %v4536_v4, %v4533_v57  ;;  %6273 = vmatpush3.bf16.msra.mxu0 %v9483_v7  ;;  %v9584_v7 = vpop.permute.xlu0 %3680 }
 0xa31   :  { %v9561_v50 = vpack.c.bf16 %v4528_v61, %v4525_v62  ;;  %v9972_v62 = vld [vmem:[#allocation15_spill] sm:$0xff]  ;;  %v9580_v56 = vrot.slane %v4887_v30, %v9169_v23 }
 0xa32   :  { %9968 = vst [vmem:[#allocation8_spill] sm:$0xff] %v9558_v29 }
 0xa33   :  { %9969 = vst [vmem:[#allocation7_spill] sm:$0xff] %v9561_v50  ;;  %v7124_v46 = vpop.f32.mrb[128].mxu1  ;;  %6274 = vmatprep.subr.bf16.mxu0 %v9561_v50 }
 0xa34   :  { %v4540_v31 = vpop.f32.mrb[129].mxu1  ;;  %6275 = vmatpush3.bf16.msra.mxu0 %v9501_v48  ;;  %v4549_v57 = vadd.f32 %v7124_v46, %v9350_v8  ;;  %v4903_v46 = vcombine.high %v9580_v56, %v9580_v56 }
 0xa35   :  { %v7125_v20 = vpop.f32.mrb[130].mxu1  ;;  %6276 = vmatprep.subr.bf16.mxu0 %v9558_v29  ;;  %v4541_v27 = vadd.f32 %v4540_v31, %v9971_v15  ;;  %v9586_v29 = vpop.permute.xlu1 %3675  ;;  %v4932_v15 = vcombine.high %v9465_v12, %v9465_v12 }
 0xa36   :  { %v4552_v61 = vadd.f32 %v7125_v20, %v9346_v49  ;;  %v4543_v4 = vpop.f32.mrb[131].mxu1 }
 0xa37   :  { %v4544_v5 = vadd.f32 %v4543_v4, %v9972_v62 }
 0xa38   :  { %v9576_v50 = vpack.c.bf16 %v4552_v61, %v4549_v57  ;;  %6277 = vmatpush3.bf16.msra.mxu0 %v9497_v9 }
 0xa39   :  { %v9582_v48 = vpack.c.bf16 %v4544_v5, %v4541_v27  ;;  %v9599_v27 = vpop.permute.xlu0 %3600  ;;  %v9605_v5 = vrot.slane %v4903_v46, %v9169_v23 }
 0xa3a   :  { %9973 = vst [vmem:[#allocation14_spill] sm:$0xff] %v9576_v50 }
 0xa3b   :  { %9974 = vst [vmem:[#allocation13_spill] sm:$0xff] %v9582_v48  ;;  %v7128_v8 = vpop.f32.mrb[132].mxu1  ;;  %6278 = vmatprep.subr.bf16.mxu0 %v9582_v48 }
 0xa3c   :  { %v4556_v49 = vpop.f32.mrb[133].mxu1  ;;  %6279 = vmatpush3.bf16.msra.mxu0 %v9513_v40  ;;  %v4565_v30 = vadd.f32 %v7128_v8, %v9420_v60  ;;  %v9607_v60 = vpop.permute.xlu1 %3595 }
 0xa3d   :  { %v7129_v31 = vpop.f32.mrb[134].mxu1  ;;  %6280 = vmatprep.subr.bf16.mxu0 %v9576_v50  ;;  %v4557_v61 = vadd.f32 %v4556_v49, %v9396_v14  ;;  %v9612_v12 = vpop.permute.xlu0 %3690 }
 0xa3e   :  { %v4568_v20 = vadd.f32 %v7129_v31, %v9417_v32  ;;  %v4559_v57 = vpop.f32.mrb[135].mxu1 }
 0xa3f   :  { %v4560_v4 = vadd.f32 %v4559_v57, %v9391_v45 }
 0xa40   :  { %v9601_v62 = vpack.c.bf16 %v4568_v20, %v4565_v30  ;;  %6281 = vmatpush3.bf16.msra.mxu0 %v9511_v51  ;;  %v9616_v20 = vpop.permute.xlu1 %3685 }
 0xa41   :  { %v9609_v32 = vpack.c.bf16 %v4560_v4, %v4557_v61  ;;  %v9624_v51 = vpop.permute.xlu0 %3610 }
 0xa43   :  { %v7132_v8 = vpop.f32.mrb[136].mxu1  ;;  %5017 = vmatmul.mubr.bf16.vlgmr.msra.gmra.mrb[76].mxu0 %v4932_v15 }
 0xa44   :  { %v4572_v14 = vpop.f32.mrb[137].mxu1  ;;  %5056 = vmatprep.mubr.bf16.mxu0 %v9605_v5  ;;  %v4581_v49 = vadd.f32 %v7132_v8, %v9477_v47  ;;  %v9626_v40 = vpop.permute.xlu1 %3605 }
 0xa45   :  { %v7133_v45 = vpop.f32.mrb[138].mxu1  ;;  %v4573_v46 = vadd.f32 %v4572_v14, %v9448_v37 }
 0xa46   :  { %v4584_v31 = vadd.f32 %v7133_v45, %v9475_v26  ;;  %v4575_v30 = vpop.f32.mrb[139].mxu1 }
 0xa47   :  { %v4576_v57 = vadd.f32 %v4575_v30, %v9443_v54 }
 0xa48   :  { %v9620_v61 = vpack.c.bf16 %v4584_v31, %v4581_v49  ;;  %v9636_v31 = vpop.permute.xlu0 %3700  ;;  %v9638_v30 = vpop.permute.xlu1 %3695 }
 0xa49   :  { %v9622_v4 = vpack.c.bf16 %v4576_v57, %v4573_v46 }
 0xa4b   :  { %v7136_v15 = vpop.f32.mrb[140].mxu1 }
 0xa4c   :  { %v4588_v50 = vpop.f32.mrb[141].mxu1  ;;  %v4597_v26 = vadd.f32 %v7136_v15, %v9517_v59 }
 0xa4d   :  { %v7137_v47 = vpop.f32.mrb[142].mxu1  ;;  %v4589_v37 = vadd.f32 %v4588_v50, %v9499_v53  ;;  %v9644_v53 = vpop.permute.xlu0 %3620 }
 0xa4e   :  { %v4600_v8 = vadd.f32 %v7137_v47, %v9515_v16  ;;  %v4591_v45 = vpop.f32.mrb[143].mxu1 }
 0xa4f   :  { %v4592_v54 = vadd.f32 %v4591_v45, %v9495_v63 }
 0xa50   :  { %v9632_v14 = vpack.c.bf16 %v4600_v8, %v4597_v26  ;;  %v9648_v26 = vpop.permute.xlu1 %3615 }
 0xa51   :  { %v9634_v49 = vpack.c.bf16 %v4592_v54, %v4589_v37  ;;  %v9652_v9 = vpop.permute.xlu0 %3710 }
 0xa52   :  { %9975 = vst [vmem:[#allocation12_spill] sm:$0xff] %v9632_v14 }
 0xa53   :  { %v7140_v46 = vpop.f32.mrb[144].mxu1 }
 0xa54   :  { %v4604_v57 = vpop.f32.mrb[145].mxu1  ;;  %v4613_v59 = vadd.f32 %v7140_v46, %v9569_v55  ;;  %v9656_v55 = vpop.permute.xlu1 %3705 }
 0xa55   :  { %v7141_v48 = vpop.f32.mrb[146].mxu1  ;;  %v4605_v50 = vadd.f32 %v4604_v57, %v9543_v38 }
 0xa56   :  { %v4616_v16 = vadd.f32 %v7141_v48, %v9564_v2  ;;  %v4607_v15 = vpop.f32.mrb[147].mxu1 }
 0xa57   :  { %v4608_v63 = vadd.f32 %v4607_v15, %v9538_v22  ;;  %v9665_v15 = vpop.permute.xlu0 %3630 }
 0xa58   :  { %v9646_v47 = vpack.c.bf16 %v4616_v16, %v4613_v59 }
 0xa59   :  { %v9650_v8 = vpack.c.bf16 %v4608_v63, %v4605_v50 }
 0xa5a   :  { %9976 = vst [vmem:[#allocation11_spill] sm:$0xff] %v9646_v47 }
 0xa5b   :  { %9977 = vst [vmem:[#allocation6_spill] sm:$0xff] %v9650_v8  ;;  %v7144_v45 = vpop.f32.mrb[148].mxu1 }
 0xa5c   :  { %v4620_v37 = vpop.f32.mrb[149].mxu1  ;;  %v4629_v2 = vadd.f32 %v7144_v45, %v9407_v43 }
 0xa5d   :  { %v7145_v54 = vpop.f32.mrb[150].mxu1  ;;  %v4621_v22 = vadd.f32 %v4620_v37, %v9382_v3 }
 0xa5e   :  { %v4632_v48 = vadd.f32 %v7145_v54, %v9403_v25  ;;  %v4623_v38 = vpop.f32.mrb[151].mxu1  ;;  %v9668_v25 = vpop.permute.xlu1 %3625 }
 0xa5f   :  { %v4624_v46 = vadd.f32 %v4623_v38, %v9380_v28 }
 0xa60   :  { %v9660_v57 = vpack.c.bf16 %v4632_v48, %v4629_v2  ;;  %v9680_v48 = vpop.permute.xlu0 %3720 }
 0xa61   :  { %v9662_v59 = vpack.c.bf16 %v4624_v46, %v4621_v22 }
 0xa62   :  { %v9682_v38 = vpop.permute.xlu1 %3715 }
 0xa63   :  { %v7148_v16 = vpop.f32.mrb[152].mxu1  ;;  %6288 = vmatprep.subr.bf16.mxu0 %v9662_v59 }
 0xa64   :  { %v4636_v50 = vpop.f32.mrb[153].mxu1  ;;  %6289 = vmatpush3.bf16.msra.mxu0 %v9609_v32  ;;  %v4645_v3 = vadd.f32 %v7148_v16, %v9459_v6 }
 0xa65   :  { %v7149_v43 = vpop.f32.mrb[154].mxu1  ;;  %6290 = vmatprep.subr.bf16.mxu0 %v9660_v57  ;;  %v4637_v45 = vadd.f32 %v4636_v50, %v9434_v42 }
 0xa66   :  { %v4648_v28 = vadd.f32 %v7149_v43, %v9455_v35  ;;  %v4639_v63 = vpop.f32.mrb[155].mxu1  ;;  %v9691_v43 = vpop.permute.xlu0 %3640 }
 0xa67   :  { %v4640_v37 = vadd.f32 %v4639_v63, %v9432_v33 }
 0xa68   :  { %v9675_v54 = vpack.c.bf16 %v4648_v28, %v4645_v3  ;;  %6291 = vmatpush3.bf16.msra.mxu0 %v9601_v62  ;;  %v3636_v28 = vpop.permute.xlu1 %3635 }
 0xa69   :  { %v9678_v2 = vpack.c.bf16 %v4640_v37, %v4637_v45 }
 0xa6b   :  { %v7152_v22 = vpop.f32.mrb[156].mxu1  ;;  %6292 = vmatprep.subr.bf16.mxu0 %v9678_v2 }
 0xa6c   :  { %v4652_v6 = vpop.f32.mrb[157].mxu1  ;;  %6293 = vmatpush3.bf16.msra.mxu0 %v9622_v4  ;;  %v4661_v33 = vadd.f32 %v7152_v22, %v9507_v10 }
 0xa6d   :  { %v7153_v35 = vpop.f32.mrb[158].mxu1  ;;  %6294 = vmatprep.subr.bf16.mxu0 %v9675_v54  ;;  %v4653_v16 = vadd.f32 %v4652_v6, %v9489_v44  ;;  %v9701_v44 = vpop.permute.xlu0 %3730 }
 0xa6e   :  { %v4664_v42 = vadd.f32 %v7153_v35, %v9503_v41  ;;  %v4655_v46 = vpop.f32.mrb[159].mxu1  ;;  %v9705_v6 = vpop.permute.xlu1 %3725 }
 0xa6f   :  { %v4656_v50 = vadd.f32 %v4655_v46, %v9487_v52 }
 0xa70   :  { %v9693_v3 = vpack.c.bf16 %v4664_v42, %v4661_v33  ;;  %6295 = vmatpush3.bf16.msra.mxu0 %v9620_v61 }
 0xa71   :  { %v9696_v63 = vpack.c.bf16 %v4656_v50, %v4653_v16  ;;  %v3651_v50 = vpop.permute.xlu0 %3650 }
 0xa72   :  { %9978 = vst [vmem:[#allocation16_spill] sm:$0xff] %v9693_v3 }
 0xa73   :  { %v7156_v45 = vpop.f32.mrb[160].mxu1  ;;  %6296 = vmatprep.subr.bf16.mxu0 %v9696_v63 }
 0xa74   :  { %v4668_v10 = vpop.f32.mrb[161].mxu1  ;;  %6297 = vmatpush3.bf16.msra.mxu0 %v9634_v49  ;;  %v4677_v52 = vadd.f32 %v7156_v45, %v9554_v24 }
 0xa75   :  { %v7157_v41 = vpop.f32.mrb[162].mxu1  ;;  %6298 = vmatprep.subr.bf16.mxu0 %v9693_v3  ;;  %v4669_v35 = vadd.f32 %v4668_v10, %v9529_v36 }
 0xa76   :  { %v4680_v37 = vadd.f32 %v7157_v41, %v9550_v1  ;;  %v4671_v22 = vpop.f32.mrb[163].mxu1  ;;  %v3646_v1 = vpop.permute.xlu1 %3645 }
 0xa77   :  { %v4672_v33 = vadd.f32 %v4671_v22, %v9527_v58 }
 0xa78   :  { %v9709_v42 = vpack.c.bf16 %v4680_v37, %v4677_v52  ;;  %6299 = vmatpush3.bf16.msra.mxu0 %v9632_v14  ;;  %v9723_v37 = vrot.slane %v9580_v56, %v9169_v23 }
 0xa79   :  { %v9712_v46 = vpack.c.bf16 %v4672_v33, %v4669_v35  ;;  %v4935_v35 = vcombine.high %v9605_v5, %v9605_v5 }
 0xa7a   :  { %9979 = vst [vmem:[#allocation15_spill] sm:$0xff] %v9709_v42 }
 0xa7b   :  { %9980 = vst [vmem:[#allocation33_spill] sm:$0xff] %v9712_v46  ;;  %v7160_v16 = vpop.f32.mrb[164].mxu1  ;;  %6300 = vmatprep.subr.bf16.mxu0 %v9712_v46 }
 0xa7c   :  { %v4684_v24 = vpop.f32.mrb[165].mxu1  ;;  %6301 = vmatpush3.bf16.msra.mxu0 %v9650_v8  ;;  %v4693_v36 = vadd.f32 %v7160_v16, %v9626_v40  ;;  %v9730_v40 = vpop.permute.xlu0 %3740 }
 0xa7d   :  { %v7161_v45 = vpop.f32.mrb[166].mxu1  ;;  %6302 = vmatprep.subr.bf16.mxu0 %v9709_v42  ;;  %v4685_v41 = vadd.f32 %v4684_v24, %v9607_v60 }
 0xa7e   :  { %v4696_v58 = vadd.f32 %v7161_v45, %v9624_v51  ;;  %v4687_v10 = vpop.f32.mrb[167].mxu1  ;;  %v9732_v51 = vpop.permute.xlu1 %3735 }
 0xa7f   :  { %v4688_v52 = vadd.f32 %v4687_v10, %v9599_v27 }
 0xa80   :  { %v9725_v22 = vpack.c.bf16 %v4696_v58, %v4693_v36  ;;  %6303 = vmatpush3.bf16.msra.mxu0 %v9646_v47  ;;  %v3661_v36 = vpop.permute.xlu0 %3660 }
 0xa81   :  { %v4859_v33 = vpack.c.bf16 %v4688_v52, %v4685_v41 }
 0xa82   :  { %v3656_v10 = vpop.permute.xlu1 %3655 }
 0xa83   :  { %v7164_v16 = vpop.f32.mrb[168].mxu1  ;;  %5057 = vmatmul.mubr.bf16.vlgmr.msra.gmra.mrb[80].mxu0 %v9723_v37 }
 0xa84   :  { %v4700_v27 = vpop.f32.mrb[169].mxu1  ;;  %5096 = vmatprep.mubr.bf16.mxu0 %v4935_v35  ;;  %v4709_v23 = vadd.f32 %v7164_v16, %v9668_v25  ;;  %v9741_v8 = vpop.permute.xlu0 %3750 }
 0xa85   :  { %v7165_v60 = vpop.f32.mrb[170].mxu1  ;;  %v4701_v45 = vadd.f32 %v4700_v27, %v9648_v26 }
 0xa86   :  { %v4712_v56 = vadd.f32 %v7165_v60, %v9665_v15  ;;  %v4703_v24 = vpop.f32.mrb[171].mxu1  ;;  %v9743_v16 = vpop.permute.xlu1 %3745 }
 0xa87   :  { %v4704_v5 = vadd.f32 %v4703_v24, %v9644_v53 }
 0xa88   :  { %v9739_v58 = vpack.c.bf16 %v4712_v56, %v4709_v23  ;;  %v3671_v23 = vpop.permute.xlu0 %3670 }
 0xa89   :  { %v4861_v41 = vpack.c.bf16 %v4704_v5, %v4701_v45 }
 0xa8a   :  { %v3666_v24 = vpop.permute.xlu1 %3665 }
 0xa8b   :  { %v7168_v52 = vpop.f32.mrb[172].mxu1 }
 0xa8c   :  { %v4716_v47 = vpop.f32.mrb[173].mxu1  ;;  %v4725_v35 = vadd.f32 %v7168_v52, %v3646_v1 }
 0xa8d   :  { %v7169_v42 = vpop.f32.mrb[174].mxu1  ;;  %v4717_v15 = vadd.f32 %v4716_v47, %v3636_v28 }
 0xa8e   :  { %v4728_v46 = vadd.f32 %v7169_v42, %v3651_v50  ;;  %v4719_v25 = vpop.f32.mrb[175].mxu1 }
 0xa8f   :  { %v4720_v26 = vadd.f32 %v4719_v25, %v9691_v43 }
 0xa90   :  { %v9746_v27 = vpack.c.bf16 %v4728_v46, %v4725_v35 }
 0xa91   :  { %v9748_v53 = vpack.c.bf16 %v4720_v26, %v4717_v15  ;;  %v9759_v15 = vld [vmem:[%s9885_s15 + $0x18] sm:$0xff] }
 0xa93   :  { %v7172_v60 = vpop.f32.mrb[176].mxu1 }
 0xa94   :  { %v4732_v56 = vpop.f32.mrb[177].mxu1  ;;  %v4741_v5 = vadd.f32 %v7172_v60, %v3666_v24 }
 0xa95   :  { %v7173_v45 = vpop.f32.mrb[178].mxu1  ;;  %v4733_v1 = vadd.f32 %v4732_v56, %v3656_v10 }
 0xa96   :  { %v4744_v14 = vadd.f32 %v7173_v45, %v3671_v23  ;;  %v4735_v3 = vpop.f32.mrb[179].mxu1 }
 0xa97   :  { %v4736_v42 = vadd.f32 %v4735_v3, %v3661_v36  ;;  %v5852_v3 = vcombine.high %v9759_v15, %v9759_v15 }
 0xa98   :  { %v9750_v50 = vpack.c.bf16 %v4744_v14, %v4741_v5 }
 0xa99   :  { %v9752_v52 = vpack.c.bf16 %v4736_v42, %v4733_v1  ;;  %5294 = vmatprep.mubr.bf16.mxu1 %v5852_v3  ;;  %v9990_v3 = vld [vmem:[#allocation5_spill] sm:$0xff] }
 0xa9b   :  { %v7176_v47 = vpop.f32.mrb[180].mxu1 }
 0xa9c   :  { %v4748_v43 = vpop.f32.mrb[181].mxu1  ;;  %v4757_v46 = vadd.f32 %v7176_v47, %v9616_v20 }
 0xa9d   :  { %v7177_v28 = vpop.f32.mrb[182].mxu1  ;;  %v4749_v10 = vadd.f32 %v4748_v43, %v9586_v29 }
 0xa9e   :  { %v4760_v35 = vadd.f32 %v7177_v28, %v9612_v12  ;;  %v4751_v25 = vpop.f32.mrb[183].mxu1 }
 0xa9f   :  { %v4752_v14 = vadd.f32 %v4751_v25, %v9584_v7 }
 0xaa0   :  { %v4868_v36 = vpack.c.bf16 %v4760_v35, %v4757_v46 }
 0xaa1   :  { %v4867_v26 = vpack.c.bf16 %v4752_v14, %v4749_v10  ;;  %v9988_v10 = vld [vmem:[#allocation32_spill] sm:$0xff]  ;;  %v9989_v14 = vld [vmem:[#allocation25_spill] sm:$0xff] }
 0xaa3   :  { %v7180_v60 = vpop.f32.mrb[184].mxu1  ;;  %6310 = vmatprep.subr.bf16.mxu0 %v4867_v26  ;;  %6398 = vmatprep.subr.bf16.mxu1 %v4867_v26  ;;  %v9992_v26 = vld [vmem:[#allocation9_spill] sm:$0xff] }
 0xaa4   :  { %v4764_v12 = vpop.f32.mrb[185].mxu1  ;;  %6311 = vmatpush3.bf16.msra.mxu0 %v4859_v33  ;;  %6399 = vmatpush3.bf16.msra.mxu1 %v4859_v33  ;;  %v4773_v23 = vadd.f32 %v7180_v60, %v9656_v55  ;;  %v9993_v60 = vld [vmem:[#allocation27_spill] sm:$0xff] }
 0xaa5   :  { %v7181_v20 = vpop.f32.mrb[186].mxu1  ;;  %6312 = vmatprep.subr.bf16.mxu0 %v4868_v36  ;;  %6400 = vmatprep.subr.bf16.mxu1 %v4868_v36  ;;  %v4765_v56 = vadd.f32 %v4764_v12, %v9638_v30  ;;  %v9991_v36 = vld [vmem:[#allocation24_spill] sm:$0xff]  ;;  %v9994_v12 = vld [vmem:[#allocation10_spill] sm:$0xff] }
 0xaa6   :  { %v4776_v29 = vadd.f32 %v7181_v20, %v9652_v9  ;;  %v4767_v7 = vpop.f32.mrb[187].mxu1  ;;  %v9995_v20 = vld [vmem:[#allocation26_spill] sm:$0xff] }
 0xaa7   :  { %v4768_v24 = vadd.f32 %v4767_v7, %v9636_v31  ;;  %v9998_v7 = vld [vmem:[#allocation8_spill] sm:$0xff] }
 0xaa8   :  { %v4870_v45 = vpack.c.bf16 %v4776_v29, %v4773_v23  ;;  %6313 = vmatpush3.bf16.msra.mxu0 %v9725_v22  ;;  %6401 = vmatpush3.bf16.msra.mxu1 %v9725_v22  ;;  %v9996_v23 = vld [vmem:[#allocation7_spill] sm:$0xff]  ;;  %v9997_v29 = vld [vmem:[#allocation29_spill] sm:$0xff] }
 0xaa9   :  { %v4869_v5 = vpack.c.bf16 %v4768_v24, %v4765_v56  ;;  %v9999_v56 = vld [vmem:[#allocation28_spill] sm:$0xff]  ;;  %v10000_v24 = vld [vmem:[#allocation13_spill] sm:$0xff] }
 0xaab   :  { %v7184_v1 = vpop.f32.mrb[188].mxu1  ;;  %6314 = vmatprep.subr.bf16.mxu0 %v4869_v5  ;;  %6402 = vmatprep.subr.bf16.mxu1 %v4869_v5  ;;  %v10002_v5 = vld [vmem:[#allocation14_spill] sm:$0xff] }
 0xaac   :  { %v4780_v33 = vpop.f32.mrb[189].mxu1  ;;  %6315 = vmatpush3.bf16.msra.mxu0 %v4861_v41  ;;  %6403 = vmatpush3.bf16.msra.mxu1 %v4861_v41  ;;  %v4789_v9 = vadd.f32 %v7184_v1, %v9705_v6  ;;  %v5106_v1 = vld [vmem:[%s9885_s15 + $0x10] sm:$0xff] }
 0xaad   :  { %v7185_v55 = vpop.f32.mrb[190].mxu1  ;;  %6316 = vmatprep.subr.bf16.mxu0 %v4870_v45  ;;  %6404 = vmatprep.subr.bf16.mxu1 %v4870_v45  ;;  %v4781_v42 = vadd.f32 %v4780_v33, %v9682_v38  ;;  %v10001_v45 = vld [vmem:[#allocation31_spill] sm:$0xff] }
 0xaae   :  { %v4792_v30 = vadd.f32 %v7185_v55, %v9701_v44  ;;  %v4783_v31 = vpop.f32.mrb[191].mxu1  ;;  %v10003_v55 = vld [vmem:[#allocation30_spill] sm:$0xff] }
 0xaaf   :  { %v4784_v47 = vadd.f32 %v4783_v31, %v9680_v48 }
 0xab0   :  { %v4872_v22 = vpack.c.bf16 %v4792_v30, %v4789_v9  ;;  %6317 = vmatpush3.bf16.msra.mxu0 %v9739_v58  ;;  %6405 = vmatpush3.bf16.msra.mxu1 %v9739_v58  ;;  %v5850_v9 = vcombine.high %v5106_v1, %v5106_v1  ;;  %v4880_v30 = vpop.permute.xlu0 %4879 }
 0xab1   :  { %v4871_v43 = vpack.c.bf16 %v4784_v47, %v4781_v42 }
 0xab3   :  { %v7188_v28 = vpop.f32.mrb[192].mxu1  ;;  %6318 = vmatprep.subr.bf16.mxu0 %v4871_v43  ;;  %6406 = vmatprep.subr.bf16.mxu1 %v4871_v43  ;;  %v10010_v43 = vld [vmem:[#allocation15_spill] sm:$0xff] }
 0xab4   :  { %v4796_v41 = vpop.f32.mrb[193].mxu1  ;;  %6319 = vmatpush3.bf16.msra.mxu0 %v9748_v53  ;;  %6407 = vmatpush3.bf16.msra.mxu1 %v9748_v53  ;;  %v4805_v38 = vadd.f32 %v7188_v28, %v9743_v16  ;;  %v5849_v28 = vcombine.low %v5106_v1, %v5106_v1 }
 0xab5   :  { %v7189_v44 = vpop.f32.mrb[194].mxu1  ;;  %6320 = vmatprep.subr.bf16.mxu0 %v4872_v22  ;;  %6408 = vmatprep.subr.bf16.mxu1 %v4872_v22  ;;  %v4797_v46 = vadd.f32 %v4796_v41, %v9732_v51  ;;  %v5851_v51 = vcombine.low %v9759_v15, %v9759_v15  ;;  %v10009_v22 = vld [vmem:[#allocation6_spill] sm:$0xff]  ;;  %v10011_v41 = vld [vmem:[#allocation11_spill] sm:$0xff] }
 0xab6   :  { %v4808_v48 = vadd.f32 %v7189_v44, %v9741_v8  ;;  %v4799_v6 = vpop.f32.mrb[195].mxu1  ;;  %v5104_v8 = vld [vmem:[%s9885_s15] sm:$0xff] }
 0xab7   :  { %v4800_v58 = vadd.f32 %v4799_v6, %v9730_v40  ;;  %v4933_v40 = vcombine.high %v9723_v37, %v9723_v37  ;;  %v5846_v16 = vcombine.high %v5104_v8, %v5104_v8  ;;  %v9981_v37 = vld [vmem:[#allocation20_spill] sm:$0xff] }
 0xab8   :  { %v4874_v35 = vpack.c.bf16 %v4808_v48, %v4805_v38  ;;  %6321 = vmatpush3.bf16.msra.mxu0 %v9746_v27  ;;  %6409 = vmatpush3.bf16.msra.mxu1 %v9746_v27 }
 0xab9   :  { %v4873_v25 = vpack.c.bf16 %v4800_v58, %v4797_v46 }
 0xabb   :  { %6322 = vmatprep.subr.bf16.mxu0 %v4873_v25  ;;  %6410 = vmatprep.subr.bf16.mxu1 %v4873_v25 }
 0xabc   :  { %6323 = vmatpush3.bf16.msra.mxu0 %v9752_v52  ;;  %6411 = vmatpush3.bf16.msra.mxu1 %v9752_v52  ;;  %v9986_v52 = vld [vmem:[#allocation22_spill] sm:$0xff] }
 0xabd   :  { %6324 = vmatprep.subr.bf16.mxu0 %v4874_v35  ;;  %6412 = vmatprep.subr.bf16.mxu1 %v4874_v35 }
 0xac0   :  { %6325 = vmatpush3.bf16.msra.mxu0 %v9750_v50  ;;  %6413 = vmatpush3.bf16.msra.mxu1 %v9750_v50  ;;  %v9984_v50 = vld [vmem:[#allocation23_spill] sm:$0xff] }
 0xac1   :  { %6332 = vmatprep.subr.bf16.mxu0 %v9398_v0  ;;  %v9982_v0 = vld [vmem:[#allocation21_spill] sm:$0xff] }
 0xac3   :  { %5097 = vmatmul.mubr.bf16.vlgmr.msra.gmra.mrb[84].mxu0 %v4933_v40  ;;  %5295 = vmatmul.mubr.bf16.vlgmr.msra.gmra.mrb[196].mxu1 %v5851_v51 }
 0xac4   :  { %6333 = vmatpush3.bf16.msra.mxu0 %v9313_v18  ;;  %5174 = vmatprep.mubr.bf16.mxu0 %v5846_v16 }
 0xac5   :  { %6334 = vmatprep.subr.bf16.mxu0 %v9393_v17  ;;  %v9983_v17 = vld [vmem:[#allocation17_spill] sm:$0xff] }
 0xac8   :  { %6335 = vmatpush3.bf16.msra.mxu0 %v9310_v11 }
 0xac9   :  { %6336 = vmatprep.subr.bf16.mxu0 %v9414_v21 }
 0xacc   :  { %6337 = vmatpush3.bf16.msra.mxu0 %v9337_v13  ;;  %v9985_v13 = vld [vmem:[#allocation19_spill] sm:$0xff] }
 0xacd   :  { %6338 = vmatprep.subr.bf16.mxu0 %v9981_v37 }
 0xad0   :  { %6339 = vmatpush3.bf16.msra.mxu0 %v9332_v34  ;;  %v5105_v34 = vld [vmem:[%s9885_s15 + $0x8] sm:$0xff] }
 0xad1   :  { %6340 = vmatprep.subr.bf16.mxu0 %v9430_v19  ;;  %v9987_v19 = vld [vmem:[#allocation18_spill] sm:$0xff]  ;;  %v5848_v15 = vcombine.high %v5105_v34, %v5105_v34  ;;  %v5847_v33 = vcombine.low %v5105_v34, %v5105_v34  ;;  %v5112_v34 = vpop.permute.xlu1 %5111 }
 0xad4   :  { %6341 = vmatpush3.bf16.msra.mxu0 %v9357_v39  ;;  %v5845_v39 = vcombine.low %v5104_v8, %v5104_v8 }
 0xad5   :  { %6342 = vmatprep.subr.bf16.mxu0 %v9982_v0 }
 0xad6   :  { %v6260_v18 = vpop.f32.mrb[72].mxu0 }
 0xad7   :  { %v6261_v27 = vpop.f32.mrb[73].mxu0 }
 0xad8   :  { %v6262_v53 = vadd.f32 %v6261_v27, %v6260_v18  ;;  %6343 = vmatpush3.bf16.msra.mxu0 %v9983_v17  ;;  %v6263_v11 = vpop.f32.mrb[74].mxu0 }
 0xad9   :  { %6344 = vmatprep.subr.bf16.mxu0 %v9984_v50  ;;  %v6264_v21 = vpop.f32.mrb[75].mxu0 }
 0xadc   :  { %6345 = vmatpush3.bf16.msra.mxu0 %v9985_v13 }
 0xadd   :  { %6346 = vmatprep.subr.bf16.mxu0 %v9986_v52 }
 0xae0   :  { %6347 = vmatpush3.bf16.msra.mxu0 %v9987_v19 }
 0xae1   :  { %6354 = vmatprep.subr.bf16.mxu0 %v9988_v10 }
 0xae3   :  { %5175 = vmatmul.mubr.bf16.vlgmr.msra.gmra.mrb[88].mxu0 %v5845_v39 }
 0xae4   :  { %6355 = vmatpush3.bf16.msra.mxu0 %v9989_v14  ;;  %5214 = vmatprep.mubr.bf16.mxu0 %v5848_v15 }
 0xae5   :  { %6356 = vmatprep.subr.bf16.mxu0 %v9990_v3 }
 0xae8   :  { %6357 = vmatpush3.bf16.msra.mxu0 %v9991_v36 }
 0xae9   :  { %6358 = vmatprep.subr.bf16.mxu0 %v9992_v26 }
 0xaec   :  { %6359 = vmatpush3.bf16.msra.mxu0 %v9993_v60 }
 0xaed   :  { %6360 = vmatprep.subr.bf16.mxu0 %v9994_v12 }
 0xaf0   :  { %6361 = vmatpush3.bf16.msra.mxu0 %v9995_v20 }
 0xaf1   :  { %6362 = vmatprep.subr.bf16.mxu0 %v9996_v23 }
 0xaf4   :  { %6363 = vmatpush3.bf16.msra.mxu0 %v9997_v29 }
 0xaf5   :  { %6364 = vmatprep.subr.bf16.mxu0 %v9998_v7 }
 0xaf8   :  { %6365 = vmatpush3.bf16.msra.mxu0 %v9999_v56 }
 0xaf9   :  { %6366 = vmatprep.subr.bf16.mxu0 %v10000_v24 }
 0xafc   :  { %6367 = vmatpush3.bf16.msra.mxu0 %v10001_v45 }
 0xafd   :  { %6368 = vmatprep.subr.bf16.mxu0 %v10002_v5 }
 0xb00   :  { %6369 = vmatpush3.bf16.msra.mxu0 %v10003_v55 }
 0xb01   :  { %6376 = vmatprep.subr.bf16.mxu0 %v9662_v59  ;;  %v10004_v59 = vld [vmem:[#allocation16_spill] sm:$0xff] }
 0xb03   :  { %5215 = vmatmul.mubr.bf16.vlgmr.msra.gmra.mrb[92].mxu0 %v5847_v33 }
 0xb04   :  { %6377 = vmatpush3.bf16.msra.mxu0 %v9609_v32  ;;  %5254 = vmatprep.mubr.bf16.mxu0 %v5850_v9  ;;  %v10005_v32 = vld [vmem:[#allocation4_spill] sm:$0xff] }
 0xb05   :  { %6378 = vmatprep.subr.bf16.mxu0 %v9660_v57  ;;  %v4885_v31 = vrot.slane %v4880_v30, %v10005_v32  ;;  %v5323_v30 = vld [vmem:[%s9887_s17] sm:$0x7f] }
 0xb08   :  { %6379 = vmatpush3.bf16.msra.mxu0 %v9601_v62  ;;  %v10006_v62 = vmov 0.0  }
 0xb09   :  { %6380 = vmatprep.subr.bf16.mxu0 %v9678_v2  ;;  %5333 = vst [vmem:[%s9886_s18] sm:$0xff] %v10006_v62  ;;  %v10007_v2 = vld [vmem:[#allocation12_spill] sm:$0xff] }
 0xb0c   :  { %6381 = vmatpush3.bf16.msra.mxu0 %v9622_v4  ;;  %v4979_v4 = vadd.f32 %v6262_v53, %v4885_v31 }
 0xb0d   :  { %6382 = vmatprep.subr.bf16.mxu0 %v9675_v54 }
 0xb10   :  { %6383 = vmatpush3.bf16.msra.mxu0 %v9620_v61 }
 0xb11   :  { %6384 = vmatprep.subr.bf16.mxu0 %v9696_v63  ;;  %v10008_v63 = vld [vmem:[#allocation33_spill] sm:$0xff] }
 0xb14   :  { %6385 = vmatpush3.bf16.msra.mxu0 %v9634_v49 }
 0xb15   :  { %6386 = vmatprep.subr.bf16.mxu0 %v10004_v59 }
 0xb16   :  { %v6282_v57 = vpop.f32.mrb[76].mxu0 }
 0xb17   :  { %v6283_v42 = vpop.f32.mrb[77].mxu0 }
 0xb18   :  { %v6284_v54 = vadd.f32 %v6283_v42, %v6282_v57  ;;  %6387 = vmatpush3.bf16.msra.mxu0 %v10007_v2  ;;  %v6285_v61 = vpop.f32.mrb[78].mxu0 }
 0xb19   :  { %6388 = vmatprep.subr.bf16.mxu0 %v10008_v63  ;;  %v6286_v47 = vpop.f32.mrb[79].mxu0 }
 0xb1a   :  { %v5019_v49 = vadd.f32 %v6284_v54, %v4979_v4 }
 0xb1c   :  { %6389 = vmatpush3.bf16.msra.mxu0 %v10009_v22 }
 0xb1d   :  { %6390 = vmatprep.subr.bf16.mxu0 %v10010_v43 }
 0xb20   :  { %6391 = vmatpush3.bf16.msra.mxu0 %v10011_v41 }
 0xb23   :  { %5255 = vmatmul.mubr.bf16.vlgmr.msra.gmra.mrb[96].mxu0 %v5849_v28 }
 0xb56   :  { %v6304_v44 = vpop.f32.mrb[80].mxu0 }
 0xb57   :  { %v6305_v38 = vpop.f32.mrb[81].mxu0 }
 0xb58   :  { %v6306_v48 = vadd.f32 %v6305_v38, %v6304_v44  ;;  %v6307_v6 = vpop.f32.mrb[82].mxu0 }
 0xb59   :  { %v6308_v46 = vpop.f32.mrb[83].mxu0 }
 0xb5a   :  { %v5059_v58 = vadd.f32 %v6306_v48, %v5019_v49 }
 0xb96   :  { %v6326_v35 = vpop.f32.mrb[84].mxu0  ;;  %v6414_v25 = vpop.f32.mrb[196].mxu1 }
 0xb97   :  { %v6327_v8 = vpop.f32.mrb[85].mxu0  ;;  %v6415_v40 = vpop.f32.mrb[197].mxu1 }
 0xb98   :  { %v6328_v51 = vadd.f32 %v6327_v8, %v6326_v35  ;;  %v6329_v16 = vpop.f32.mrb[86].mxu0  ;;  %v6416_v37 = vadd.f32 %v6415_v40, %v6414_v25  ;;  %v6417_v0 = vpop.f32.mrb[198].mxu1 }
 0xb99   :  { %v6330_v18 = vpop.f32.mrb[87].mxu0  ;;  %v6418_v27 = vpop.f32.mrb[199].mxu1 }
 0xb9a   :  { %v5099_v53 = vadd.f32 %v6328_v51, %v5059_v58 }
 0xb9c   :  { %5335 = vst.msk [vmem:[%s9886_s18] sm:$0x1] %vm5334_vm9, %v5099_v53 }
 0xbb6   :  { %v6348_v17 = vpop.f32.mrb[88].mxu0 }
 0xbb7   :  { %v6349_v11 = vpop.f32.mrb[89].mxu0 }
 0xbb8   :  { %v6350_v50 = vadd.f32 %v6349_v11, %v6348_v17  ;;  %v6351_v21 = vpop.f32.mrb[90].mxu0 }
 0xbb9   :  { %v6352_v13 = vpop.f32.mrb[91].mxu0 }
 0xbba   :  { %v5177_v19 = vadd.f32 %v6350_v50, %v5112_v34 }
 0xbd6   :  { %v6370_v52 = vpop.f32.mrb[92].mxu0 }
 0xbd7   :  { %v6371_v39 = vpop.f32.mrb[93].mxu0 }
 0xbd8   :  { %v6372_v15 = vadd.f32 %v6371_v39, %v6370_v52  ;;  %v6373_v10 = vpop.f32.mrb[94].mxu0 }
 0xbd9   :  { %v6374_v14 = vpop.f32.mrb[95].mxu0 }
 0xbda   :  { %v5217_v3 = vadd.f32 %v6372_v15, %v5177_v19 }
 0xbf6   :  { %v6392_v36 = vpop.f32.mrb[96].mxu0 }
 0xbf7   :  { %v6393_v26 = vpop.f32.mrb[97].mxu0 }
 0xbf8   :  { %v6394_v60 = vadd.f32 %v6393_v26, %v6392_v36  ;;  %v6395_v12 = vpop.f32.mrb[98].mxu0 }
 0xbf9   :  { %v6396_v20 = vpop.f32.mrb[99].mxu0 }
 0xbfa   :  { %v5257_v23 = vadd.f32 %v6394_v60, %v5217_v3 }
 0xbfc   :  { %v5297_v29 = vadd.f32 %v6416_v37, %v5257_v23 }
 0xbfe   :  { %v5303_v7 = vsel %vm5302_vm10, %v5297_v29, -inf  ;;  %v5324_v32 = vmul.f32 %v5323_v30, %v5297_v29 }
 0xbff   :  { %v5304_v56 = vrot.slane %v5303_v7, 4 }
 0xc00   :  { %v5325_v62 = vsel %vm5302_vm10, %v5324_v32, 0.0 }
 0xc01   :  { %v5305_v24 = vmax.f32 %v5303_v7, %v5304_v56  ;;  %v5326_v54 = vrot.slane %v5325_v62, 4 }
 0xc03   :  { %v5306_v45 = vrot.slane %v5305_v24, 2  ;;  %v5327_v63 = vadd.f32 %v5326_v54, %v5325_v62 }
 0xc05   :  { %v5307_v5 = vmax.f32 %v5305_v24, %v5306_v45  ;;  %v5328_v49 = vrot.slane %v5327_v63, 2 }
 0xc07   :  { %v5308_v1 = vrot.slane %v5307_v5, 1  ;;  %v5329_v22 = vadd.f32 %v5328_v49, %v5327_v63 }
 0xc09   :  { %v5309_v33 = vmax.f32 %v5307_v5, %v5308_v1  ;;  %v5330_v43 = vrot.slane %v5329_v22, 1 }
 0xc0b   :  { %v5310_v55 = vsub.f32 %v5297_v29, %v5309_v33  ;;  %v5331_v38 = vadd.f32 %v5330_v43, %v5329_v22 }
 0xc0d   :  { %v5311_v9 = vmul.f32 1.442695, %v5310_v55 }
 0xc0f   :  { %7445 = vpow2.f32 %v5311_v9 }
 0xc19   :  { %v7446_v59 = vpop.eup %7445 }
 0xc1a   :  { %v5313_v31 = vsel %vm5302_vm10, %v7446_v59, 0.0 }
 0xc1b   :  { %v5314_v57 = vrot.slane %v5313_v31, 4 }
 0xc1d   :  { %v5315_v42 = vadd.f32 %v5314_v57, %v5313_v31 }
 0xc1f   :  { %v5316_v4 = vrot.slane %v5315_v42, 2 }
 0xc21   :  { %v5317_v2 = vadd.f32 %v5316_v4, %v5315_v42 }
 0xc23   :  { %v5318_v61 = vrot.slane %v5317_v2, 1 }
 0xc25   :  { %v5319_v47 = vadd.f32 %v5318_v61, %v5317_v2 }
 0xc27   :  { %7447 = vlog2.f32 %v5319_v47 }
 0xc31   :  { %v7448_v28 = vpop.eup %7447 }
 0xc32   :  { %v5321_v41 = vmul.f32 0.6931472, %v7448_v28 }
 0xc34   :  { %v5322_v44 = vadd.f32 %v5321_v41, %v5309_v33 }
 0xc36   :  { %v5332_v48 = vsub.f32 %v5322_v44, %v5331_v38 }
 0xc38   :  { %5336 = vst.msk [vmem:[%s9886_s18 + $0x1] sm:$0x1] %vm5334_vm9, %v5332_v48 }

</bundles_post_ra>
